<compile_context>
chip_gen: v7x
topology: tpu7x:2x2x1
jax: 0.10.0
libtpu: 0.0.40
codegen_flags: <defaults>
</compile_context>

<pallas_src>
import math
import functools

import jax
import jax.numpy as jnp
from jax.experimental import pallas as pl
from jax.experimental.pallas import tpu as pltpu

# Highest (fp32) contract precision everywhere so kernel and reference agree.
_HIGHEST = jax.lax.Precision.HIGHEST


def _mab_kernel(q_ref, k_ref,
                wq_ref, bq_ref, wk_ref, bk_ref, wv_ref, bv_ref, wo_ref, bo_ref,
                o_ref, acc_ref, *, num_heads: int, dim_V: int, cast_bf16: bool):
    """One block of TB batch elements per grid step."""
    TB, Nq, dim_Q = q_ref.shape
    _, Nk, dim_K = k_ref.shape
    ds = dim_V // num_heads
    scale = 1.0 / math.sqrt(dim_V)   # PyTorch scales by sqrt(dim_V), not sqrt(head_dim)

    # MXU operands may be cast to bf16 (v6e/v7x); accumulation stays fp32.
    if cast_bf16:
        mxu = lambda x: x.astype(jnp.bfloat16)
    else:
        mxu = lambda x: x

    def mm(a, b):
        return jnp.dot(mxu(a), mxu(b), preferred_element_type=jnp.float32,
                       precision=_HIGHEST)

    # Flatten batch into the M dimension for the projections.
    q2 = q_ref[...].reshape(TB * Nq, dim_Q)          # (TB*Nq, dim_Q)
    k2 = k_ref[...].reshape(TB * Nk, dim_K)          # (TB*Nk, dim_K)

    Qp = mm(q2, wq_ref[...]) + bq_ref[...]
    # Fold the softmax scale into K (K only ever feeds the score matmul).
    Kp = (mm(k2, wk_ref[...]) + bk_ref[...]) * scale
    Vp = mm(k2, wv_ref[...]) + bv_ref[...]

    Qp3 = Qp.reshape(TB, Nq, dim_V)
    Kp3 = Kp.reshape(TB, Nk, dim_V)
    Vp3 = Vp.reshape(TB, Nk, dim_V)

    # Per-head attention, batched over TB via dot_general batch dims (no .T).
    for h in range(num_heads):
        lo, hi = h * ds, (h + 1) * ds
        Qh = Qp3[:, :, lo:hi]                        # (TB, Nq, ds)  fp32
        Kh = Kp3[:, :, lo:hi]                        # (TB, Nk, ds)  fp32 (pre-scaled)
        Vh = Vp3[:, :, lo:hi]                        # (TB, Nk, ds)  fp32

        S = jnp.einsum('bqd,bkd->bqk', mxu(Qh), mxu(Kh),
                       preferred_element_type=jnp.float32,
                       precision=_HIGHEST)                           # (TB, Nq, Nk)
        S = S - jnp.max(S, axis=-1, keepdims=True)
        P = jnp.exp(S)
        # Exact normalization (matches jax.nn.softmax; approx reciprocal removed).
        A = P * (1.0 / jnp.sum(P, axis=-1, keepdims=True))

        Oh = Qh + jnp.einsum('bqk,bkd->bqd', mxu(A), mxu(Vh),
                             preferred_element_type=jnp.float32,
                             precision=_HIGHEST)                     # (TB, Nq, ds)
        # Static-offset store into the scratch accumulator (no lane-axis concat).
        acc_ref[:, lo:hi] = Oh.reshape(TB * Nq, ds)

    # ln0 skipped (ln=False).  O = O + relu(fc_o(O)).  ln1 skipped (ln=False).
    O = acc_ref[...]                                                 # (TB*Nq, dim_V) fp32
    ff = mm(O, wo_ref[...]) + bo_ref[...]
    out = O + jnp.maximum(ff, 0.0)
    o_ref[...] = out.reshape(TB, Nq, dim_V).astype(o_ref.dtype)


def _largest_divisor_leq(n: int, cap: int) -> int:
    cap = max(1, min(cap, n))
    for d in range(cap, 0, -1):
        if n % d == 0:
            return d
    return 1


def mab_forward(Q, K, params, *, num_heads: int, block_b: int = 8,
                cast_bf16: bool = False):
    """Pallas MAB forward. Q: (B, Nq, dim_Q), K: (B, Nk, dim_K) -> (B, Nq, dim_V)."""
    B, Nq, dim_Q = Q.shape
    _, Nk, dim_K = K.shape
    wq, bq, wk, bk, wv, bv, wo, bo = params
    dim_V = wq.shape[1]
    assert dim_V % num_heads == 0

    # Batch-block size: largest divisor of B not exceeding block_b.
    # (On v7x pick block_b so the grid length stays even -> both TensorCores busy.)
    TB = _largest_divisor_leq(B, block_b)
    grid = (B // TB,)

    # Biases as (1, dim_V) rows for clean 2-D VMEM layout / broadcast.
    bq2, bk2, bv2, bo2 = (b.reshape(1, dim_V) for b in (bq, bk, bv, bo))

    kernel = functools.partial(_mab_kernel, num_heads=num_heads, dim_V=dim_V,
                               cast_bf16=cast_bf16)

    def rep(shape):  # weight/bias: same full block for every grid step
        return pl.BlockSpec(shape, lambda b: (0, 0))

    # Advisory cost estimate (helps XLA overlap neighbors around this call).
    flops = B * (2 * Nq * dim_Q * dim_V            # fc_q
                 + 2 * 2 * Nk * dim_K * dim_V      # fc_k + fc_v
                 + 2 * 2 * Nq * Nk * dim_V         # scores + A@V (summed over heads)
                 + 2 * Nq * dim_V * dim_V)         # fc_o
    transcendentals = B * num_heads * Nq * Nk      # exp
    bytes_accessed = ((Q.size + K.size + B * Nq * dim_V) * Q.dtype.itemsize
                      + sum(int(p.size) * p.dtype.itemsize for p in params))

    return pl.pallas_call(
        kernel,
        out_shape=jax.ShapeDtypeStruct((B, Nq, dim_V), Q.dtype),
        grid=grid,
        in_specs=[
            pl.BlockSpec((TB, Nq, dim_Q), lambda b: (b, 0, 0)),   # Q block
            pl.BlockSpec((TB, Nk, dim_K), lambda b: (b, 0, 0)),   # K block
            rep((dim_Q, dim_V)), rep((1, dim_V)),                 # Wq, bq
            rep((dim_K, dim_V)), rep((1, dim_V)),                 # Wk, bk
            rep((dim_K, dim_V)), rep((1, dim_V)),                 # Wv, bv
            rep((dim_V, dim_V)), rep((1, dim_V)),                 # Wo, bo
        ],
        out_specs=pl.BlockSpec((TB, Nq, dim_V), lambda b: (b, 0, 0)),
        scratch_shapes=[pltpu.VMEM((TB * Nq, dim_V), jnp.float32)],
        compiler_params=pltpu.CompilerParams(dimension_semantics=("parallel",)),
        cost_estimate=pl.CostEstimate(flops=flops,
                                      transcendentals=transcendentals,
                                      bytes_accessed=bytes_accessed),
    )(Q, K, wq, bq2, wk, bk2, wv, bv2, wo, bo2)


def mab_reference(Q, K, params, *, num_heads: int):
    """Pure-JAX reference mirroring the PyTorch code exactly (fp32-precision dots)."""
    wq, bq, wk, bk, wv, bv, wo, bo = params
    dim_V = wq.shape[1]
    Qp = jnp.dot(Q, wq, precision=_HIGHEST) + bq
    Kp = jnp.dot(K, wk, precision=_HIGHEST) + bk
    Vp = jnp.dot(K, wv, precision=_HIGHEST) + bv
    ds = dim_V // num_heads
    B = Q.shape[0]
    # torch.cat(X.split(ds, 2), 0): head h of batch b lands at index h*B + b
    split = lambda X: jnp.concatenate(
        [X[:, :, h * ds:(h + 1) * ds] for h in range(num_heads)], axis=0)
    Q_, K_, V_ = split(Qp), split(Kp), split(Vp)
    logits = jnp.einsum("bqd,bkd->bqk", Q_, K_, precision=_HIGHEST) / math.sqrt(dim_V)
    A = jax.nn.softmax(logits, axis=2)
    O_ = Q_ + jnp.einsum("bqk,bkd->bqd", A, V_, precision=_HIGHEST)
    O = jnp.concatenate([O_[h * B:(h + 1) * B] for h in range(num_heads)], axis=2)
    return O + jax.nn.relu(jnp.dot(O, wo, precision=_HIGHEST) + bo)


def init_params(key, dim_Q, dim_K, dim_V):
    """Deterministic nn.Linear-style init (uniform +-1/sqrt(fan_in))."""
    ks = jax.random.split(key, 8)
    def lin(kw, kb, fan_in, fan_out):
        bound = 1.0 / math.sqrt(fan_in)
        w = jax.random.uniform(kw, (fan_in, fan_out), jnp.float32, -bound, bound)
        b = jax.random.uniform(kb, (fan_out,), jnp.float32, -bound, bound)
        return w, b
    wq, bq = lin(ks[0], ks[1], dim_Q, dim_V)
    wk, bk = lin(ks[2], ks[3], dim_K, dim_V)
    wv, bv = lin(ks[4], ks[5], dim_K, dim_V)
    wo, bo = lin(ks[6], ks[7], dim_V, dim_V)
    return (wq, bq, wk, bk, wv, bv, wo, bo)


if __name__ == "__main__":
    # Small shapes: batch=4, seq_q=16, seq_k=8, dim_Q=dim_K=dim_V=32, heads=4.
    B, Nq, Nk = 4, 16, 8
    dim_Q, dim_K, dim_V, num_heads = 32, 32, 32, 4

    key = jax.random.PRNGKey(0)
    kq, kk, kp = jax.random.split(key, 3)
    Q = jax.random.normal(kq, (B, Nq, dim_Q), jnp.float32)
    K = jax.random.normal(kk, (B, Nk, dim_K), jnp.float32)
    params = init_params(kp, dim_Q, dim_K, dim_V)

    # block_b=2 -> TB=2, grid=(2,): multi-step, even grid (keeps 2 TCs busy on v7x).
    out = mab_forward(Q, K, params, num_heads=num_heads, block_b=2)
    out = jax.block_until_ready(out)

    ref = mab_reference(Q, K, params, num_heads=num_heads)
    assert out.shape == (B, Nq, dim_V)
    err = float(jnp.max(jnp.abs(out - ref)))
    assert err < 5e-3, f"mismatch vs JAX reference: max_abs_err={err}"

    print("KERNEL_OK")
</pallas_src>

<mosaic_0001>
module attributes {stable_mosaic.version = 11 : i64} {
  func.func @_mab_kernel(%arg0: i32, %arg1: memref<2x16x32xf32, #tpu.memory_space<vmem>>, %arg2: memref<2x8x32xf32, #tpu.memory_space<vmem>>, %arg3: memref<32x32xf32, #tpu.memory_space<vmem>>, %arg4: memref<1x32xf32, #tpu.memory_space<vmem>>, %arg5: memref<32x32xf32, #tpu.memory_space<vmem>>, %arg6: memref<1x32xf32, #tpu.memory_space<vmem>>, %arg7: memref<32x32xf32, #tpu.memory_space<vmem>>, %arg8: memref<1x32xf32, #tpu.memory_space<vmem>>, %arg9: memref<32x32xf32, #tpu.memory_space<vmem>>, %arg10: memref<1x32xf32, #tpu.memory_space<vmem>>, %arg11: memref<2x16x32xf32, #tpu.memory_space<vmem>>, %arg12: memref<32x32xf32, #tpu.memory_space<vmem>>) attributes {dimension_semantics = [#tpu.dimension_semantics<parallel>], iteration_bounds = array<i64: 2>, scalar_prefetch = 0 : i64, scratch_operands = 1 : i64, tpu.core_type = #tpu.core_type<tc>, window_params = [{transform_indices = @transform_0, window_bounds = array<i64: 2, 16, 32>}, {transform_indices = @transform_1, window_bounds = array<i64: 2, 8, 32>}, {pipeline_mode = #tpu.pipeline_mode<synchronous>, transform_indices = @transform_2, window_bounds = array<i64: 32, 32>}, {pipeline_mode = #tpu.pipeline_mode<synchronous>, transform_indices = @transform_3, window_bounds = array<i64: 1, 32>}, {pipeline_mode = #tpu.pipeline_mode<synchronous>, transform_indices = @transform_4, window_bounds = array<i64: 32, 32>}, {pipeline_mode = #tpu.pipeline_mode<synchronous>, transform_indices = @transform_5, window_bounds = array<i64: 1, 32>}, {pipeline_mode = #tpu.pipeline_mode<synchronous>, transform_indices = @transform_6, window_bounds = array<i64: 32, 32>}, {pipeline_mode = #tpu.pipeline_mode<synchronous>, transform_indices = @transform_7, window_bounds = array<i64: 1, 32>}, {pipeline_mode = #tpu.pipeline_mode<synchronous>, transform_indices = @transform_8, window_bounds = array<i64: 32, 32>}, {pipeline_mode = #tpu.pipeline_mode<synchronous>, transform_indices = @transform_9, window_bounds = array<i64: 1, 32>}, {transform_indices = @transform_10, window_bounds = array<i64: 2, 16, 32>}]} {
    %c0 = arith.constant 0 : index
    %c0_0 = arith.constant 0 : index
    %c0_1 = arith.constant 0 : index
    %0 = vector.load %arg1[%c0, %c0_0, %c0_1] : memref<2x16x32xf32, #tpu.memory_space<vmem>>, vector<2x16x32xf32>
    %1 = vector.shape_cast %0 : vector<2x16x32xf32> to vector<32x32xf32>
    %c0_2 = arith.constant 0 : index
    %c0_3 = arith.constant 0 : index
    %c0_4 = arith.constant 0 : index
    %2 = vector.load %arg2[%c0_2, %c0_3, %c0_4] : memref<2x8x32xf32, #tpu.memory_space<vmem>>, vector<2x8x32xf32>
    %3 = vector.shape_cast %2 : vector<2x8x32xf32> to vector<16x32xf32>
    %c0_5 = arith.constant 0 : index
    %c0_6 = arith.constant 0 : index
    %4 = vector.load %arg3[%c0_5, %c0_6] : memref<32x32xf32, #tpu.memory_space<vmem>>, vector<32x32xf32>
    %cst = arith.constant dense<0.000000e+00> : vector<32x32xf32>
    %5 = tpu.matmul %1, %4, %cst {dimension_numbers = #tpu.dot_dimension_numbers<[1], [0], [0], [1], [0, 0, 1, 1], [], []>, precision = #tpu.contract_precision<fp32>} : vector<32x32xf32>, vector<32x32xf32>, vector<32x32xf32> -> vector<32x32xf32>
    %c0_7 = arith.constant 0 : index
    %c0_8 = arith.constant 0 : index
    %6 = vector.load %arg4[%c0_7, %c0_8] : memref<1x32xf32, #tpu.memory_space<vmem>>, vector<1x32xf32>
    %7 = vector.broadcast %6 : vector<1x32xf32> to vector<32x32xf32>
    %8 = arith.addf %5, %7 : vector<32x32xf32>
    %c0_9 = arith.constant 0 : index
    %c0_10 = arith.constant 0 : index
    %9 = vector.load %arg5[%c0_9, %c0_10] : memref<32x32xf32, #tpu.memory_space<vmem>>, vector<32x32xf32>
    %cst_11 = arith.constant dense<0.000000e+00> : vector<16x32xf32>
    %10 = tpu.matmul %3, %9, %cst_11 {dimension_numbers = #tpu.dot_dimension_numbers<[1], [0], [0], [1], [0, 0, 1, 1], [], []>, precision = #tpu.contract_precision<fp32>} : vector<16x32xf32>, vector<32x32xf32>, vector<16x32xf32> -> vector<16x32xf32>
    %c0_12 = arith.constant 0 : index
    %c0_13 = arith.constant 0 : index
    %11 = vector.load %arg6[%c0_12, %c0_13] : memref<1x32xf32, #tpu.memory_space<vmem>>, vector<1x32xf32>
    %12 = vector.broadcast %11 : vector<1x32xf32> to vector<16x32xf32>
    %13 = arith.addf %10, %12 : vector<16x32xf32>
    %cst_14 = arith.constant 0.176776692 : f32
    %14 = vector.broadcast %cst_14 : f32 to vector<16x32xf32>
    %15 = arith.mulf %13, %14 : vector<16x32xf32>
    %c0_15 = arith.constant 0 : index
    %c0_16 = arith.constant 0 : index
    %16 = vector.load %arg7[%c0_15, %c0_16] : memref<32x32xf32, #tpu.memory_space<vmem>>, vector<32x32xf32>
    %cst_17 = arith.constant dense<0.000000e+00> : vector<16x32xf32>
    %17 = tpu.matmul %3, %16, %cst_17 {dimension_numbers = #tpu.dot_dimension_numbers<[1], [0], [0], [1], [0, 0, 1, 1], [], []>, precision = #tpu.contract_precision<fp32>} : vector<16x32xf32>, vector<32x32xf32>, vector<16x32xf32> -> vector<16x32xf32>
    %c0_18 = arith.constant 0 : index
    %c0_19 = arith.constant 0 : index
    %18 = vector.load %arg8[%c0_18, %c0_19] : memref<1x32xf32, #tpu.memory_space<vmem>>, vector<1x32xf32>
    %19 = vector.broadcast %18 : vector<1x32xf32> to vector<16x32xf32>
    %20 = arith.addf %17, %19 : vector<16x32xf32>
    %21 = vector.shape_cast %8 : vector<32x32xf32> to vector<2x16x32xf32>
    %22 = vector.shape_cast %15 : vector<16x32xf32> to vector<2x8x32xf32>
    %23 = vector.shape_cast %20 : vector<16x32xf32> to vector<2x8x32xf32>
    %24 = vector.extract_strided_slice %21 {offsets = [0, 0, 0], sizes = [2, 16, 8], strides = [1, 1, 1]} : vector<2x16x32xf32> to vector<2x16x8xf32>
    %25 = vector.extract_strided_slice %22 {offsets = [0, 0, 0], sizes = [2, 8, 8], strides = [1, 1, 1]} : vector<2x8x32xf32> to vector<2x8x8xf32>
    %26 = vector.extract_strided_slice %23 {offsets = [0, 0, 0], sizes = [2, 8, 8], strides = [1, 1, 1]} : vector<2x8x32xf32> to vector<2x8x8xf32>
    "tpu.trace_start"() <{level = 10 : i32, message = "bqd,bkd->bqk"}> : () -> ()
    %cst_20 = arith.constant dense<0.000000e+00> : vector<2x16x8xf32>
    %27 = tpu.matmul %24, %25, %cst_20 {dimension_numbers = #tpu.dot_dimension_numbers<[2], [2], [1], [1], [0, 0, 0, 1, 1, 1], [0], [0]>, precision = #tpu.contract_precision<fp32>} : vector<2x16x8xf32>, vector<2x8x8xf32>, vector<2x16x8xf32> -> vector<2x16x8xf32>
    "tpu.trace_stop"() : () -> ()
    %cst_21 = arith.constant dense<0xFF800000> : vector<2x16xf32>
    %28 = vector.multi_reduction <maximumf>, %27, %cst_21 [2] : vector<2x16x8xf32> to vector<2x16xf32>
    %29 = vector.shape_cast %28 : vector<2x16xf32> to vector<2x16x1xf32>
    %30 = vector.broadcast %29 : vector<2x16x1xf32> to vector<2x16x8xf32>
    %31 = arith.subf %27, %30 : vector<2x16x8xf32>
    %32 = math.exp %31 : vector<2x16x8xf32>
    %cst_22 = arith.constant dense<0.000000e+00> : vector<2x16xf32>
    %33 = vector.multi_reduction <add>, %32, %cst_22 [2] : vector<2x16x8xf32> to vector<2x16xf32>
    %34 = vector.shape_cast %33 : vector<2x16xf32> to vector<2x16x1xf32>
    %cst_23 = arith.constant 1.000000e+00 : f32
    %35 = vector.broadcast %cst_23 : f32 to vector<2x16x1xf32>
    %36 = arith.divf %35, %34 : vector<2x16x1xf32>
    %37 = vector.broadcast %36 : vector<2x16x1xf32> to vector<2x16x8xf32>
    %38 = arith.mulf %32, %37 : vector<2x16x8xf32>
    "tpu.trace_start"() <{level = 10 : i32, message = "bqk,bkd->bqd"}> : () -> ()
    %cst_24 = arith.constant dense<0.000000e+00> : vector<2x16x8xf32>
    %39 = tpu.matmul %38, %26, %cst_24 {dimension_numbers = #tpu.dot_dimension_numbers<[2], [1], [1], [2], [0, 0, 0, 1, 1, 2], [0], [0]>, precision = #tpu.contract_precision<fp32>} : vector<2x16x8xf32>, vector<2x8x8xf32>, vector<2x16x8xf32> -> vector<2x16x8xf32>
    "tpu.trace_stop"() : () -> ()
    %40 = arith.addf %24, %39 : vector<2x16x8xf32>
    %41 = vector.shape_cast %40 : vector<2x16x8xf32> to vector<32x8xf32>
    %c0_25 = arith.constant 0 : index
    %c0_26 = arith.constant 0 : index
    %42 = vector.load %arg12[%c0_25, %c0_26] : memref<32x32xf32, #tpu.memory_space<vmem>>, vector<32x8xf32>
    tpu.vector_store %arg12[%c0_25, %c0_26], %41 {strides = array<i32>} : memref<32x32xf32, #tpu.memory_space<vmem>>, vector<32x8xf32>,
    %43 = vector.extract_strided_slice %21 {offsets = [0, 0, 8], sizes = [2, 16, 8], strides = [1, 1, 1]} : vector<2x16x32xf32> to vector<2x16x8xf32>
    %44 = vector.extract_strided_slice %22 {offsets = [0, 0, 8], sizes = [2, 8, 8], strides = [1, 1, 1]} : vector<2x8x32xf32> to vector<2x8x8xf32>
    %45 = vector.extract_strided_slice %23 {offsets = [0, 0, 8], sizes = [2, 8, 8], strides = [1, 1, 1]} : vector<2x8x32xf32> to vector<2x8x8xf32>
    "tpu.trace_start"() <{level = 10 : i32, message = "bqd,bkd->bqk"}> : () -> ()
    %cst_27 = arith.constant dense<0.000000e+00> : vector<2x16x8xf32>
    %46 = tpu.matmul %43, %44, %cst_27 {dimension_numbers = #tpu.dot_dimension_numbers<[2], [2], [1], [1], [0, 0, 0, 1, 1, 1], [0], [0]>, precision = #tpu.contract_precision<fp32>} : vector<2x16x8xf32>, vector<2x8x8xf32>, vector<2x16x8xf32> -> vector<2x16x8xf32>
    "tpu.trace_stop"() : () -> ()
    %cst_28 = arith.constant dense<0xFF800000> : vector<2x16xf32>
    %47 = vector.multi_reduction <maximumf>, %46, %cst_28 [2] : vector<2x16x8xf32> to vector<2x16xf32>
    %48 = vector.shape_cast %47 : vector<2x16xf32> to vector<2x16x1xf32>
    %49 = vector.broadcast %48 : vector<2x16x1xf32> to vector<2x16x8xf32>
    %50 = arith.subf %46, %49 : vector<2x16x8xf32>
    %51 = math.exp %50 : vector<2x16x8xf32>
    %cst_29 = arith.constant dense<0.000000e+00> : vector<2x16xf32>
    %52 = vector.multi_reduction <add>, %51, %cst_29 [2] : vector<2x16x8xf32> to vector<2x16xf32>
    %53 = vector.shape_cast %52 : vector<2x16xf32> to vector<2x16x1xf32>
    %cst_30 = arith.constant 1.000000e+00 : f32
    %54 = vector.broadcast %cst_30 : f32 to vector<2x16x1xf32>
    %55 = arith.divf %54, %53 : vector<2x16x1xf32>
    %56 = vector.broadcast %55 : vector<2x16x1xf32> to vector<2x16x8xf32>
    %57 = arith.mulf %51, %56 : vector<2x16x8xf32>
    "tpu.trace_start"() <{level = 10 : i32, message = "bqk,bkd->bqd"}> : () -> ()
    %cst_31 = arith.constant dense<0.000000e+00> : vector<2x16x8xf32>
    %58 = tpu.matmul %57, %45, %cst_31 {dimension_numbers = #tpu.dot_dimension_numbers<[2], [1], [1], [2], [0, 0, 0, 1, 1, 2], [0], [0]>, precision = #tpu.contract_precision<fp32>} : vector<2x16x8xf32>, vector<2x8x8xf32>, vector<2x16x8xf32> -> vector<2x16x8xf32>
    "tpu.trace_stop"() : () -> ()
    %59 = arith.addf %43, %58 : vector<2x16x8xf32>
    %60 = vector.shape_cast %59 : vector<2x16x8xf32> to vector<32x8xf32>
    %c0_32 = arith.constant 0 : index
    %c8 = arith.constant 8 : index
    %61 = vector.load %arg12[%c0_32, %c8] : memref<32x32xf32, #tpu.memory_space<vmem>>, vector<32x8xf32>
    tpu.vector_store %arg12[%c0_32, %c8], %60 {strides = array<i32>} : memref<32x32xf32, #tpu.memory_space<vmem>>, vector<32x8xf32>,
    %62 = vector.extract_strided_slice %21 {offsets = [0, 0, 16], sizes = [2, 16, 8], strides = [1, 1, 1]} : vector<2x16x32xf32> to vector<2x16x8xf32>
    %63 = vector.extract_strided_slice %22 {offsets = [0, 0, 16], sizes = [2, 8, 8], strides = [1, 1, 1]} : vector<2x8x32xf32> to vector<2x8x8xf32>
    %64 = vector.extract_strided_slice %23 {offsets = [0, 0, 16], sizes = [2, 8, 8], strides = [1, 1, 1]} : vector<2x8x32xf32> to vector<2x8x8xf32>
    "tpu.trace_start"() <{level = 10 : i32, message = "bqd,bkd->bqk"}> : () -> ()
    %cst_33 = arith.constant dense<0.000000e+00> : vector<2x16x8xf32>
    %65 = tpu.matmul %62, %63, %cst_33 {dimension_numbers = #tpu.dot_dimension_numbers<[2], [2], [1], [1], [0, 0, 0, 1, 1, 1], [0], [0]>, precision = #tpu.contract_precision<fp32>} : vector<2x16x8xf32>, vector<2x8x8xf32>, vector<2x16x8xf32> -> vector<2x16x8xf32>
    "tpu.trace_stop"() : () -> ()
    %cst_34 = arith.constant dense<0xFF800000> : vector<2x16xf32>
    %66 = vector.multi_reduction <maximumf>, %65, %cst_34 [2] : vector<2x16x8xf32> to vector<2x16xf32>
    %67 = vector.shape_cast %66 : vector<2x16xf32> to vector<2x16x1xf32>
    %68 = vector.broadcast %67 : vector<2x16x1xf32> to vector<2x16x8xf32>
    %69 = arith.subf %65, %68 : vector<2x16x8xf32>
    %70 = math.exp %69 : vector<2x16x8xf32>
    %cst_35 = arith.constant dense<0.000000e+00> : vector<2x16xf32>
    %71 = vector.multi_reduction <add>, %70, %cst_35 [2] : vector<2x16x8xf32> to vector<2x16xf32>
    %72 = vector.shape_cast %71 : vector<2x16xf32> to vector<2x16x1xf32>
    %cst_36 = arith.constant 1.000000e+00 : f32
    %73 = vector.broadcast %cst_36 : f32 to vector<2x16x1xf32>
    %74 = arith.divf %73, %72 : vector<2x16x1xf32>
    %75 = vector.broadcast %74 : vector<2x16x1xf32> to vector<2x16x8xf32>
    %76 = arith.mulf %70, %75 : vector<2x16x8xf32>
    "tpu.trace_start"() <{level = 10 : i32, message = "bqk,bkd->bqd"}> : () -> ()
    %cst_37 = arith.constant dense<0.000000e+00> : vector<2x16x8xf32>
    %77 = tpu.matmul %76, %64, %cst_37 {dimension_numbers = #tpu.dot_dimension_numbers<[2], [1], [1], [2], [0, 0, 0, 1, 1, 2], [0], [0]>, precision = #tpu.contract_precision<fp32>} : vector<2x16x8xf32>, vector<2x8x8xf32>, vector<2x16x8xf32> -> vector<2x16x8xf32>
    "tpu.trace_stop"() : () -> ()
    %78 = arith.addf %62, %77 : vector<2x16x8xf32>
    %79 = vector.shape_cast %78 : vector<2x16x8xf32> to vector<32x8xf32>
    %c0_38 = arith.constant 0 : index
    %c16 = arith.constant 16 : index
    %80 = vector.load %arg12[%c0_38, %c16] : memref<32x32xf32, #tpu.memory_space<vmem>>, vector<32x8xf32>
    tpu.vector_store %arg12[%c0_38, %c16], %79 {strides = array<i32>} : memref<32x32xf32, #tpu.memory_space<vmem>>, vector<32x8xf32>,
    %81 = vector.extract_strided_slice %21 {offsets = [0, 0, 24], sizes = [2, 16, 8], strides = [1, 1, 1]} : vector<2x16x32xf32> to vector<2x16x8xf32>
    %82 = vector.extract_strided_slice %22 {offsets = [0, 0, 24], sizes = [2, 8, 8], strides = [1, 1, 1]} : vector<2x8x32xf32> to vector<2x8x8xf32>
    %83 = vector.extract_strided_slice %23 {offsets = [0, 0, 24], sizes = [2, 8, 8], strides = [1, 1, 1]} : vector<2x8x32xf32> to vector<2x8x8xf32>
    "tpu.trace_start"() <{level = 10 : i32, message = "bqd,bkd->bqk"}> : () -> ()
    %cst_39 = arith.constant dense<0.000000e+00> : vector<2x16x8xf32>
    %84 = tpu.matmul %81, %82, %cst_39 {dimension_numbers = #tpu.dot_dimension_numbers<[2], [2], [1], [1], [0, 0, 0, 1, 1, 1], [0], [0]>, precision = #tpu.contract_precision<fp32>} : vector<2x16x8xf32>, vector<2x8x8xf32>, vector<2x16x8xf32> -> vector<2x16x8xf32>
    "tpu.trace_stop"() : () -> ()
    %cst_40 = arith.constant dense<0xFF800000> : vector<2x16xf32>
    %85 = vector.multi_reduction <maximumf>, %84, %cst_40 [2] : vector<2x16x8xf32> to vector<2x16xf32>
    %86 = vector.shape_cast %85 : vector<2x16xf32> to vector<2x16x1xf32>
    %87 = vector.broadcast %86 : vector<2x16x1xf32> to vector<2x16x8xf32>
    %88 = arith.subf %84, %87 : vector<2x16x8xf32>
    %89 = math.exp %88 : vector<2x16x8xf32>
    %cst_41 = arith.constant dense<0.000000e+00> : vector<2x16xf32>
    %90 = vector.multi_reduction <add>, %89, %cst_41 [2] : vector<2x16x8xf32> to vector<2x16xf32>
    %91 = vector.shape_cast %90 : vector<2x16xf32> to vector<2x16x1xf32>
    %cst_42 = arith.constant 1.000000e+00 : f32
    %92 = vector.broadcast %cst_42 : f32 to vector<2x16x1xf32>
    %93 = arith.divf %92, %91 : vector<2x16x1xf32>
    %94 = vector.broadcast %93 : vector<2x16x1xf32> to vector<2x16x8xf32>
    %95 = arith.mulf %89, %94 : vector<2x16x8xf32>
    "tpu.trace_start"() <{level = 10 : i32, message = "bqk,bkd->bqd"}> : () -> ()
    %cst_43 = arith.constant dense<0.000000e+00> : vector<2x16x8xf32>
    %96 = tpu.matmul %95, %83, %cst_43 {dimension_numbers = #tpu.dot_dimension_numbers<[2], [1], [1], [2], [0, 0, 0, 1, 1, 2], [0], [0]>, precision = #tpu.contract_precision<fp32>} : vector<2x16x8xf32>, vector<2x8x8xf32>, vector<2x16x8xf32> -> vector<2x16x8xf32>
    "tpu.trace_stop"() : () -> ()
    %97 = arith.addf %81, %96 : vector<2x16x8xf32>
    %98 = vector.shape_cast %97 : vector<2x16x8xf32> to vector<32x8xf32>
    %c0_44 = arith.constant 0 : index
    %c24 = arith.constant 24 : index
    %99 = vector.load %arg12[%c0_44, %c24] : memref<32x32xf32, #tpu.memory_space<vmem>>, vector<32x8xf32>
    tpu.vector_store %arg12[%c0_44, %c24], %98 {strides = array<i32>} : memref<32x32xf32, #tpu.memory_space<vmem>>, vector<32x8xf32>,
    %c0_45 = arith.constant 0 : index
    %c0_46 = arith.constant 0 : index
    %100 = vector.load %arg12[%c0_45, %c0_46] : memref<32x32xf32, #tpu.memory_space<vmem>>, vector<32x32xf32>
    %c0_47 = arith.constant 0 : index
    %c0_48 = arith.constant 0 : index
    %101 = vector.load %arg9[%c0_47, %c0_48] : memref<32x32xf32, #tpu.memory_space<vmem>>, vector<32x32xf32>
    %cst_49 = arith.constant dense<0.000000e+00> : vector<32x32xf32>
    %102 = tpu.matmul %100, %101, %cst_49 {dimension_numbers = #tpu.dot_dimension_numbers<[1], [0], [0], [1], [0, 0, 1, 1], [], []>, precision = #tpu.contract_precision<fp32>} : vector<32x32xf32>, vector<32x32xf32>, vector<32x32xf32> -> vector<32x32xf32>
    %c0_50 = arith.constant 0 : index
    %c0_51 = arith.constant 0 : index
    %103 = vector.load %arg10[%c0_50, %c0_51] : memref<1x32xf32, #tpu.memory_space<vmem>>, vector<1x32xf32>
    %104 = vector.broadcast %103 : vector<1x32xf32> to vector<32x32xf32>
    %105 = arith.addf %102, %104 : vector<32x32xf32>
    %cst_52 = arith.constant 0.000000e+00 : f32
    %106 = vector.broadcast %cst_52 : f32 to vector<32x32xf32>
    %107 = arith.maximumf %105, %106 : vector<32x32xf32>
    %108 = arith.addf %100, %107 : vector<32x32xf32>
    %109 = vector.shape_cast %108 : vector<32x32xf32> to vector<2x16x32xf32>
    %c0_53 = arith.constant 0 : index
    %c0_54 = arith.constant 0 : index
    %c0_55 = arith.constant 0 : index
    %110 = vector.load %arg11[%c0_53, %c0_54, %c0_55] : memref<2x16x32xf32, #tpu.memory_space<vmem>>, vector<2x16x32xf32>
    tpu.vector_store %arg11[%c0_53, %c0_54, %c0_55], %109 {strides = array<i32>} : memref<2x16x32xf32, #tpu.memory_space<vmem>>, vector<2x16x32xf32>,
    return
  }
  func.func @transform_0(%arg0: i32) -> (i32, i32, i32) {
    %c0_i32 = arith.constant 0 : i32
    %c0_i32_0 = arith.constant 0 : i32
    %c0_i32_1 = arith.constant 0 : i32
    return %arg0, %c0_i32, %c0_i32_0 : i32, i32, i32
  }
  func.func @transform_1(%arg0: i32) -> (i32, i32, i32) {
    %c0_i32 = arith.constant 0 : i32
    %c0_i32_0 = arith.constant 0 : i32
    %c0_i32_1 = arith.constant 0 : i32
    return %arg0, %c0_i32, %c0_i32_0 : i32, i32, i32
  }
  func.func @transform_2(%arg0: i32) -> (i32, i32) {
    %c0_i32 = arith.constant 0 : i32
    %c0_i32_0 = arith.constant 0 : i32
    %c0_i32_1 = arith.constant 0 : i32
    return %c0_i32, %c0_i32_0 : i32, i32
  }
  func.func @transform_3(%arg0: i32) -> (i32, i32) {
    %c0_i32 = arith.constant 0 : i32
    %c0_i32_0 = arith.constant 0 : i32
    %c0_i32_1 = arith.constant 0 : i32
    return %c0_i32, %c0_i32_0 : i32, i32
  }
  func.func @transform_4(%arg0: i32) -> (i32, i32) {
    %c0_i32 = arith.constant 0 : i32
    %c0_i32_0 = arith.constant 0 : i32
    %c0_i32_1 = arith.constant 0 : i32
    return %c0_i32, %c0_i32_0 : i32, i32
  }
  func.func @transform_5(%arg0: i32) -> (i32, i32) {
    %c0_i32 = arith.constant 0 : i32
    %c0_i32_0 = arith.constant 0 : i32
    %c0_i32_1 = arith.constant 0 : i32
    return %c0_i32, %c0_i32_0 : i32, i32
  }
  func.func @transform_6(%arg0: i32) -> (i32, i32) {
    %c0_i32 = arith.constant 0 : i32
    %c0_i32_0 = arith.constant 0 : i32
    %c0_i32_1 = arith.constant 0 : i32
    return %c0_i32, %c0_i32_0 : i32, i32
  }
  func.func @transform_7(%arg0: i32) -> (i32, i32) {
    %c0_i32 = arith.constant 0 : i32
    %c0_i32_0 = arith.constant 0 : i32
    %c0_i32_1 = arith.constant 0 : i32
    return %c0_i32, %c0_i32_0 : i32, i32
  }
  func.func @transform_8(%arg0: i32) -> (i32, i32) {
    %c0_i32 = arith.constant 0 : i32
    %c0_i32_0 = arith.constant 0 : i32
    %c0_i32_1 = arith.constant 0 : i32
    return %c0_i32, %c0_i32_0 : i32, i32
  }
  func.func @transform_9(%arg0: i32) -> (i32, i32) {
    %c0_i32 = arith.constant 0 : i32
    %c0_i32_0 = arith.constant 0 : i32
    %c0_i32_1 = arith.constant 0 : i32
    return %c0_i32, %c0_i32_0 : i32, i32
  }
  func.func @transform_10(%arg0: i32) -> (i32, i32, i32) {
    %c0_i32 = arith.constant 0 : i32
    %c0_i32_0 = arith.constant 0 : i32
    %c0_i32_1 = arith.constant 0 : i32
    return %arg0, %c0_i32, %c0_i32_0 : i32, i32, i32
  }
}

</mosaic_0001>

<bundles_post_ra>
// kernel: tpu_custom_call.1
= control target key start
LH: loop header
LB: loop body
LE: loop exit
PB: predicated region body
PF: predicated region fallthrough
CT: control target
= control target key end

     0   :  { %s14615_s0 = inlined_call_operand.hbm [shape: f32[4,16,32], index: 0, kind: input, shape index: {}]   ;;  %s14616_s1 = inlined_call_operand.hbm [shape: f32[4,8,32], index: 1, kind: input, shape index: {}]   ;;  %s14617_s2 = inlined_call_operand.hbm [shape: f32[32,32], index: 2, kind: input, shape index: {}]   ;;  %s14618_s3 = inlined_call_operand.vmem [shape: f32[1,32], index: 3, kind: input, shape index: {}]   ;;  %s14619_s4 = inlined_call_operand.hbm [shape: f32[32,32], index: 4, kind: input, shape index: {}]   ;;  %s14620_s5 = inlined_call_operand.vmem [shape: f32[1,32], index: 5, kind: input, shape index: {}]   ;;  %s14621_s6 = inlined_call_operand.hbm [shape: f32[32,32], index: 6, kind: input, shape index: {}]   ;;  %s14622_s7 = inlined_call_operand.vmem [shape: f32[1,32], index: 7, kind: input, shape index: {}]   ;;  %s14623_s8 = inlined_call_operand.hbm [shape: f32[32,32], index: 8, kind: input, shape index: {}]   ;;  %s14624_s9 = inlined_call_operand.vmem [shape: f32[1,32], index: 9, kind: input, shape index: {}]   ;;  %s14625_s10 = inlined_call_operand.hbm [shape: f32[4,16,32], index: 10, kind: output, shape index: {}]  }
   0x1   :  { %14636 = sst [smem:[#allocation23_spill]] %s14615_s0 }
   0x2   :  { %14637 = sst [smem:[#allocation24_spill]] %s14617_s2 }
   0x3   :  { %14638 = sst [smem:[#allocation25_spill]] %s14619_s4 }
   0x4   :  { %14639 = sst [smem:[#allocation26_spill]] %s14621_s6 }
   0x5   :  { %14640 = sst [smem:[#allocation27_spill]] %s14624_s9 }
   0x6   :  { %14641 = sst [smem:[#allocation28_spill]] %s14625_s10 }
   0x7   :  { %15 = vsyncpa [#allocation4], 0 }
   0x8   :  { %17 = vsyncpa [#allocation4 + $0x1], 0 }
   0x9   :  { %18 = vsyncpa [#allocation7], 0 }
   0xa   :  { %20 = vsyncpa [#allocation7 + $0x1], 0 }
   0xb   :  { %21 = vsyncpa [#allocation10], 0 }
   0xc   :  { %22 = vsyncpa [#allocation13], 0 }
   0xd   :  { %23 = vsyncpa [#allocation5], 0 }
   0xe   :  { %25 = vsyncpa [#allocation5 + $0x1], 0  ;;  %s13459_s13 = smov 0   ;;  %s13461_s14 = smov 0  }
   0xf   :  { %s13463_s15 = smov 0   ;;  %s13465_s16 = smov 0  }
  0x10 LB: > { %14642 = sst [smem:[#allocation21_spill]] %s13374_s13  ;;  %s13480_s17 = sadd.s32 4294967295, %s13386_s16   ;;  %s13386_s16 = sphi %s13465_s16, %s14676_s16   ;;  %s13382_s15 = sphi %s13463_s15, %s14675_s15   ;;  %s13378_s14 = sphi %s13461_s14, %s14674_s14   ;;  %s13374_s13 = sphi %s13459_s13, %s14673_s13  }
  0x11   : > { %s11270_s18 = sadd.s32 4294967294, %s13386_s16   ;;  %p51_p0 = scmp.ne.s32.totalorder %s13378_s14, %s13374_s13 }
  0x12   : > { %p14626_p1 = scmp.eq.s32.totalorder %s13480_s17, 0  ;;  %p275_p3 = scmp.eq.s32.totalorder %s11270_s18, 1 }
  0x13   : > { %p11271_p5 = scmp.ge.s32.totalorder %s13386_s16, 1  ;;  %p282_p7 = scmp.lt.s32.totalorder %s13386_s16, 3 }
  0x14   : > { %p13489_p4 = por %p14626_p1, %p51_p0  ;;  %p13494_p6 = por %p275_p3, %p51_p0 }
  0x15   : > { %p13499_p8 = pnand %p11271_p5, %p282_p7  ;;  %s13388_s22 = smov [#allocation8]  }
  0x16   : > { %s14643_s19 = scalar_select %p13489_p4, 1, 0 }
  0x17   : > { %s14644_s20 = scalar_select %p13494_p6, 1, 0 }
  0x18   : > { %s14646_s21 = scalar_select %p13499_p8, 1, 0 }
  0x19   : > { %14645 = sst [smem:[#allocation22_spill]] %s14644_s20  ;;  %s294_s23 = sshll.u32 %s13388_s22, 4  ;;  %s13503_s23 = int_to_ptr.vmem [resolvable:$true] %s294_s23 }
  0x1a   : > { %p12989_p9 = pneg %p13499_p8  ;;  %s13389_s25 = smov [#allocation9]  }
  0x1b   : > { %s310_s26 = sshll.u32 %s13389_s25, 4  ;;  %s13390_s27 = smov [#allocation11]   ;;  %s13514_s26 = int_to_ptr.vmem [resolvable:$true] %s310_s26 }
  0x1c   : > { %p13510_p11 = pnand %p12989_p9, %p14626_p1  ;;  %s13516_s28 = sshll.u32 %s13390_s27, 4  ;;  %s327_s28 = int_to_ptr.vmem [resolvable:$true] %s13516_s28 }
  0x1d   : > { %s14648_s2 = sld [smem:[#allocation24_spill]] }
  0x1e   : > { %p13526_p13 = pneg %p13510_p11 }
  0x23   : > { %s13132_s11 = scalar_lea.hbm %s14648_s2, 512 }
  0x24   : > { %p13133_p12 = scmp.ne.s32.totalorder %s14648_s2, %s13132_s11  ;;  %p13139_p5 = scmp.lt.u32.totalorder %s13132_s11, %s14648_s2 }
  0x26   : > { %p13135_p0 = pnand %p13526_p13, %p13133_p12 }
  0x28   : > { %p13136_p3 = pneg %p13135_p0 }
  0x2a   : > { %p13141_p7 = pnand %p13139_p5, %p13136_p3 }
  0x2c   : > { %13144 = shalt.err (!%p13141_p7)
}
  0x2d   : > { %s13145_s29 = scalar_lea.vmem %s13503_s23, 512  ;;  %p13153_p2 = scmp.lt.s32.totalorder %s13503_s23, %s13503_s23 }
  0x2e   : > { %p13146_p9 = scmp.ne.s32.totalorder %s13503_s23, %s13145_s29  ;;  %p13154_p6 = scmp.lt.s32.totalorder %s13145_s29, %s13145_s29 }
  0x30   : > { %p13148_p10 = pnand %p13146_p9, %p13526_p13  ;;  %p13155_p12 = por %p13154_p6, %p13153_p2 }
  0x32   : > { %p13149_p1 = pneg %p13148_p10 }
  0x34   : > { %p13156_p0 = pnand %p13155_p12, %p13149_p1 }
  0x36   : > { %13159 = shalt.err (!%p13156_p0)
}
  0x37   : > { %s14632_s30 = smov 128   ;;  %s14634_s11 = smov 8  }
  0x38   : > { %12992 = dma.hbm_to_vmem [thread:$0]  (!%p13510_p11), %s14648_s2, 512, %s13503_s23, [#allocation7], %s14632_s30, %s14632_s30, %s14634_s11  }
  0x39   : > { %s14650_s4 = sld [smem:[#allocation25_spill]] }
  0x3f   : > { %s13160_s29 = scalar_lea.hbm %s14650_s4, 512 }
  0x40   : > { %p13161_p1 = scmp.ne.s32.totalorder %s14650_s4, %s13160_s29  ;;  %p13167_p10 = scmp.lt.u32.totalorder %s13160_s29, %s14650_s4 }
  0x42   : > { %p13163_p2 = pnand %p13161_p1, %p13526_p13 }
  0x44   : > { %p13164_p6 = pneg %p13163_p2 }
  0x46   : > { %p13169_p3 = pnand %p13167_p10, %p13164_p6 }
  0x48   : > { %13172 = shalt.err (!%p13169_p3)
}
  0x49   : > { %s13173_s23 = scalar_lea.vmem %s13514_s26, 512  ;;  %p13181_p12 = scmp.lt.s32.totalorder %s13514_s26, %s13514_s26 }
  0x4a   : > { %p13174_p5 = scmp.ne.s32.totalorder %s13514_s26, %s13173_s23  ;;  %p13182_p0 = scmp.lt.s32.totalorder %s13173_s23, %s13173_s23 }
  0x4c   : > { %p13176_p7 = pnand %p13174_p5, %p13526_p13  ;;  %p13183_p1 = por %p13182_p0, %p13181_p12 }
  0x4e   : > { %p13177_p9 = pneg %p13176_p7 }
  0x50   : > { %p13184_p2 = pnand %p13183_p1, %p13177_p9 }
  0x52   : > { %13187 = shalt.err (!%p13184_p2)
}
  0x53   : > { %12995 = dma.hbm_to_vmem [thread:$0]  (!%p13510_p11), %s14650_s4, 512, %s13514_s26, [#allocation10], %s14632_s30, %s14632_s30, %s14634_s11  }
  0x54   : > { %s14651_s6 = sld [smem:[#allocation26_spill]] }
  0x5a   : > { %s13188_s12 = scalar_lea.hbm %s14651_s6, 512 }
  0x5b   : > { %p13189_p6 = scmp.ne.s32.totalorder %s14651_s6, %s13188_s12  ;;  %p13195_p5 = scmp.lt.u32.totalorder %s13188_s12, %s14651_s6 }
  0x5d   : > { %p13191_p10 = pnand %p13189_p6, %p13526_p13 }
  0x5f   : > { %p13192_p3 = pneg %p13191_p10 }
  0x61   : > { %p13197_p7 = pnand %p13195_p5, %p13192_p3 }
  0x63   : > { %13200 = shalt.err (!%p13197_p7)
}
  0x64   : > { %s13201_s23 = scalar_lea.vmem %s327_s28, 512  ;;  %p13209_p1 = scmp.lt.s32.totalorder %s327_s28, %s327_s28 }
  0x65   : > { %p13202_p9 = scmp.ne.s32.totalorder %s327_s28, %s13201_s23  ;;  %p13210_p2 = scmp.lt.s32.totalorder %s13201_s23, %s13201_s23 }
  0x67   : > { %p13204_p12 = pnand %p13202_p9, %p13526_p13  ;;  %p13211_p4 = por %p13210_p2, %p13209_p1 }
  0x69   : > { %p13205_p0 = pneg %p13204_p12 }
  0x6b   : > { %p13212_p8 = pnand %p13211_p4, %p13205_p0 }
  0x6d   : > { %13215 = shalt.err (!%p13212_p8)
}
  0x6e   : > { %12998 = dma.hbm_to_vmem [thread:$0]  (!%p13510_p11), %s14651_s6, 512, %s327_s28, [#allocation10], %s14632_s30, %s14632_s30, %s14634_s11  }
  0x6f   : > { %s13393_s10 = smov [#allocation12]   ;;  %s13216_s18 = scalar_lea.hbm %s14623_s8, 512 }
  0x70   : > { %s342_s13 = sshll.u32 %s13393_s10, 4  ;;  %p13217_p4 = scmp.ne.s32.totalorder %s14623_s8, %s13216_s18  ;;  %s343_s13 = int_to_ptr.vmem [resolvable:$true] %s342_s13 }
  0x71   : > { %p13223_p10 = scmp.lt.u32.totalorder %s13216_s18, %s14623_s8 }
  0x72   : > { %p13219_p8 = pnand %p13217_p4, %p13526_p13 }
  0x74   : > { %p13220_p6 = pneg %p13219_p8 }
  0x76   : > { %p13225_p3 = pnand %p13223_p10, %p13220_p6 }
  0x78   : > { %13228 = shalt.err (!%p13225_p3)
}
  0x79   : > { %s13229_s28 = scalar_lea.vmem %s343_s13, 512  ;;  %p13237_p12 = scmp.lt.s32.totalorder %s343_s13, %s343_s13 }
  0x7a   : > { %p13230_p5 = scmp.ne.s32.totalorder %s343_s13, %s13229_s28  ;;  %p13238_p0 = scmp.lt.s32.totalorder %s13229_s28, %s13229_s28 }
  0x7c   : > { %p13232_p7 = pnand %p13230_p5, %p13526_p13  ;;  %p13239_p1 = por %p13238_p0, %p13237_p12 }
  0x7e   : > { %p13233_p9 = pneg %p13232_p7 }
  0x80   : > { %p13240_p2 = pnand %p13239_p1, %p13233_p9 }
  0x82   : > { %13243 = shalt.err (!%p13240_p2)
}
  0x83   : > { %13001 = dma.hbm_to_vmem [thread:$0]  (!%p13510_p11), %s14623_s8, 512, %s343_s13, [#allocation13], %s14632_s30, %s14632_s30, %s14634_s11  }
  0x84   : > { %s13620_s22 = sadd.s32 1, %s13386_s16   ;;  %s38_s24 = sadd.s32 1, %s13382_s15 }
  0x85   : > { %s35_s10 = ssub.s32 %s13386_s16, %s13620_s22  ;;  %p45_p13 = scmp.ne.s32.totalorder %s13382_s15, %s13378_s14 }
  0x86   : > { %p36_p4 = scmp.eq.s32.totalorder %s35_s10, 0  ;;  %p46_p8 = scmp.eq.s32.totalorder %s13386_s16, 0 }
  0x87   : > { %p14652_p6 = scmp.eq.s32.totalorder %s13480_s17, 1  ;;  %p13017_p3 = scmp.lt.s32.totalorder %s13386_s16, 2 }
  0x88   : > { %s13636_s12 = scalar_select %p36_p4, %s13382_s15, %s38_s24  }
  0x89   : > { %p13630_p10 = por %p14652_p6, %p45_p13  ;;  %p47_p5 = por %p46_p8, %p45_p13 }
  0x8a   : > { %s13639_s18 = sand.u32 1, %s13382_s15   ;;  %s11303_s25 = sshll.u32 %s13386_s16, 9 }
  0x8b   : > { %s11277_s13 = sshll.u32 %s13639_s18, 5  ;;  %s14654_s0 = sld [smem:[#allocation23_spill]] }
  0x8c   : > { %s363_s28 = scalar_lea.vmem [#allocation3], %s11277_s13  ;;  %p13650_p11 = pnand %p13017_p3, %p47_p5 }
  0x8d   : > { %s371_s26 = sshll.u32 %s363_s28, 4  ;;  %s11281_s10 = sshll.u32 %s13639_s18, 4  ;;  %s13648_s26 = int_to_ptr.vmem [resolvable:$true] %s371_s26 }
  0x8e   : > { %s360_s30 = scalar_lea.sflag [#allocation4], %s13639_s18  ;;  %p13246_p9 = pneg %p13650_p11 }
  0x91   : > { %s13646_s23 = scalar_lea.hbm %s14654_s0, %s11303_s25  ;;  %s13249_s29 = scalar_lea.hbm %s14654_s0, 1024 }
  0x92   : > { %s13244_s27 = scalar_lea.hbm %s13646_s23, 512  ;;  %p13250_p1 = scmp.lt.u32.totalorder %s13646_s23, %s14654_s0 }
  0x93   : > { %p13245_p7 = scmp.ne.s32.totalorder %s13646_s23, %s13244_s27  ;;  %p13251_p2 = scmp.lt.u32.totalorder %s13249_s29, %s13244_s27 }
  0x94   : > { %p13253_p4 = scmp.lt.u32.totalorder %s13244_s27, %s13646_s23 }
  0x95   : > { %p13247_p12 = pnand %p13246_p9, %p13245_p7  ;;  %p13252_p13 = por %p13251_p2, %p13250_p1 }
  0x97   : > { %p13248_p0 = pneg %p13247_p12  ;;  %p13254_p8 = por %p13253_p4, %p13252_p13 }
  0x99   : > { %p13255_p6 = pnand %p13254_p8, %p13248_p0 }
  0x9b   : > { %13258 = shalt.err (!%p13255_p6)
}
  0x9c   : > { %s13259_s24 = scalar_lea.vmem %s13648_s26, 512  ;;  %s13394_s13 = smov [#allocation3]  }
  0x9d   : > { %p13260_p3 = scmp.ne.s32.totalorder %s13648_s26, %s13259_s24  ;;  %s13264_s25 = sshll.u32 %s13394_s13, 4  ;;  %s13265_s25 = int_to_ptr.vmem [resolvable:$false] %s13264_s25 }
  0x9e   : > { %s13266_s11 = scalar_lea.vmem %s13265_s25, 1024  ;;  %p13267_p12 = scmp.lt.s32.totalorder %s13648_s26, %s13265_s25 }
  0x9f   : > { %p13262_p5 = pnand %p13260_p3, %p13246_p9  ;;  %p13268_p1 = scmp.lt.s32.totalorder %s13266_s11, %s13259_s24 }
  0xa1   : > { %p13263_p7 = pneg %p13262_p5  ;;  %p13269_p2 = por %p13268_p1, %p13267_p12 }
  0xa3   : > { %p13270_p13 = pnand %p13269_p2, %p13263_p7 }
  0xa5   : > { %13273 = shalt.err (!%p13270_p13)
}
  0xa6   : > { %s14656_s27 = smov 8   ;;  %s14657_s29 = smov 128  }
  0xa7   : > { %13005 = dma.hbm_to_vmem [thread:$0]  (!%p13650_p11), %s13646_s23, 512, %s13648_s26, %s360_s30, %s14657_s29, %s14657_s29, %s14656_s27  }
  0xa8   : > { %s11304_s28 = sshll.u32 %s13386_s16, 8  ;;  %s385_s11 = scalar_lea.vmem [#allocation6], %s11281_s10 }
  0xa9   : > { %s13691_s25 = scalar_lea.hbm %s14616_s1, %s11304_s28  ;;  %s392_s0 = sshll.u32 %s385_s11, 4  ;;  %s13695_s0 = int_to_ptr.vmem [resolvable:$true] %s392_s0 }
  0xaa   : > { %s14658_s2 = sand.u32 1, %s13386_s16   ;;  %s13274_s6 = scalar_lea.hbm %s13691_s25, 256 }
  0xab   : > { %s13699_s4 = scalar_lea.sflag [#allocation7], %s14658_s2  ;;  %p13275_p0 = scmp.ne.s32.totalorder %s13691_s25, %s13274_s6 }
  0xac   : > { %s13279_s18 = scalar_lea.hbm %s14616_s1, 512  ;;  %p13280_p6 = scmp.lt.u32.totalorder %s13691_s25, %s14616_s1 }
  0xad   : > { %p13277_p4 = pnand %p13275_p0, %p13246_p9  ;;  %p13281_p3 = scmp.lt.u32.totalorder %s13279_s18, %s13274_s6 }
  0xae   : > { %p13283_p7 = scmp.lt.u32.totalorder %s13274_s6, %s13691_s25 }
  0xaf   : > { %p13278_p8 = pneg %p13277_p4  ;;  %p13282_p5 = por %p13281_p3, %p13280_p6 }
  0xb1   : > { %p13284_p12 = por %p13283_p7, %p13282_p5 }
  0xb3   : > { %p13285_p1 = pnand %p13284_p12, %p13278_p8 }
  0xb5   : > { %13288 = shalt.err (!%p13285_p1)
}
  0xb6   : > { %s13289_s2 = scalar_lea.vmem %s13695_s0, 256  ;;  %s13395_s10 = smov [#allocation6]  }
  0xb7   : > { %p13290_p2 = scmp.ne.s32.totalorder %s13695_s0, %s13289_s2  ;;  %s13294_s13 = sshll.u32 %s13395_s10, 4  ;;  %s13295_s13 = int_to_ptr.vmem [resolvable:$false] %s13294_s13 }
  0xb8   : > { %s13296_s24 = scalar_lea.vmem %s13295_s13, 512  ;;  %p13297_p4 = scmp.lt.s32.totalorder %s13695_s0, %s13295_s13 }
  0xb9   : > { %p13292_p13 = pnand %p13290_p2, %p13246_p9  ;;  %p13298_p6 = scmp.lt.s32.totalorder %s13296_s24, %s13289_s2 }
  0xbb   : > { %p13293_p0 = pneg %p13292_p13  ;;  %p13299_p3 = por %p13298_p6, %p13297_p4 }
  0xbd   : > { %p13300_p5 = pnand %p13299_p3, %p13293_p0 }
  0xbf   : > { %13303 = shalt.err (!%p13300_p5)
}
  0xc0   : > { %13008 = dma.hbm_to_vmem [thread:$0]  (!%p13650_p11), %s13691_s25, 256, %s13695_s0, %s13699_s4, %s14657_s29, %s14657_s29, %s14656_s27  }
  0xc1   : > { %p14659_p9 = scmp.ne.s32.totalorder %s14646_s21, 0 }
  0xc2   : > { %s13731_s6 = sand.u32 (!%p14659_p9), 1, %s13378_s14   ;;  %p14660_p8 = scmp.ne.s32.totalorder (!%p14659_p9), %s14643_s19, 0 }
  0xc3   : > { %404 = sbr.rel (%p14659_p9) target bundleno = 3686 (0xe66), region = 60  ;;  %s11285_s11 = sshll.u32 (!%p14659_p9), %s13731_s6, 5 }
  0xc4   : > { %s407_s30 = scalar_lea.sflag (!%p14659_p9), [#allocation4], %s13731_s6  ;;  %s410_s9 = scalar_lea.vmem (!%p14659_p9), [#allocation3], %s11285_s11 }
  0xca   : > { %13349 = dma.done.wait (%p14660_p8), %s407_s30, 512  }
  0xcb   : > { %13351 = vsyncadd (%p14660_p8), %s407_s30, 4294966784  ;;  %s415_s0 = sand.u32 1, %s13480_s17   ;;  %s11286_s4 = sshll.u32 %s13731_s6, 4 }
  0xcc   : > { %s416_s21 = scalar_lea.sflag [#allocation7], %s415_s0  ;;  %s13743_s27 = scalar_lea.vmem [#allocation6], %s11286_s4 }
  0xcd   : > { %13353 = dma.done.wait (%p14660_p8), %s416_s21, 256  }
  0xce   : > { %13355 = vsyncadd (%p14660_p8), %s416_s21, 4294967040  ;;  %p14661_p11 = scmp.eq.s32.totalorder %s13480_s17, 0 }
  0xd0   : > { %13357 = dma.done.wait (%p14661_p11), [#allocation7], 512   ;;  %p14662_p7 = pmov %p14661_p11 }
  0xd2   : > { %13359 = vsyncadd (%p14662_p7), [#allocation7], 4294966784  ;;  %p14663_p12 = pmov %p14662_p7 }
  0xd3   : > { %p14664_p1 = pmov %p14662_p7 }
  0xd4   : > { %13361 = dma.done.wait (%p14663_p12), [#allocation10], 1024  }
  0xd5   : > { %13363 = vsyncadd (%p14664_p1), [#allocation10], 4294966272  ;;  %p14665_p2 = pmov %p14664_p1 }
  0xd6   : > { %p14666_p13 = pmov %p14664_p1 }
  0xd7   : > { %13365 = dma.done.wait (%p14665_p2), [#allocation13], 512  }
  0xd8   : > { %13367 = vsyncadd (%p14666_p13), [#allocation13], 4294966784  ;;  %vm497_vm0 = vcmask 261120   ;;  %v486_v0 = vld [vmem:[#allocation8] sm:$0xff]  ;;  %v487_v1 = vld [vmem:[#allocation8 + $0x8] sm:$0xff]  ;;  %vm2210_vm1 = vcmask 64512  }
  0xd9   : > { %v488_v2 = vld [vmem:[#allocation8 + $0x10] sm:$0xff]  ;;  %v511_v3 = vand.u32 4294901760, %v486_v0  ;;  %v514_v4 = vand.u32 4294901760, %v487_v1  ;;  %v489_v5 = vld [vmem:[#allocation8 + $0x18] sm:$0xff]  ;;  %v480_v7 = vld [vmem:[%s410_s9] sm:$0xff]  ;;  %s13396_s28 = smov 120  }
  0xda   : > { %v517_v6 = vand.u32 4294901760, %v488_v2  ;;  %v481_v8 = vld [vmem:[%s410_s9 + $0x8] sm:$0xff]  ;;  %v520_v9 = vand.u32 4294901760, %v489_v5  ;;  %v499_v10 = vsel %vm497_vm0, %v480_v7, 0  ;;  %v482_v12 = vld [vmem:[%s410_s9 + $0x10] sm:$0xff]  ;;  %v483_v13 = vld [vmem:[%s410_s9 + $0x18] sm:$0xff] }
  0xdb   : > { %v502_v11 = vsel %vm497_vm0, %v481_v8, 0  ;;  %v13763_v14 = vpack.c.bf16 %v514_v4, %v511_v3  ;;  %v13765_v15 = vand.u32 4294901760, %v499_v10  ;;  %v13769_v17 = vsub.f32 %v486_v0, %v511_v3  ;;  %v13814_v46 = vld [vmem:[#allocation9] sm:$0xff]  ;;  %v13817_v50 = vld [vmem:[#allocation9 + $0x8] sm:$0xff]  ;;  %v1126_v60 = vld [vmem:[#allocation9 + $0x10] sm:$0xff]  ;;  %s13397_s2 = smov 112  }
  0xdc   : > { %v13767_v16 = vand.u32 4294901760, %v502_v11  ;;  %v13771_v18 = vpack.c.bf16 %v520_v9, %v517_v6  ;;  %v628_v19 = vsub.f32 %v487_v1, %v514_v4  ;;  %v505_v20 = vsel %vm497_vm0, %v482_v12, 0  ;;  %v484_v55 = vld [vmem:[%s13743_s27] sm:$0xff]  ;;  %v485_v56 = vld [vmem:[%s13743_s27 + $0x8] sm:$0xff]  ;;  %s13398_s10 = smov 104   ;;  %s13399_s13 = smov 8  }
  0xdd   : > { %v508_v21 = vsel %vm497_vm0, %v483_v13, 0  ;;  %12544 = vmatprep.subr.bf16.mxu1 %v13763_v14  ;;  %12568 = vmatprep.subr.bf16.mxu0 %v13763_v14  ;;  %v13778_v22 = vsub.f32 %v499_v10, %v13765_v15  ;;  %v622_v24 = vand.u32 4294901760, %v13769_v17  ;;  %v13784_v25 = vand.u32 4294901760, %v505_v20  ;;  %v1127_v61 = vld [vmem:[#allocation9 + $0x18] sm:$0xff]  ;;  %s13400_s24 = smov 16   ;;  %s13401_s30 = smov 24  }
  0xde   : > { %v13781_v23 = vsub.f32 %v502_v11, %v13767_v16  ;;  %12546 = vmatpush3.bf16.msra.mxu1 %v13763_v14  ;;  %12570 = vmatpush3.bf16.msra.mxu0 %v13763_v14  ;;  %v629_v26 = vand.u32 4294901760, %v628_v19  ;;  %v13788_v27 = vand.u32 4294901760, %v508_v21  ;;  %v13790_v28 = vsub.f32 %v488_v2, %v517_v6  ;;  %s14667_s4 = sld [smem:[#allocation27_spill]]  ;;  %s476_s21 = scalar_lea.vmem [#allocation14], %s11285_s11 }
  0xdf   : > { %v13792_v29 = vsub.f32 %v489_v5, %v520_v9  ;;  %12548 = vmatprep.subr.bf16.mxu1 %v13771_v18  ;;  %12572 = vmatprep.subr.bf16.mxu0 %v13771_v18  ;;  %v581_v30 = vand.u32 4294901760, %v13778_v22  ;;  %v623_v32 = vsub.f32 %v13769_v17, %v622_v24  ;;  %v13800_v33 = vsub.f32 %v505_v20, %v13784_v25  ;;  %s11136_s27 = sshll.u32 %s476_s21, 4  ;;  %s11306_s19 = sshll.u32 %s13480_s17, 9  ;;  %s14561_s27 = int_to_ptr.vmem [resolvable:$true] %s11136_s27 }
  0xe0   : > { %v591_v31 = vand.u32 4294901760, %v13781_v23  ;;  %v630_v34 = vsub.f32 %v628_v19, %v629_v26  ;;  %v12575_v35 = vpack.c.bf16 %v629_v26, %v622_v24  ;;  %v13803_v36 = vsub.f32 %v508_v21, %v13788_v27  ;;  %s14668_s25 = sld [smem:[#allocation28_spill]]  ;;  %s11122_s17 = scalar_lea.sflag [#allocation5], %s13731_s6 }
  0xe1   : > { %v636_v37 = vand.u32 4294901760, %v13790_v28  ;;  %v582_v38 = vsub.f32 %v13778_v22, %v581_v30  ;;  %v624_v40 = vand.u32 4294901760, %v623_v32  ;;  %11813 = vmatprep.mubr.f32.mxu0 %v581_v30  ;;  %v601_v41 = vand.u32 4294901760, %v13800_v33  ;;  %s13304_s18 = scalar_lea.vmem %s14561_s27, 512  ;;  %s13402_s26 = smov [#allocation14]  }
  0xe2   : > { %v592_v39 = vsub.f32 %v13781_v23, %v591_v31  ;;  %12550 = vmatpush3.bf16.msra.mxu1 %v13771_v18  ;;  %12574 = vmatpush3.bf16.msra.mxu0 %v13771_v18  ;;  %v631_v42 = vand.u32 4294901760, %v630_v34  ;;  %v611_v43 = vand.u32 4294901760, %v13803_v36  ;;  %v643_v45 = vand.u32 4294901760, %v13792_v29  ;;  %p13305_p0 = scmp.ne.s32.totalorder %s14561_s27, %s13304_s18 }
  0xe3   : > { %v637_v44 = vsub.f32 %v13790_v28, %v636_v37  ;;  %v583_v47 = vand.u32 4294901760, %v582_v38  ;;  %12576 = vmatprep.subr.bf16.mxu0 %v12575_v35  ;;  %v602_v49 = vsub.f32 %v13800_v33, %v601_v41  ;;  %v1142_v59 = vand.u32 4294901760, %v13814_v46 }
  0xe4   : > { %v593_v48 = vand.u32 4294901760, %v592_v39  ;;  %v12551_v51 = vpack.c.bf16 %v631_v42, %v624_v40  ;;  %v612_v52 = vsub.f32 %v13803_v36, %v611_v43  ;;  %v644_v54 = vsub.f32 %v13792_v29, %v643_v45  ;;  %p13306_p4 = pnand %p13305_p0, %p13630_p10 }
  0xe5   : > { %v638_v53 = vand.u32 4294901760, %v637_v44  ;;  %11771 = vmatprep.mubr.f32.mxu1 %v583_v47  ;;  %11814 = vmatmul.mubr.f32.vlgmr.msra.gmra.mrb[0].mxu0 %v591_v31  ;;  %v603_v57 = vand.u32 4294901760, %v602_v49  ;;  %v12579_v58 = vpack.c.bf16 %v643_v45, %v636_v37  ;;  %v1145_v0 = vand.u32 4294901760, %v13817_v50 }
  0xe6   : > { %11772 = vmatmul.mubr.f32.vlgmr.msra.gmra.mrb[0].mxu1 %v593_v48  ;;  %12552 = vmatprep.subr.bf16.mxu1 %v12551_v51  ;;  %v613_v62 = vand.u32 4294901760, %v612_v52  ;;  %v645_v63 = vand.u32 4294901760, %v644_v54  ;;  %v12559_v1 = vpack.c.bf16 %v628_v19, %v13769_v17  ;;  %v1136_v2 = vsel %vm497_vm0, %v484_v55, 0  ;;  %s14568_s23 = scalar_lea.hbm %s14668_s25, %s11306_s19  ;;  %p13307_p6 = pneg %p13306_p4 }
  0xe7   : > { %12554 = vmatpush3.bf16.msra.mxu1 %v12551_v51  ;;  %11774 = vmatprep.mubr.f32.mxu1 %v603_v57  ;;  %v1139_v3 = vsel %vm497_vm0, %v485_v56, 0  ;;  %v13829_v4 = vsub.f32 %v13814_v46, %v1142_v59  ;;  %v1148_v6 = vand.u32 4294901760, %v1126_v60  ;;  %v1151_v7 = vand.u32 4294901760, %v1127_v61 }
  0xe8   : > { %12578 = vmatpush3.bf16.msra.mxu0 %v12575_v35  ;;  %v12555_v5 = vpack.c.bf16 %v645_v63, %v638_v53  ;;  %11816 = vmatprep.mubr.f32.mxu0 %v601_v41  ;;  %v13831_v8 = vand.u32 4294901760, %v1136_v2  ;;  %v13834_v9 = vsub.f32 %v13817_v50, %v1145_v0  ;;  %v13836_v10 = vand.u32 4294901760, %v1139_v3 }
  0xe9   : > { %11817 = vmatmul.mubr.f32.gmra.mrb[2].mxu0 %v611_v43  ;;  %12580 = vmatprep.subr.bf16.mxu0 %v12579_v58  ;;  %v1233_v11 = vand.u32 4294901760, %v13829_v4  ;;  %v13844_v17 = vsub.f32 %v1126_v60, %v1148_v6  ;;  %v13846_v19 = vsub.f32 %v1127_v61, %v1151_v7  ;;  %v12563_v20 = vpack.c.bf16 %v13792_v29, %v13790_v28 }
  0xea   : > { %11775 = vmatmul.mubr.f32.gmra.mrb[2].mxu1 %v613_v62  ;;  %12556 = vmatprep.subr.bf16.mxu1 %v12555_v5  ;;  %v13841_v12 = vsub.f32 %v1136_v2, %v13831_v8  ;;  %v1240_v13 = vand.u32 4294901760, %v13834_v9  ;;  %v13854_v21 = vsub.f32 %v1139_v3, %v13836_v10  ;;  %v13871_v31 = vpack.c.bf16 %v1145_v0, %v1142_v59  ;;  %v11293_v3 = vld [vmem:[%s14620_s5] ss:$0 sm:$0xff] }
  0xeb   : > { %12558 = vmatpush3.bf16.msra.mxu1 %v12555_v5  ;;  %11785 = vmatprep.mubr.f32.mxu1 %v13765_v15  ;;  %v1234_v24 = vsub.f32 %v13829_v4, %v1233_v11  ;;  %v1247_v29 = vand.u32 4294901760, %v13844_v17  ;;  %v1254_v30 = vand.u32 4294901760, %v13846_v19  ;;  %v12595_v32 = vpack.c.bf16 %v1151_v7, %v1148_v6 }
  0xec   : > { %12582 = vmatpush3.bf16.msra.mxu0 %v12579_v58  ;;  %12560 = vmatprep.subr.bf16.mxu1 %v12559_v1  ;;  %v13863_v26 = vand.u32 4294901760, %v13841_v12  ;;  %v1241_v28 = vsub.f32 %v13834_v9, %v1240_v13  ;;  %vm6321_vm2 = vcmask 130112   ;;  %vm8392_vm3 = vcmask 195712  }
  0xed   : > { %11827 = vmatprep.mubr.f32.mxu0 %v13765_v15  ;;  %12584 = vmatprep.subr.bf16.mxu0 %v13763_v14  ;;  %v1235_v34 = vand.u32 4294901760, %v1234_v24  ;;  %v1248_v38 = vsub.f32 %v13844_v17, %v1247_v29  ;;  %v1255_v39 = vsub.f32 %v13846_v19, %v1254_v30  ;;  %vm10463_vm4 = vcmask 261312  }
  0xee   : > { %11786 = vmatmul.mubr.f32.vlgmr.msra.gmra.mrb[0].mxu1 %v13767_v16  ;;  %v1213_v35 = vsub.f32 %v13841_v12, %v13863_v26  ;;  %v1242_v37 = vand.u32 4294901760, %v1241_v28 }
  0xef   : > { %12562 = vmatpush3.bf16.msra.mxu1 %v12559_v1  ;;  %11828 = vmatmul.mubr.f32.vlgmr.msra.gmra.mrb[0].mxu0 %v13767_v16  ;;  %v1249_v41 = vand.u32 4294901760, %v1248_v38  ;;  %v1256_v42 = vand.u32 4294901760, %v1255_v39 }
  0xf0   : > { %11788 = vmatprep.mubr.f32.mxu1 %v13784_v25  ;;  %12586 = vmatpush3.bf16.msra.mxu0 %v13763_v14  ;;  %v13876_v14 = vand.u32 4294901760, %v13854_v21 }
  0xf1   : > { %12564 = vmatprep.subr.bf16.mxu1 %v12563_v20  ;;  %11830 = vmatprep.mubr.f32.mxu0 %v13784_v25 }
  0xf2   : > { %11789 = vmatmul.mubr.f32.gmra.mrb[2].mxu1 %v13788_v27  ;;  %12588 = vmatprep.subr.bf16.mxu0 %v13771_v18  ;;  %v1223_v40 = vsub.f32 %v13854_v21, %v13876_v14 }
  0xf3   : > { %12566 = vmatpush3.bf16.msra.mxu1 %v12563_v20  ;;  %11831 = vmatmul.mubr.f32.gmra.mrb[2].mxu0 %v13788_v27 }
  0xf4   : > { %11799 = vmatprep.mubr.f32.mxu1 %v13778_v22  ;;  %12590 = vmatpush3.bf16.msra.mxu0 %v13771_v18  ;;  %v1214_v18 = vand.u32 4294901760, %v1213_v35  ;;  %v12599_v22 = vpack.c.bf16 %v1242_v37, %v1235_v34 }
  0xf5   : > { %12592 = vmatprep.subr.bf16.mxu1 %v13871_v31  ;;  %11841 = vmatprep.mubr.f32.mxu0 %v13765_v15  ;;  %v13895_v15 = vand.u32 4294901760, %v1223_v40 }
  0xf6   : > { %11800 = vmatmul.mubr.f32.vlgmr.msra.gmra.mrb[0].mxu1 %v13781_v23  ;;  %v12603_v23 = vpack.c.bf16 %v1256_v42, %v1249_v41 }
  0xf7   : > { %12594 = vmatpush3.bf16.msra.mxu1 %v13871_v31  ;;  %11842 = vmatmul.mubr.f32.vlgmr.msra.gmra.mrb[0].mxu0 %v13767_v16  ;;  %v12607_v16 = vpack.c.bf16 %v13834_v9, %v13829_v4 }
  0xf8   : > { %11802 = vmatprep.mubr.f32.mxu1 %v13800_v33  ;;  %12596 = vmatprep.subr.bf16.mxu1 %v12595_v32  ;;  %v12627_v33 = vpack.c.bf16 %v1254_v30, %v1247_v29 }
  0xf9   : > { %11844 = vmatprep.mubr.f32.mxu0 %v13784_v25  ;;  %v12611_v25 = vpack.c.bf16 %v13846_v19, %v13844_v17 }
  0xfa   : > { %11803 = vmatmul.mubr.f32.gmra.mrb[2].mxu1 %v13803_v36  ;;  %v11292_v36 = vld [vmem:[%s14618_s3] ss:$0 sm:$0xff] }
  0xfb   : > { %12598 = vmatpush3.bf16.msra.mxu1 %v12595_v32  ;;  %11845 = vmatmul.mubr.f32.gmra.mrb[2].mxu0 %v13788_v27  ;;  %v12623_v27 = vpack.c.bf16 %v1240_v13, %v1233_v11 }
  0xfc   : > { %11855 = vmatprep.mubr.f32.mxu1 %v1214_v18  ;;  %12600 = vmatprep.subr.bf16.mxu1 %v12599_v22 }
  0xfd   : > { %11921 = vmatprep.mubr.f32.mxu0 %v1214_v18 }
  0xfe   : > { %11856 = vmatmul.mubr.f32.vlgmr.msra.gmra.mrb[4].mxu1 %v13895_v15 }
  0xff   : > { %12602 = vmatpush3.bf16.msra.mxu1 %v12599_v22  ;;  %11866 = vmatprep.mubr.f32.mxu1 %v13831_v8 }
 0x100   : > { %12604 = vmatprep.subr.bf16.mxu1 %v12603_v23 }
 0x103   : > { %12606 = vmatpush3.bf16.msra.mxu1 %v12603_v23 }
 0x104   : > { %12608 = vmatprep.subr.bf16.mxu1 %v12607_v16 }
 0x106   : > { %11867 = vmatmul.mubr.f32.vlgmr.msra.gmra.mrb[4].mxu1 %v13836_v10 }
 0x107   : > { %12610 = vmatpush3.bf16.msra.mxu1 %v12607_v16  ;;  %11877 = vmatprep.mubr.f32.mxu1 %v13841_v12 }
 0x108   : > { %12612 = vmatprep.subr.bf16.mxu1 %v12611_v25 }
 0x10b   : > { %12614 = vmatpush3.bf16.msra.mxu1 %v12611_v25 }
 0x10c   : > { %12616 = vmatprep.subr.bf16.mxu1 %v13871_v31 }
 0x10e   : > { %11878 = vmatmul.mubr.f32.vlgmr.msra.gmra.mrb[4].mxu1 %v13854_v21 }
 0x10f   : > { %12618 = vmatpush3.bf16.msra.mxu1 %v13871_v31  ;;  %11888 = vmatprep.mubr.f32.mxu1 %v13863_v26 }
 0x110   : > { %12620 = vmatprep.subr.bf16.mxu1 %v12595_v32 }
 0x113   : > { %12622 = vmatpush3.bf16.msra.mxu1 %v12595_v32 }
 0x114   : > { %12624 = vmatprep.subr.bf16.mxu1 %v12623_v27 }
 0x116   : > { %11889 = vmatmul.mubr.f32.vlgmr.msra.gmra.mrb[4].mxu1 %v13876_v14 }
 0x117   : > { %12626 = vmatpush3.bf16.msra.mxu1 %v12623_v27  ;;  %11899 = vmatprep.mubr.f32.mxu1 %v13831_v8 }
 0x118   : > { %12628 = vmatprep.subr.bf16.mxu1 %v12627_v33 }
 0x11b   : > { %12630 = vmatpush3.bf16.msra.mxu1 %v12627_v33 }
 0x11c   : > { %12632 = vmatprep.subr.bf16.mxu1 %v13871_v31 }
 0x11e   : > { %11900 = vmatmul.mubr.f32.vlgmr.msra.gmra.mrb[4].mxu1 %v13836_v10 }
 0x11f   : > { %12634 = vmatpush3.bf16.msra.mxu1 %v13871_v31  ;;  %11910 = vmatprep.mubr.f32.mxu1 %v13831_v8 }
 0x120   : > { %12636 = vmatprep.subr.bf16.mxu1 %v12595_v32 }
 0x123   : > { %12638 = vmatpush3.bf16.msra.mxu1 %v12595_v32 }
 0x126   : > { %11911 = vmatmul.mubr.f32.vlgmr.msra.gmra.mrb[4].mxu1 %v13836_v10 }
 0x1c9   : > { %v11801_v43 = vpop.f32.mrb[0].mxu1 }
 0x1ca   : > { %v12735_v44 = vadd.f32 %v11801_v43, %v11292_v36  ;;  %v804_v45 = vpop.f32.mrb[1].mxu1  ;;  %v11843_v46 = vpop.f32.mrb[0].mxu0 }
 0x1cb   : > { %v12737_v47 = vadd.f32 %v11292_v36, %v804_v45  ;;  %v1102_v48 = vpop.f32.mrb[1].mxu0  ;;  %v1671_v45 = vld [vmem:[#allocation11] sm:$0xff] }
 0x1cc   : > { %v13924_v49 = vadd.f32 %v12735_v44, %v11843_v46  ;;  %v1672_v46 = vld [vmem:[#allocation11 + $0x8] sm:$0xff] }
 0x1cd   : > { %v13926_v50 = vadd.f32 %v12737_v47, %v1102_v48  ;;  %v11804_v51 = vpop.f32.mrb[2].mxu1  ;;  %v1673_v47 = vld [vmem:[#allocation11 + $0x10] sm:$0xff]  ;;  %v1683_v48 = vand.u32 4294901760, %v1671_v45 }
 0x1ce   : > { %v12739_v52 = vadd.f32 %v11804_v51, %v11292_v36  ;;  %v818_v53 = vpop.f32.mrb[3].mxu1  ;;  %v11846_v54 = vpop.f32.mrb[2].mxu0  ;;  %v2215_v1 = vsel %vm2210_vm1, %v13924_v49, 0  ;;  %v1686_v51 = vand.u32 4294901760, %v1672_v46 }
 0x1cf   : > { %v12741_v55 = vadd.f32 %v11292_v36, %v818_v53  ;;  %v1114_v56 = vpop.f32.mrb[3].mxu0  ;;  %v2212_v57 = vsel %vm2210_vm1, %v13926_v50, 0  ;;  %v2296_v2 = vand.u32 4294901760, %v2215_v1  ;;  %v1689_v53 = vand.u32 4294901760, %v1673_v47 }
 0x1d0   : > { %v13930_v58 = vadd.f32 %v12739_v52, %v11846_v54  ;;  %v2286_v59 = vand.u32 4294901760, %v2212_v57  ;;  %v1674_v52 = vld [vmem:[#allocation11 + $0x18] sm:$0xff] }
 0x1d1   : > { %v13932_v60 = vadd.f32 %v12741_v55, %v1114_v56  ;;  %v2297_v4 = vsub.f32 %v2215_v1, %v2296_v2  ;;  %v1692_v54 = vand.u32 4294901760, %v1674_v52  ;;  %v12639_v55 = vpack.c.bf16 %v1686_v51, %v1683_v48 }
 0x1d2   : > { %v2287_v61 = vsub.f32 %v2212_v57, %v2286_v59  ;;  %v2713_v38 = vsel %vm2210_vm1, %v13930_v58, 0  ;;  %v1773_v56 = vsub.f32 %v1671_v45, %v1683_v48  ;;  %v1780_v57 = vsub.f32 %v1672_v46, %v1686_v51 }
 0x1d3   : > { %v2298_v9 = vand.u32 4294901760, %v2297_v4  ;;  %v2710_v34 = vsel %vm2210_vm1, %v13932_v60, 0  ;;  %v2794_v40 = vand.u32 4294901760, %v2713_v38  ;;  %12640 = vmatprep.subr.bf16.mxu0 %v12639_v55 }
 0x1d4   : > { %v2288_v62 = vand.u32 4294901760, %v2287_v61  ;;  %v2784_v37 = vand.u32 4294901760, %v2710_v34  ;;  %12642 = vmatpush3.bf16.msra.mxu0 %v12639_v55 }
 0x1d5   : > { %v2299_v19 = vsub.f32 %v2297_v4, %v2298_v9  ;;  %v2795_v41 = vsub.f32 %v2713_v38, %v2794_v40 }
 0x1d6   : > { %v2289_v63 = vsub.f32 %v2287_v61, %v2288_v62  ;;  %v2785_v18 = vsub.f32 %v2710_v34, %v2784_v37 }
 0x1d7   : > { %v2300_v24 = vand.u32 4294901760, %v2299_v19  ;;  %v2796_v16 = vand.u32 4294901760, %v2795_v41 }
 0x1d8   : > { %v2290_v0 = vand.u32 4294901760, %v2289_v63  ;;  %v2786_v42 = vand.u32 4294901760, %v2785_v18  ;;  %v1774_v63 = vand.u32 4294901760, %v1773_v56 }
 0x1d9   : > { %v2797_v33 = vsub.f32 %v2795_v41, %v2796_v16 }
 0x1da   : > { %11981 = vmatprep.mubr.f32.mxu1 %v2290_v0  ;;  %v2787_v25 = vsub.f32 %v2785_v18, %v2786_v42  ;;  %v1781_v0 = vand.u32 4294901760, %v1780_v57 }
 0x1db   : > { %v2798_v44 = vand.u32 4294901760, %v2797_v33 }
 0x1dc   : > { %v2788_v36 = vand.u32 4294901760, %v2787_v25 }
 0x1f9   : > { %v11912_v5 = vpop.f32.mrb[4].mxu1 }
 0x1fa   : > { %v1659_v6 = vpop.f32.mrb[5].mxu1  ;;  %v12743_v31 = vadd.f32 %v11912_v5, %v11293_v3 }
 0x1fb   : > { %v12744_v7 = vadd.f32 %v11293_v3, %v1659_v6  ;;  %v1775_v3 = vsub.f32 %v1773_v56, %v1774_v63 }
 0x1fc   : > { %v13943_v32 = vmul.f32 0.17677669, %v12743_v31 }
 0x1fd   : > { %v13939_v11 = vmul.f32 0.17677669, %v12744_v7  ;;  %v1776_v7 = vand.u32 4294901760, %v1775_v3 }
 0x1fe   : > { %v2716_v35 = vsel %vm2210_vm1, %v13943_v32, 0 }
 0x1ff   : > { %v2218_v13 = vsel %vm2210_vm1, %v13939_v11, 0  ;;  %v2719_v39 = vand.u32 4294901760, %v2716_v35 }
 0x200   : > { %v2221_v17 = vand.u32 4294901760, %v2218_v13 }
 0x201   : > { %v2806_v22 = vsub.f32 %v2716_v35, %v2719_v39 }
 0x202   : > { %v2308_v20 = vsub.f32 %v2218_v13, %v2221_v17  ;;  %11979 = vmatprep.subr.mxu1 %v2221_v17 }
 0x203   : > { %11980 = vmatpush3.xpose.msra.mxu1 %v2221_v17  ;;  %v2807_v23 = vand.u32 4294901760, %v2806_v22 }
 0x204   : > { %v2309_v28 = vand.u32 4294901760, %v2308_v20 }
 0x205   : > { %v2808_v27 = vsub.f32 %v2806_v22, %v2807_v23 }
 0x206   : > { %11982 = vmatmul.mubr.f32.vlgmr.msra.gmra.mrb[6].mxu1 %v2300_v24  ;;  %v2310_v29 = vsub.f32 %v2308_v20, %v2309_v28  ;;  %v12655_v24 = vpack.c.bf16 %v1780_v57, %v1773_v56 }
 0x207   : > { %11986 = vmatprep.mubr.f32.mxu1 %v2286_v59  ;;  %v2809_v43 = vand.u32 4294901760, %v2808_v27  ;;  %v11294_v27 = vld [vmem:[%s14622_s7] ss:$0 sm:$0xff] }
 0x208   : > { %v2311_v30 = vand.u32 4294901760, %v2310_v29 }
 0x20a   : > { %11984 = vmatprep.subr.mxu1 %v2311_v30 }
 0x20b   : > { %11985 = vmatpush3.xpose.msra.mxu1 %v2311_v30 }
 0x20c   : > { %11989 = vmatprep.subr.mxu1 %v2308_v20 }
 0x20e   : > { %11987 = vmatmul.mubr.f32.vlgmr.msra.gmra.mrb[6].mxu1 %v2296_v2 }
 0x20f   : > { %11990 = vmatpush3.xpose.msra.mxu1 %v2308_v20  ;;  %11991 = vmatprep.mubr.f32.mxu1 %v2287_v61  ;;  %v12643_v61 = vpack.c.bf16 %v1692_v54, %v1689_v53 }
 0x210   : > { %11994 = vmatprep.subr.mxu1 %v2221_v17 }
 0x211   : > { %12644 = vmatprep.subr.bf16.mxu0 %v12643_v61 }
 0x212   : > { %12646 = vmatpush3.bf16.msra.mxu0 %v12643_v61 }
 0x215   : > { %11922 = vmatmul.mubr.f32.vlgmr.msra.gmra.mrb[4].mxu0 %v13895_v15  ;;  %v12671_v15 = vpack.c.bf16 %v1781_v0, %v1774_v63 }
 0x216   : > { %11992 = vmatmul.mubr.f32.vlgmr.msra.gmra.mrb[6].mxu1 %v2297_v4  ;;  %v1782_v4 = vsub.f32 %v1780_v57, %v1781_v0  ;;  %11932 = vmatprep.mubr.f32.mxu0 %v13831_v8 }
 0x217   : > { %11995 = vmatpush3.xpose.msra.mxu1 %v2221_v17  ;;  %11996 = vmatprep.mubr.f32.mxu1 %v2288_v62  ;;  %v1794_v62 = vsub.f32 %v1674_v52, %v1692_v54 }
 0x218   : > { %11999 = vmatprep.subr.mxu1 %v2309_v28 }
 0x21e   : > { %11997 = vmatmul.mubr.f32.vlgmr.msra.gmra.mrb[6].mxu1 %v2298_v9  ;;  %v1783_v9 = vand.u32 4294901760, %v1782_v4 }
 0x21f   : > { %12000 = vmatpush3.xpose.msra.mxu1 %v2309_v28  ;;  %12001 = vmatprep.mubr.f32.mxu1 %v2286_v59 }
 0x220   : > { %12004 = vmatprep.subr.mxu1 %v2221_v17  ;;  %v12647_v19 = vpack.c.bf16 %v1783_v9, %v1776_v7 }
 0x222   : > { %12648 = vmatprep.subr.bf16.mxu0 %v12647_v19 }
 0x223   : > { %12650 = vmatpush3.bf16.msra.mxu0 %v12647_v19 }
 0x226   : > { %12002 = vmatmul.mubr.f32.vlgmr.msra.gmra.mrb[6].mxu1 %v2296_v2 }
 0x227   : > { %12005 = vmatpush3.xpose.msra.mxu1 %v2221_v17  ;;  %12006 = vmatprep.mubr.f32.mxu1 %v2286_v59  ;;  %v1787_v59 = vsub.f32 %v1673_v47, %v1689_v53 }
 0x228   : > { %12009 = vmatprep.subr.mxu1 %v2719_v39 }
 0x229   : > { %v1788_v1 = vand.u32 4294901760, %v1787_v59  ;;  %v12659_v28 = vpack.c.bf16 %v1794_v62, %v1787_v59 }
 0x22b   : > { %v1789_v5 = vsub.f32 %v1787_v59, %v1788_v1 }
 0x22d   : > { %v1790_v13 = vand.u32 4294901760, %v1789_v5 }
 0x22e   : > { %12007 = vmatmul.mubr.f32.vlgmr.msra.gmra.mrb[6].mxu1 %v2296_v2  ;;  %v1795_v2 = vand.u32 4294901760, %v1794_v62 }
 0x22f   : > { %12010 = vmatpush3.xpose.msra.mxu1 %v2719_v39  ;;  %12011 = vmatprep.mubr.f32.mxu1 %v2788_v36 }
 0x230   : > { %12014 = vmatprep.subr.mxu1 %v2809_v43  ;;  %v1796_v6 = vsub.f32 %v1794_v62, %v1795_v2  ;;  %v12675_v29 = vpack.c.bf16 %v1795_v2, %v1788_v1 }
 0x232   : > { %12012 = vmatmul.mubr.f32.vlgmr.msra.gmra.mrb[8].mxu1 %v2798_v44  ;;  %v1797_v17 = vand.u32 4294901760, %v1796_v6 }
 0x233   : > { %12015 = vmatpush3.xpose.msra.mxu1 %v2809_v43  ;;  %12016 = vmatprep.mubr.f32.mxu1 %v2784_v37 }
 0x234   : > { %12019 = vmatprep.subr.mxu1 %v2806_v22  ;;  %v12651_v20 = vpack.c.bf16 %v1797_v17, %v1790_v13 }
 0x236   : > { %12652 = vmatprep.subr.bf16.mxu0 %v12651_v20 }
 0x237   : > { %12654 = vmatpush3.bf16.msra.mxu0 %v12651_v20 }
 0x238   : > { %12656 = vmatprep.subr.bf16.mxu0 %v12655_v24 }
 0x23a   : > { %12017 = vmatmul.mubr.f32.vlgmr.msra.gmra.mrb[8].mxu1 %v2794_v40  ;;  %11933 = vmatmul.mubr.f32.vlgmr.msra.gmra.mrb[4].mxu0 %v13836_v10 }
 0x23b   : > { %12020 = vmatpush3.xpose.msra.mxu1 %v2806_v22  ;;  %12021 = vmatprep.mubr.f32.mxu1 %v2785_v18 }
 0x23c   : > { %12024 = vmatprep.subr.mxu1 %v2719_v39  ;;  %12658 = vmatpush3.bf16.msra.mxu0 %v12655_v24 }
 0x23d   : > { %11943 = vmatprep.mubr.f32.mxu0 %v13841_v12  ;;  %12660 = vmatprep.subr.bf16.mxu0 %v12659_v28 }
 0x240   : > { %12662 = vmatpush3.bf16.msra.mxu0 %v12659_v28 }
 0x241   : > { %12664 = vmatprep.subr.bf16.mxu0 %v12639_v55 }
 0x242   : > { %12022 = vmatmul.mubr.f32.vlgmr.msra.gmra.mrb[8].mxu1 %v2795_v41 }
 0x243   : > { %12025 = vmatpush3.xpose.msra.mxu1 %v2719_v39  ;;  %12026 = vmatprep.mubr.f32.mxu1 %v2786_v42 }
 0x244   : > { %12029 = vmatprep.subr.mxu1 %v2807_v23  ;;  %11944 = vmatmul.mubr.f32.vlgmr.msra.gmra.mrb[4].mxu0 %v13854_v21 }
 0x245   : > { %12666 = vmatpush3.bf16.msra.mxu0 %v12639_v55  ;;  %11954 = vmatprep.mubr.f32.mxu0 %v13863_v26 }
 0x246   : > { %12668 = vmatprep.subr.bf16.mxu0 %v12643_v61 }
 0x249   : > { %12670 = vmatpush3.bf16.msra.mxu0 %v12643_v61 }
 0x24a   : > { %12027 = vmatmul.mubr.f32.vlgmr.msra.gmra.mrb[8].mxu1 %v2796_v16  ;;  %12672 = vmatprep.subr.bf16.mxu0 %v12671_v15 }
 0x24b   : > { %12030 = vmatpush3.xpose.msra.mxu1 %v2807_v23  ;;  %12031 = vmatprep.mubr.f32.mxu1 %v2784_v37 }
 0x24c   : > { %12034 = vmatprep.subr.mxu1 %v2719_v39  ;;  %11955 = vmatmul.mubr.f32.vlgmr.msra.gmra.mrb[4].mxu0 %v13876_v14 }
 0x24d   : > { %12674 = vmatpush3.bf16.msra.mxu0 %v12671_v15  ;;  %11965 = vmatprep.mubr.f32.mxu0 %v13831_v8 }
 0x24e   : > { %12676 = vmatprep.subr.bf16.mxu0 %v12675_v29 }
 0x251   : > { %12678 = vmatpush3.bf16.msra.mxu0 %v12675_v29 }
 0x252   : > { %12032 = vmatmul.mubr.f32.vlgmr.msra.gmra.mrb[8].mxu1 %v2794_v40  ;;  %12680 = vmatprep.subr.bf16.mxu0 %v12639_v55 }
 0x253   : > { %12035 = vmatpush3.xpose.msra.mxu1 %v2719_v39  ;;  %12036 = vmatprep.mubr.f32.mxu1 %v2784_v37 }
 0x254   : > { %11966 = vmatmul.mubr.f32.vlgmr.msra.gmra.mrb[4].mxu0 %v13836_v10 }
 0x255   : > { %12682 = vmatpush3.bf16.msra.mxu0 %v12639_v55  ;;  %11976 = vmatprep.mubr.f32.mxu0 %v13831_v8 }
 0x256   : > { %12684 = vmatprep.subr.bf16.mxu0 %v12643_v61 }
 0x259   : > { %12686 = vmatpush3.bf16.msra.mxu0 %v12643_v61 }
 0x25a   : > { %12037 = vmatmul.mubr.f32.vlgmr.msra.gmra.mrb[8].mxu1 %v2794_v40 }
 0x25c   : > { %11977 = vmatmul.mubr.f32.vlgmr.msra.gmra.mrb[4].mxu0 %v13836_v10 }
 0x301   : > { %v12008_v12 = vpop.f32.mrb[6].mxu1 }
 0x302   : > { %v2699_v21 = vpop.f32.mrb[7].mxu1  ;;  %v3210_v14 = vsel %vm2210_vm1, %v12008_v12, -inf }
 0x303   : > { %v3207_v26 = vsel %vm2210_vm1, %v2699_v21, -inf }
 0x304   : > { %3208 = vmax.xlane.f32.xlu0 %v3207_v26 }
 0x308   : > { %3211 = vmax.xlane.f32.xlu0 %v3210_v14 }
 0x32d   : > { %v12038_v30 = vpop.f32.mrb[8].mxu1 }
 0x32e   : > { %v3197_v31 = vpop.f32.mrb[9].mxu1  ;;  %v3216_v35 = vsel %vm2210_vm1, %v12038_v30, -inf }
 0x32f   : > { %v3213_v34 = vsel %vm2210_vm1, %v3197_v31, -inf  ;;  %v11978_v25 = vpop.f32.mrb[4].mxu0 }
 0x330   : > { %3214 = vmax.xlane.f32.xlu1 %v3213_v34  ;;  %v2200_v33 = vpop.f32.mrb[5].mxu0  ;;  %v13971_v43 = vadd.f32 %v11978_v25, %v11294_v27 }
 0x331   : > { %v13973_v44 = vadd.f32 %v11294_v27, %v2200_v33 }
 0x332   : > { %v13976_v47 = vand.u32 4294901760, %v13971_v43 }
 0x333   : > { %v13979_v48 = vand.u32 4294901760, %v13973_v44 }
 0x334   : > { %3217 = vmax.xlane.f32.xlu1 %v3216_v35  ;;  %12069 = vmatprep.subr.mxu1 %v13976_v47  ;;  %v13991_v54 = vsub.f32 %v13971_v43, %v13976_v47 }
 0x335   : > { %12039 = vmatprep.subr.mxu0 %v13979_v48  ;;  %v3349_v52 = vsub.f32 %v13973_v44, %v13979_v48  ;;  %12070 = vmatpush3.msra.mxu1 %v13976_v47 }
 0x336   : > { %12040 = vmatpush3.msra.mxu0 %v13979_v48  ;;  %v13995_v56 = vand.u32 4294901760, %v13991_v54 }
 0x337   : > { %v13987_v53 = vand.u32 4294901760, %v3349_v52 }
 0x338   : > { %v3846_v59 = vsub.f32 %v13991_v54, %v13995_v56 }
 0x339   : > { %v3351_v55 = vsub.f32 %v3349_v52, %v13987_v53 }
 0x33a   : > { %v14001_v62 = vand.u32 4294901760, %v3846_v59 }
 0x33b   : > { %v3352_v57 = vand.u32 4294901760, %v3351_v55 }
 0x33c   : > { %12074 = vmatprep.subr.mxu1 %v14001_v62 }
 0x33d   : > { %12044 = vmatprep.subr.mxu0 %v3352_v57 }
 0x391   : > { %v3209_v8 = vpop.xlane.xlu0 %3208 }
 0x392   : > { %v3219_v37 = vsub.f32 %v2699_v21, %v3209_v8 }
 0x394   : > { %v3223_v38 = vmul.f32 1.442695, %v3219_v37 }
 0x395   : > { %v3212_v10 = vpop.xlane.xlu0 %3211 }
 0x396   : > { %13068 = vpow2.f32 %v3223_v38  ;;  %v3220_v39 = vsub.f32 %v12008_v12, %v3212_v10 }
 0x398   : > { %v3225_v40 = vmul.f32 1.442695, %v3220_v39 }
 0x39a   : > { %13070 = vpow2.f32 %v3225_v40 }
 0x3a0   : > { %v13069_v18 = vpop.eup %13068 }
 0x3a1   : > { %v3231_v22 = vsel %vm2210_vm1, %v13069_v18, 0.0 }
 0x3a2   : > { %3232 = vadd.xlane.f32.xlu0 %v3231_v22 }
 0x3a4   : > { %v13071_v41 = vpop.eup %13070 }
 0x3a5   : > { %v3234_v42 = vsel %vm2210_vm1, %v13071_v41, 0.0 }
 0x3a6   : > { %3235 = vadd.xlane.f32.xlu1 %v3234_v42 }
 0x3bd   : > { %v3215_v23 = vpop.xlane.xlu1 %3214 }
 0x3be   : > { %v3221_v16 = vsub.f32 %v3197_v31, %v3215_v23 }
 0x3c0   : > { %v3227_v36 = vmul.f32 1.442695, %v3221_v16 }
 0x3c1   : > { %v3218_v45 = vpop.xlane.xlu1 %3217 }
 0x3c2   : > { %13072 = vpow2.f32 %v3227_v36  ;;  %v3222_v46 = vsub.f32 %v12038_v30, %v3218_v45 }
 0x3c4   : > { %v3229_v51 = vmul.f32 1.442695, %v3222_v46 }
 0x3c6   : > { %13074 = vpow2.f32 %v3229_v51 }
 0x3cc   : > { %v13999_v61 = vpop.eup %13072 }
 0x3cd   : > { %v3237_v63 = vsel %vm2210_vm1, %v13999_v61, 0.0 }
 0x3ce   : > { %3238 = vadd.xlane.f32.xlu0 %v3237_v63 }
 0x3d0   : > { %v14006_v0 = vpop.eup %13074 }
 0x3d1   : > { %v3240_v1 = vsel %vm2210_vm1, %v14006_v0, 0.0 }
 0x3d2   : > { %3241 = vadd.xlane.f32.xlu1 %v3240_v1 }
 0x3e3   : > { %4255 = vrot.lane.b32.xlu1 %v13924_v49, %s13396_s28 }
 0x3e4   : > { %4253 = vrot.lane.b32.xlu0 %v13926_v50, %s13396_s28 }
 0x3e7   : > { %4754 = vrot.lane.b32.xlu1 %v13932_v60, %s13396_s28 }
 0x3e8   : > { %4756 = vrot.lane.b32.xlu0 %v13930_v58, %s13396_s28 }
 0x3eb   : > { %4257 = vrot.lane.b32.xlu1 %v13939_v11, %s13396_s28 }
 0x3ef   : > { %4758 = vrot.lane.b32.xlu1 %v13943_v32, %s13396_s28 }
 0x42f   : > { %v3233_v2 = vpop.xlane.xlu0 %3232 }
 0x430   : > { %13076 = vrcp.f32 %v3233_v2 }
 0x433   : > { %v3236_v3 = vpop.xlane.xlu1 %3235 }
 0x434   : > { %13078 = vrcp.f32 %v3236_v3 }
 0x43a   : > { %v13077_v4 = vpop.eup %13076 }
 0x43b   : > { %v3251_v5 = vmul.f32 %v13077_v4, %v13069_v18 }
 0x43d   : > { %v3256_v6 = vsel %vm2210_vm1, %v3251_v5, 0 }
 0x43e   : > { %v13079_v7 = vpop.eup %13078  ;;  %v3327_v9 = vand.u32 4294901760, %v3256_v6 }
 0x43f   : > { %v3252_v13 = vmul.f32 %v13079_v7, %v13071_v41 }
 0x440   : > { %v3328_v17 = vsub.f32 %v3256_v6, %v3327_v9 }
 0x441   : > { %v3259_v19 = vsel %vm2210_vm1, %v3252_v13, 0 }
 0x442   : > { %v3329_v20 = vand.u32 4294901760, %v3328_v17  ;;  %v14024_v24 = vand.u32 4294901760, %v3259_v19 }
 0x444   : > { %v3330_v28 = vsub.f32 %v3328_v17, %v3329_v20  ;;  %v3338_v15 = vsub.f32 %v3259_v19, %v14024_v24 }
 0x446   : > { %v3331_v29 = vand.u32 4294901760, %v3330_v28  ;;  %v3339_v12 = vand.u32 4294901760, %v3338_v15 }
 0x448   : > { %12041 = vmatprep.mubr.f32.mxu0 %v3331_v29  ;;  %v3340_v21 = vsub.f32 %v3338_v15, %v3339_v12 }
 0x44a   : > { %v3341_v26 = vand.u32 4294901760, %v3340_v21 }
 0x44c   : > { %12042 = vmatmul.mubr.f32.vlgmr.msra.gmra.mrb[6].mxu0 %v3341_v26 }
 0x44d   : > { %12045 = vmatpush3.msra.mxu0 %v3352_v57  ;;  %12046 = vmatprep.mubr.f32.mxu0 %v3327_v9 }
 0x44e   : > { %12049 = vmatprep.subr.mxu0 %v3349_v52 }
 0x454   : > { %12047 = vmatmul.mubr.f32.vlgmr.msra.gmra.mrb[6].mxu0 %v14024_v24 }
 0x455   : > { %12050 = vmatpush3.msra.mxu0 %v3349_v52  ;;  %12051 = vmatprep.mubr.f32.mxu0 %v3328_v17 }
 0x456   : > { %12054 = vmatprep.subr.mxu0 %v13979_v48 }
 0x45b   : > { %v3239_v14 = vpop.xlane.xlu0 %3238 }
 0x45c   : > { %13080 = vrcp.f32 %v3239_v14  ;;  %12052 = vmatmul.mubr.f32.vlgmr.msra.gmra.mrb[6].mxu0 %v3338_v15 }
 0x45d   : > { %12055 = vmatpush3.msra.mxu0 %v13979_v48  ;;  %12056 = vmatprep.mubr.f32.mxu0 %v3329_v20 }
 0x45e   : > { %12059 = vmatprep.subr.mxu0 %v13987_v53 }
 0x45f   : > { %v4254_v30 = vpop.permute.xlu0 %4253  ;;  %v3242_v31 = vpop.xlane.xlu1 %3241 }
 0x460   : > { %v4259_v34 = vsel %vm2210_vm1, %v4254_v30, 0  ;;  %13082 = vrcp.f32 %v3242_v31 }
 0x461   : > { %v14032_v35 = vand.u32 4294901760, %v4259_v34 }
 0x463   : > { %v4256_v8 = vpop.permute.xlu1 %4255  ;;  %v4332_v40 = vsub.f32 %v4259_v34, %v14032_v35 }
 0x464   : > { %v4261_v37 = vsel %vm2210_vm1, %v4256_v8, 0  ;;  %12057 = vmatmul.mubr.f32.vlgmr.msra.gmra.mrb[6].mxu0 %v3339_v12 }
 0x465   : > { %12060 = vmatpush3.msra.mxu0 %v13987_v53  ;;  %12061 = vmatprep.mubr.f32.mxu0 %v3327_v9  ;;  %v14036_v10 = vand.u32 4294901760, %v4261_v37  ;;  %v4333_v16 = vand.u32 4294901760, %v4332_v40 }
 0x466   : > { %v13081_v38 = vpop.eup %13080  ;;  %12064 = vmatprep.subr.mxu0 %v13979_v48 }
 0x467   : > { %v3253_v39 = vmul.f32 %v13081_v38, %v13999_v61  ;;  %v14041_v18 = vpop.permute.xlu1 %4754  ;;  %v14045_v42 = vsub.f32 %v4261_v37, %v14036_v10  ;;  %v4334_v55 = vsub.f32 %v4332_v40, %v4333_v16 }
 0x469   : > { %v3751_v22 = vsel %vm2210_vm1, %v3253_v39, 0  ;;  %v4343_v46 = vand.u32 4294901760, %v14045_v42  ;;  %v4335_v1 = vand.u32 4294901760, %v4334_v55 }
 0x46a   : > { %v13083_v41 = vpop.eup %13082  ;;  %v14047_v23 = vand.u32 4294901760, %v3751_v22 }
 0x46b   : > { %v3254_v25 = vmul.f32 %v13083_v41, %v14006_v0  ;;  %v4258_v27 = vpop.permute.xlu1 %4257  ;;  %v4344_v0 = vsub.f32 %v14045_v42, %v4343_v46 }
 0x46c   : > { %v4263_v33 = vsel %vm2210_vm1, %v4258_v27, 0  ;;  %12062 = vmatmul.mubr.f32.vlgmr.msra.gmra.mrb[6].mxu0 %v14024_v24  ;;  %v3823_v36 = vsub.f32 %v3751_v22, %v14047_v23 }
 0x46d   : > { %v14053_v45 = vand.u32 4294901760, %v4263_v33  ;;  %12065 = vmatpush3.msra.mxu0 %v13979_v48  ;;  %12066 = vmatprep.mubr.f32.mxu0 %v3327_v9  ;;  %v3754_v52 = vsel %vm2210_vm1, %v3254_v25, 0  ;;  %v4345_v6 = vand.u32 4294901760, %v4344_v0  ;;  %v4760_v9 = vsel %vm2210_vm1, %v14041_v18, 0 }
 0x46e   : > { %v3824_v51 = vand.u32 4294901760, %v3823_v36  ;;  %v14060_v57 = vand.u32 4294901760, %v3754_v52  ;;  %v4832_v19 = vand.u32 4294901760, %v4760_v9 }
 0x46f   : > { %v4353_v53 = vsub.f32 %v4263_v33, %v14053_v45  ;;  %12099 = vmatprep.subr.mxu0 %v14053_v45 }
 0x470   : > { %v3825_v59 = vsub.f32 %v3823_v36, %v3824_v51  ;;  %v3833_v63 = vsub.f32 %v3754_v52, %v14060_v57  ;;  %v4833_v28 = vsub.f32 %v4760_v9, %v4832_v19 }
 0x471   : > { %v4354_v61 = vand.u32 4294901760, %v4353_v53 }
 0x472   : > { %v3826_v48 = vand.u32 4294901760, %v3825_v59  ;;  %v3834_v3 = vand.u32 4294901760, %v3833_v63  ;;  %v4834_v12 = vand.u32 4294901760, %v4833_v28 }
 0x473   : > { %v4355_v2 = vsub.f32 %v4353_v53, %v4354_v61 }
 0x474   : > { %12067 = vmatmul.mubr.f32.vlgmr.msra.gmra.mrb[6].mxu0 %v14024_v24  ;;  %12071 = vmatprep.mubr.f32.mxu1 %v3826_v48  ;;  %v3835_v5 = vsub.f32 %v3833_v63, %v3834_v3  ;;  %v4835_v26 = vsub.f32 %v4833_v28, %v4834_v12 }
 0x475   : > { %12100 = vmatpush3.xpose.msra.mxu0 %v14053_v45  ;;  %12101 = vmatprep.mubr.f32.mxu0 %v4335_v1  ;;  %v4356_v4 = vand.u32 4294901760, %v4355_v2 }
 0x476   : > { %v3836_v7 = vand.u32 4294901760, %v3835_v5  ;;  %v4836_v31 = vand.u32 4294901760, %v4835_v26 }
 0x477   : > { %12104 = vmatprep.subr.mxu0 %v4356_v4 }
 0x478   : > { %12102 = vmatmul.mubr.f32.vlgmr.msra.gmra.mrb[8].mxu0 %v4345_v6  ;;  %12072 = vmatmul.mubr.f32.vlgmr.msra.gmra.mrb[10].mxu1 %v3836_v7 }
 0x479   : > { %12105 = vmatpush3.xpose.msra.mxu0 %v4356_v4  ;;  %12075 = vmatpush3.msra.mxu1 %v14001_v62  ;;  %v4759_v62 = vpop.permute.xlu1 %4758 }
 0x47a   : > { %12076 = vmatprep.mubr.f32.mxu1 %v14047_v23  ;;  %12079 = vmatprep.subr.mxu1 %v13991_v54  ;;  %v4764_v13 = vsel %vm2210_vm1, %v4759_v62, 0 }
 0x47b   : > { %12106 = vmatprep.mubr.f32.mxu0 %v14032_v35  ;;  %12109 = vmatprep.subr.mxu0 %v4353_v53  ;;  %v4767_v20 = vand.u32 4294901760, %v4764_v13 }
 0x47d   : > { %v4854_v15 = vsub.f32 %v4764_v13, %v4767_v20 }
 0x480   : > { %12107 = vmatmul.mubr.f32.vlgmr.msra.gmra.mrb[8].mxu0 %v14036_v10  ;;  %12077 = vmatmul.mubr.f32.vlgmr.msra.gmra.mrb[10].mxu1 %v14060_v57 }
 0x481   : > { %12110 = vmatpush3.xpose.msra.mxu0 %v4353_v53  ;;  %12080 = vmatpush3.msra.mxu1 %v13991_v54  ;;  %v4757_v54 = vpop.permute.xlu0 %4756 }
 0x482   : > { %12081 = vmatprep.mubr.f32.mxu1 %v3823_v36  ;;  %12084 = vmatprep.subr.mxu1 %v13976_v47  ;;  %v4762_v17 = vsel %vm2210_vm1, %v4757_v54, 0 }
 0x483   : > { %12111 = vmatprep.mubr.f32.mxu0 %v4332_v40  ;;  %12114 = vmatprep.subr.mxu0 %v14053_v45  ;;  %v4842_v24 = vand.u32 4294901760, %v4762_v17 }
 0x485   : > { %v4843_v29 = vsub.f32 %v4762_v17, %v4842_v24 }
 0x487   : > { %v4844_v21 = vand.u32 4294901760, %v4843_v29 }
 0x488   : > { %12112 = vmatmul.mubr.f32.vlgmr.msra.gmra.mrb[8].mxu0 %v14045_v42  ;;  %12082 = vmatmul.mubr.f32.vlgmr.msra.gmra.mrb[10].mxu1 %v3833_v63 }
 0x489   : > { %12115 = vmatpush3.xpose.msra.mxu0 %v14053_v45  ;;  %12085 = vmatpush3.msra.mxu1 %v13976_v47  ;;  %v4845_v30 = vsub.f32 %v4843_v29, %v4844_v21 }
 0x48a   : > { %12086 = vmatprep.mubr.f32.mxu1 %v3824_v51  ;;  %12089 = vmatprep.subr.mxu1 %v13995_v56 }
 0x48b   : > { %12116 = vmatprep.mubr.f32.mxu0 %v4333_v16  ;;  %12119 = vmatprep.subr.mxu0 %v4354_v61  ;;  %v4846_v8 = vand.u32 4294901760, %v4845_v30 }
 0x490   : > { %12117 = vmatmul.mubr.f32.vlgmr.msra.gmra.mrb[8].mxu0 %v4343_v46  ;;  %12087 = vmatmul.mubr.f32.vlgmr.msra.gmra.mrb[10].mxu1 %v3834_v3 }
 0x491   : > { %12120 = vmatpush3.xpose.msra.mxu0 %v4354_v61  ;;  %12090 = vmatpush3.msra.mxu1 %v13995_v56  ;;  %v4855_v56 = vand.u32 4294901760, %v4854_v15 }
 0x492   : > { %12091 = vmatprep.mubr.f32.mxu1 %v14047_v23  ;;  %12094 = vmatprep.subr.mxu1 %v13976_v47 }
 0x493   : > { %12121 = vmatprep.mubr.f32.mxu0 %v14032_v35  ;;  %12124 = vmatprep.subr.mxu0 %v14053_v45  ;;  %v4856_v14 = vsub.f32 %v4854_v15, %v4855_v56 }
 0x495   : > { %v4857_v34 = vand.u32 4294901760, %v4856_v14 }
 0x498   : > { %12122 = vmatmul.mubr.f32.vlgmr.msra.gmra.mrb[8].mxu0 %v14036_v10  ;;  %12092 = vmatmul.mubr.f32.vlgmr.msra.gmra.mrb[10].mxu1 %v14060_v57 }
 0x499   : > { %12125 = vmatpush3.xpose.msra.mxu0 %v14053_v45  ;;  %12095 = vmatpush3.msra.mxu1 %v13976_v47 }
 0x49a   : > { %12096 = vmatprep.mubr.f32.mxu1 %v14047_v23  ;;  %12126 = vmatprep.mubr.f32.mxu0 %v14032_v35 }
 0x49b   : > { %12129 = vmatprep.subr.mxu1 %v4767_v20 }
 0x4a0   : > { %12127 = vmatmul.mubr.f32.vlgmr.msra.gmra.mrb[8].mxu0 %v14036_v10  ;;  %12097 = vmatmul.mubr.f32.vlgmr.msra.gmra.mrb[10].mxu1 %v14060_v57 }
 0x4a1   : > { %12130 = vmatpush3.xpose.msra.mxu1 %v4767_v20  ;;  %12131 = vmatprep.mubr.f32.mxu1 %v4836_v31 }
 0x4a2   : > { %12134 = vmatprep.subr.mxu1 %v4857_v34 }
 0x4a4   : > { %12132 = vmatmul.mubr.f32.vlgmr.msra.gmra.mrb[12].mxu1 %v4846_v8 }
 0x4a5   : > { %12135 = vmatpush3.xpose.msra.mxu1 %v4857_v34  ;;  %12136 = vmatprep.mubr.f32.mxu1 %v4832_v19 }
 0x4a6   : > { %12139 = vmatprep.subr.mxu1 %v4854_v15 }
 0x4ac   : > { %12137 = vmatmul.mubr.f32.vlgmr.msra.gmra.mrb[12].mxu1 %v4842_v24 }
 0x4ad   : > { %12140 = vmatpush3.xpose.msra.mxu1 %v4854_v15  ;;  %12141 = vmatprep.mubr.f32.mxu1 %v4833_v28 }
 0x4ae   : > { %12144 = vmatprep.subr.mxu1 %v4767_v20 }
 0x4b4   : > { %12142 = vmatmul.mubr.f32.vlgmr.msra.gmra.mrb[12].mxu1 %v4843_v29 }
 0x4b5   : > { %12145 = vmatpush3.xpose.msra.mxu1 %v4767_v20  ;;  %12146 = vmatprep.mubr.f32.mxu1 %v4834_v12 }
 0x4b6   : > { %12149 = vmatprep.subr.mxu1 %v4855_v56 }
 0x4bc   : > { %12147 = vmatmul.mubr.f32.vlgmr.msra.gmra.mrb[12].mxu1 %v4844_v21 }
 0x4bd   : > { %12150 = vmatpush3.xpose.msra.mxu1 %v4855_v56  ;;  %12151 = vmatprep.mubr.f32.mxu1 %v4832_v19 }
 0x4be   : > { %12154 = vmatprep.subr.mxu1 %v4767_v20 }
 0x4c4   : > { %12152 = vmatmul.mubr.f32.vlgmr.msra.gmra.mrb[12].mxu1 %v4842_v24 }
 0x4c5   : > { %12155 = vmatpush3.xpose.msra.mxu1 %v4767_v20  ;;  %12156 = vmatprep.mubr.f32.mxu1 %v4832_v19 }
 0x4cc   : > { %12157 = vmatmul.mubr.f32.vlgmr.msra.gmra.mrb[12].mxu1 %v4842_v24 }
 0x547   : > { %v12068_v47 = vpop.f32.mrb[6].mxu0 }
 0x548   : > { %v4246_v35 = vadd.f32 %v13924_v49, %v12068_v47  ;;  %v3740_v37 = vpop.f32.mrb[7].mxu0 }
 0x549   : > { %v4245_v38 = vadd.f32 %v13926_v50, %v3740_v37 }
 0x54a   : > { %4250 = vst.msk [vmem:[#allocation2 + $0x8] sm:$0xff] %vm2210_vm1, %v4246_v35 }
 0x54b   : > { %4249 = vst.msk [vmem:[#allocation2] sm:$0xff] %vm2210_vm1, %v4245_v38 }
 0x573   : > { %v12128_v10 = vpop.f32.mrb[8].mxu0  ;;  %v12098_v39 = vpop.f32.mrb[10].mxu1 }
 0x574   : > { %v4744_v40 = vpop.f32.mrb[9].mxu0  ;;  %v5258_v18 = vsel %vm2210_vm1, %v12128_v10, -inf  ;;  %v4248_v22 = vadd.f32 %v13930_v58, %v12098_v39  ;;  %v4235_v41 = vpop.f32.mrb[11].mxu1 }
 0x575   : > { %5259 = vmax.xlane.f32.xlu1 %v5258_v18  ;;  %v5255_v42 = vsel %vm2210_vm1, %v4744_v40, -inf  ;;  %v4247_v23 = vadd.f32 %v13932_v60, %v4235_v41 }
 0x576   : > { %5256 = vmax.xlane.f32.xlu0 %v5255_v42  ;;  %4252 = vst.msk [vmem:[#allocation2 + $0x18] sm:$0xff] %vm2210_vm1, %v4248_v22 }
 0x577   : > { %4251 = vst.msk [vmem:[#allocation2 + $0x10] sm:$0xff] %vm2210_vm1, %v4247_v23 }
 0x59f   : > { %v12158_v16 = vpop.f32.mrb[12].mxu1 }
 0x5a0   : > { %v5245_v25 = vpop.f32.mrb[13].mxu1  ;;  %v5264_v33 = vsel %vm2210_vm1, %v12158_v16, -inf }
 0x5a1   : > { %v5261_v27 = vsel %vm2210_vm1, %v5245_v25, -inf }
 0x5a2   : > { %5262 = vmax.xlane.f32.xlu0 %v5261_v27 }
 0x5a6   : > { %5265 = vmax.xlane.f32.xlu0 %v5264_v33 }
 0x602   : > { %v5260_v36 = vpop.xlane.xlu1 %5259 }
 0x603   : > { %v5268_v45 = vsub.f32 %v12128_v10, %v5260_v36  ;;  %v5257_v46 = vpop.xlane.xlu0 %5256 }
 0x604   : > { %v5267_v51 = vsub.f32 %v4744_v40, %v5257_v46 }
 0x605   : > { %v5273_v52 = vmul.f32 1.442695, %v5268_v45 }
 0x606   : > { %v5271_v53 = vmul.f32 1.442695, %v5267_v51 }
 0x607   : > { %13084 = vpow2.f32 %v5273_v52 }
 0x608   : > { %13086 = vpow2.f32 %v5271_v53 }
 0x611   : > { %v13085_v55 = vpop.eup %13084 }
 0x612   : > { %v13087_v57 = vpop.eup %13086  ;;  %v5282_v59 = vsel %vm2210_vm1, %v13085_v55, 0.0 }
 0x613   : > { %5283 = vadd.xlane.f32.xlu1 %v5282_v59  ;;  %v5279_v61 = vsel %vm2210_vm1, %v13087_v57, 0.0 }
 0x614   : > { %5280 = vadd.xlane.f32.xlu0 %v5279_v61 }
 0x62f   : > { %v5263_v63 = vpop.xlane.xlu0 %5262 }
 0x630   : > { %v5269_v0 = vsub.f32 %v5245_v25, %v5263_v63 }
 0x632   : > { %v5275_v48 = vmul.f32 1.442695, %v5269_v0 }
 0x633   : > { %v5266_v1 = vpop.xlane.xlu0 %5265 }
 0x634   : > { %13088 = vpow2.f32 %v5275_v48  ;;  %v5270_v2 = vsub.f32 %v12158_v16, %v5266_v1 }
 0x636   : > { %v5277_v3 = vmul.f32 1.442695, %v5270_v2 }
 0x638   : > { %13090 = vpow2.f32 %v5277_v3 }
 0x63e   : > { %v13089_v4 = vpop.eup %13088 }
 0x63f   : > { %v5285_v5 = vsel %vm2210_vm1, %v13089_v4, 0.0 }
 0x640   : > { %5286 = vadd.xlane.f32.xlu0 %v5285_v5 }
 0x642   : > { %v13091_v6 = vpop.eup %13090 }
 0x643   : > { %v5288_v7 = vsel %vm2210_vm1, %v13091_v6, 0.0 }
 0x644   : > { %5289 = vadd.xlane.f32.xlu1 %v5288_v7 }
 0x655   : > { %5803 = vrot.lane.b32.xlu1 %v13971_v43, %s13396_s28 }
 0x656   : > { %5304 = vrot.lane.b32.xlu0 %v13973_v44, %s13396_s28  ;;  %s13308_s28 = sshll.u32 %s13402_s26, 4  ;;  %s13309_s28 = int_to_ptr.vmem [resolvable:$false] %s13308_s28 }
 0x657   : > { %p13311_p3 = scmp.lt.s32.totalorder %s14561_s27, %s13309_s28 }
 0x659   : > { %6326 = vrot.lane.b32.xlu1 %v13926_v50, %s13397_s2 }
 0x65a   : > { %6827 = vrot.lane.b32.xlu0 %v13932_v60, %s13397_s2 }
 0x65d   : > { %6328 = vrot.lane.b32.xlu1 %v13924_v49, %s13397_s2 }
 0x65e   : > { %6829 = vrot.lane.b32.xlu0 %v13930_v58, %s13397_s2 }
 0x661   : > { %6330 = vrot.lane.b32.xlu1 %v13939_v11, %s13397_s2 }
 0x665   : > { %6831 = vrot.lane.b32.xlu1 %v13943_v32, %s13397_s2 }
 0x6a0   : > { %v5284_v13 = vpop.xlane.xlu1 %5283 }
 0x6a1   : > { %v5281_v62 = vpop.xlane.xlu0 %5280 }
 0x6a2   : > { %13092 = vrcp.f32 %v5281_v62 }
 0x6a3   : > { %13094 = vrcp.f32 %v5284_v13 }
 0x6ac   : > { %v13093_v54 = vpop.eup %13092 }
 0x6ad   : > { %v5299_v9 = vmul.f32 %v13093_v54, %v13087_v57  ;;  %v13095_v29 = vpop.eup %13094 }
 0x6ae   : > { %v5300_v12 = vmul.f32 %v13095_v29, %v13085_v55 }
 0x6af   : > { %v5308_v17 = vsel %vm2210_vm1, %v5299_v9, 0 }
 0x6b0   : > { %v14129_v19 = vand.u32 4294901760, %v5308_v17  ;;  %v5311_v56 = vsel %vm2210_vm1, %v5300_v12, 0 }
 0x6b1   : > { %v14137_v21 = vand.u32 4294901760, %v5311_v56 }
 0x6b2   : > { %v14132_v20 = vsub.f32 %v5308_v17, %v14129_v19 }
 0x6b3   : > { %v14140_v26 = vsub.f32 %v5311_v56, %v14137_v21 }
 0x6b4   : > { %v5381_v24 = vand.u32 4294901760, %v14132_v20 }
 0x6b5   : > { %v5391_v14 = vand.u32 4294901760, %v14140_v26 }
 0x6b6   : > { %v5382_v28 = vsub.f32 %v14132_v20, %v5381_v24 }
 0x6b7   : > { %v5392_v31 = vsub.f32 %v14140_v26, %v5391_v14 }
 0x6b8   : > { %v5383_v15 = vand.u32 4294901760, %v5382_v28 }
 0x6b9   : > { %v5393_v37 = vand.u32 4294901760, %v5392_v31 }
 0x6ba   : > { %12161 = vmatprep.mubr.f32.mxu0 %v5383_v15 }
 0x6cd   : > { %v5287_v30 = vpop.xlane.xlu0 %5286 }
 0x6ce   : > { %13096 = vrcp.f32 %v5287_v30 }
 0x6d1   : > { %v5305_v34 = vpop.permute.xlu0 %5304  ;;  %v5290_v8 = vpop.xlane.xlu1 %5289 }
 0x6d2   : > { %v14146_v47 = vand.u32 4294901760, %v5305_v34  ;;  %13098 = vrcp.f32 %v5290_v8 }
 0x6d4   : > { %v5401_v35 = vsub.f32 %v5305_v34, %v14146_v47  ;;  %12159 = vmatprep.subr.mxu0 %v14146_v47 }
 0x6d5   : > { %12160 = vmatpush3.msra.mxu0 %v14146_v47  ;;  %v5804_v38 = vpop.permute.xlu1 %5803 }
 0x6d6   : > { %v14151_v10 = vand.u32 4294901760, %v5804_v38  ;;  %12162 = vmatmul.mubr.f32.vlgmr.msra.gmra.mrb[10].mxu0 %v5393_v37  ;;  %v5402_v39 = vand.u32 4294901760, %v5401_v35 }
 0x6d7   : > { %12166 = vmatprep.mubr.f32.mxu0 %v14129_v19 }
 0x6d8   : > { %v13097_v40 = vpop.eup %13096  ;;  %v5900_v18 = vsub.f32 %v5804_v38, %v14151_v10  ;;  %12189 = vmatprep.subr.mxu1 %v14151_v10  ;;  %v5403_v22 = vsub.f32 %v5401_v35, %v5402_v39 }
 0x6d9   : > { %v5301_v41 = vmul.f32 %v13097_v40, %v13089_v4  ;;  %12190 = vmatpush3.msra.mxu1 %v14151_v10  ;;  %v6327_v27 = vpop.permute.xlu1 %6326 }
 0x6da   : > { %v5404_v42 = vand.u32 4294901760, %v5403_v22  ;;  %v14157_v23 = vand.u32 4294901760, %v5900_v18  ;;  %v6332_v3 = vsel %vm2210_vm1, %v6327_v27, 0 }
 0x6db   : > { %v5807_v16 = vsel %vm2210_vm1, %v5301_v41, 0  ;;  %v14176_v5 = vand.u32 4294901760, %v6332_v3 }
 0x6dc   : > { %v13099_v25 = vpop.eup %13098  ;;  %12164 = vmatprep.subr.mxu0 %v5404_v42  ;;  %v5902_v33 = vsub.f32 %v5900_v18, %v14157_v23  ;;  %v14161_v36 = vand.u32 4294901760, %v5807_v16 }
 0x6dd   : > { %v5302_v45 = vmul.f32 %v13099_v25, %v13091_v6  ;;  %12165 = vmatpush3.msra.mxu0 %v5404_v42  ;;  %v6329_v57 = vpop.permute.xlu1 %6328  ;;  %v14188_v54 = vsub.f32 %v6332_v3, %v14176_v5 }
 0x6de   : > { %12167 = vmatmul.mubr.f32.vlgmr.msra.gmra.mrb[10].mxu0 %v14137_v21  ;;  %12169 = vmatprep.subr.mxu0 %v5401_v35  ;;  %v5903_v46 = vand.u32 4294901760, %v5902_v33  ;;  %v5879_v51 = vsub.f32 %v5807_v16, %v14161_v36  ;;  %v6334_v6 = vsel %vm2210_vm1, %v6329_v57, 0 }
 0x6df   : > { %12170 = vmatpush3.msra.mxu0 %v5401_v35  ;;  %12171 = vmatprep.mubr.f32.mxu0 %v14132_v20  ;;  %v5810_v52 = vsel %vm2210_vm1, %v5302_v45, 0  ;;  %v14184_v62 = vand.u32 4294901760, %v6334_v6  ;;  %v6406_v17 = vand.u32 4294901760, %v14188_v54 }
 0x6e0   : > { %12174 = vmatprep.subr.mxu0 %v14146_v47  ;;  %12194 = vmatprep.subr.mxu1 %v5903_v46  ;;  %v5880_v53 = vand.u32 4294901760, %v5879_v51  ;;  %v14168_v55 = vand.u32 4294901760, %v5810_v52 }
 0x6e1   : > { %v6331_v1 = vpop.permute.xlu1 %6330  ;;  %v14193_v13 = vsub.f32 %v6334_v6, %v14184_v62  ;;  %v6407_v15 = vsub.f32 %v14188_v54, %v6406_v17 }
 0x6e2   : > { %v5881_v59 = vsub.f32 %v5879_v51, %v5880_v53  ;;  %v5889_v61 = vsub.f32 %v5810_v52, %v14168_v55  ;;  %v6336_v4 = vsel %vm2210_vm1, %v6331_v1, 0 }
 0x6e3   : > { %v14179_v7 = vand.u32 4294901760, %v6336_v4  ;;  %v6416_v28 = vand.u32 4294901760, %v14193_v13  ;;  %v6408_v56 = vand.u32 4294901760, %v6407_v15 }
 0x6e4   : > { %v5882_v63 = vand.u32 4294901760, %v5881_v59  ;;  %v5890_v0 = vand.u32 4294901760, %v5889_v61 }
 0x6e5   : > { %v6426_v9 = vsub.f32 %v6336_v4, %v14179_v7  ;;  %v6417_v12 = vsub.f32 %v14193_v13, %v6416_v28 }
 0x6e6   : > { %12172 = vmatmul.mubr.f32.vlgmr.msra.gmra.mrb[10].mxu0 %v14140_v26  ;;  %12191 = vmatprep.mubr.f32.mxu1 %v5882_v63  ;;  %v5891_v48 = vsub.f32 %v5889_v61, %v5890_v0 }
 0x6e7   : > { %12175 = vmatpush3.msra.mxu0 %v14146_v47  ;;  %12176 = vmatprep.mubr.f32.mxu0 %v5381_v24  ;;  %v14198_v20 = vand.u32 4294901760, %v6426_v9  ;;  %v6828_v24 = vpop.permute.xlu0 %6827  ;;  %v6418_v31 = vand.u32 4294901760, %v6417_v12 }
 0x6e8   : > { %12179 = vmatprep.subr.mxu0 %v5402_v39  ;;  %v5892_v2 = vand.u32 4294901760, %v5891_v48  ;;  %v6833_v30 = vsel %vm2210_vm1, %v6828_v24, 0 }
 0x6e9   : > { %v6428_v29 = vsub.f32 %v6426_v9, %v14198_v20 }
 0x6ea   : > { %12192 = vmatmul.mubr.f32.vlgmr.msra.gmra.mrb[14].mxu1 %v5892_v2 }
 0x6eb   : > { %12195 = vmatpush3.msra.mxu1 %v5903_v46  ;;  %12196 = vmatprep.mubr.f32.mxu1 %v14161_v36  ;;  %v6830_v26 = vpop.permute.xlu0 %6829 }
 0x6ec   : > { %12199 = vmatprep.subr.mxu1 %v5900_v18  ;;  %v6835_v8 = vsel %vm2210_vm1, %v6830_v26, 0 }
 0x6ee   : > { %12177 = vmatmul.mubr.f32.vlgmr.msra.gmra.mrb[10].mxu0 %v5391_v14  ;;  %v6429_v14 = vand.u32 4294901760, %v6428_v29 }
 0x6ef   : > { %12180 = vmatpush3.msra.mxu0 %v5402_v39  ;;  %12181 = vmatprep.mubr.f32.mxu0 %v14129_v19 }
 0x6f0   : > { %12184 = vmatprep.subr.mxu0 %v14146_v47 }
 0x6f2   : > { %12197 = vmatmul.mubr.f32.vlgmr.msra.gmra.mrb[14].mxu1 %v14168_v55 }
 0x6f3   : > { %12200 = vmatpush3.msra.mxu1 %v5900_v18  ;;  %12201 = vmatprep.mubr.f32.mxu1 %v5879_v51 }
 0x6f4   : > { %12204 = vmatprep.subr.mxu1 %v14151_v10 }
 0x6f6   : > { %12182 = vmatmul.mubr.f32.vlgmr.msra.gmra.mrb[10].mxu0 %v14137_v21 }
 0x6f7   : > { %12185 = vmatpush3.msra.mxu0 %v14146_v47  ;;  %12186 = vmatprep.mubr.f32.mxu0 %v14129_v19  ;;  %v6832_v19 = vpop.permute.xlu1 %6831  ;;  %v6905_v47 = vand.u32 4294901760, %v6833_v30 }
 0x6f8   : > { %12219 = vmatprep.subr.mxu0 %v14179_v7  ;;  %v6837_v34 = vsel %vm2210_vm1, %v6832_v19, 0 }
 0x6f9   : > { %v6840_v35 = vand.u32 4294901760, %v6837_v34  ;;  %v6906_v37 = vsub.f32 %v6833_v30, %v6905_v47 }
 0x6fa   : > { %12202 = vmatmul.mubr.f32.vlgmr.msra.gmra.mrb[14].mxu1 %v5889_v61 }
 0x6fb   : > { %12205 = vmatpush3.msra.mxu1 %v14151_v10  ;;  %12206 = vmatprep.mubr.f32.mxu1 %v5880_v53  ;;  %v6927_v38 = vsub.f32 %v6837_v34, %v6840_v35  ;;  %v6907_v40 = vand.u32 4294901760, %v6906_v37 }
 0x6fc   : > { %12209 = vmatprep.subr.mxu1 %v14157_v23 }
 0x6fd   : > { %v6928_v18 = vand.u32 4294901760, %v6927_v38  ;;  %v6908_v41 = vsub.f32 %v6906_v37, %v6907_v40 }
 0x6fe   : > { %12187 = vmatmul.mubr.f32.vlgmr.msra.gmra.mrb[10].mxu0 %v14137_v21  ;;  %v6915_v21 = vand.u32 4294901760, %v6835_v8 }
 0x6ff   : > { %12220 = vmatpush3.xpose.msra.mxu0 %v14179_v7  ;;  %12221 = vmatprep.mubr.f32.mxu0 %v6408_v56  ;;  %v6929_v42 = vsub.f32 %v6927_v38, %v6928_v18 }
 0x700   : > { %12224 = vmatprep.subr.mxu0 %v6429_v14  ;;  %v6916_v39 = vsub.f32 %v6835_v8, %v6915_v21 }
 0x701   : > { %v6930_v16 = vand.u32 4294901760, %v6929_v42 }
 0x702   : > { %12207 = vmatmul.mubr.f32.vlgmr.msra.gmra.mrb[14].mxu1 %v5890_v0  ;;  %12222 = vmatmul.mubr.f32.vlgmr.msra.gmra.mrb[12].mxu0 %v6418_v31  ;;  %v6917_v22 = vand.u32 4294901760, %v6916_v39 }
 0x703   : > { %12210 = vmatpush3.msra.mxu1 %v14157_v23  ;;  %12225 = vmatpush3.xpose.msra.mxu0 %v6429_v14 }
 0x704   : > { %12211 = vmatprep.mubr.f32.mxu1 %v14161_v36  ;;  %12214 = vmatprep.subr.mxu1 %v14151_v10  ;;  %v6918_v23 = vsub.f32 %v6916_v39, %v6917_v22 }
 0x705   : > { %12226 = vmatprep.mubr.f32.mxu0 %v14176_v5  ;;  %12229 = vmatprep.subr.mxu0 %v6426_v9 }
 0x706   : > { %v6919_v25 = vand.u32 4294901760, %v6918_v23 }
 0x70a   : > { %12212 = vmatmul.mubr.f32.vlgmr.msra.gmra.mrb[14].mxu1 %v14168_v55  ;;  %12227 = vmatmul.mubr.f32.vlgmr.msra.gmra.mrb[12].mxu0 %v14184_v62 }
 0x70b   : > { %12215 = vmatpush3.msra.mxu1 %v14151_v10  ;;  %12230 = vmatpush3.xpose.msra.mxu0 %v6426_v9  ;;  %v6909_v10 = vand.u32 4294901760, %v6908_v41 }
 0x70c   : > { %12216 = vmatprep.mubr.f32.mxu1 %v14161_v36  ;;  %12231 = vmatprep.mubr.f32.mxu0 %v14188_v54 }
 0x70d   : > { %12234 = vmatprep.subr.mxu0 %v14179_v7  ;;  %12249 = vmatprep.subr.mxu1 %v6840_v35 }
 0x712   : > { %12217 = vmatmul.mubr.f32.vlgmr.msra.gmra.mrb[14].mxu1 %v14168_v55  ;;  %12232 = vmatmul.mubr.f32.vlgmr.msra.gmra.mrb[12].mxu0 %v14193_v13 }
 0x713   : > { %12235 = vmatpush3.xpose.msra.mxu0 %v14179_v7  ;;  %12250 = vmatpush3.xpose.msra.mxu1 %v6840_v35 }
 0x714   : > { %12236 = vmatprep.mubr.f32.mxu0 %v6406_v17  ;;  %12239 = vmatprep.subr.mxu0 %v14198_v20 }
 0x715   : > { %12251 = vmatprep.mubr.f32.mxu1 %v6909_v10  ;;  %12254 = vmatprep.subr.mxu1 %v6930_v16 }
 0x716   : > { %12252 = vmatmul.mubr.f32.vlgmr.msra.gmra.mrb[16].mxu1 %v6919_v25 }
 0x717   : > { %12255 = vmatpush3.xpose.msra.mxu1 %v6930_v16  ;;  %12256 = vmatprep.mubr.f32.mxu1 %v6905_v47 }
 0x718   : > { %12259 = vmatprep.subr.mxu1 %v6927_v38 }
 0x71a   : > { %12237 = vmatmul.mubr.f32.vlgmr.msra.gmra.mrb[12].mxu0 %v6416_v28 }
 0x71b   : > { %12240 = vmatpush3.xpose.msra.mxu0 %v14198_v20  ;;  %12241 = vmatprep.mubr.f32.mxu0 %v14176_v5 }
 0x71c   : > { %12244 = vmatprep.subr.mxu0 %v14179_v7 }
 0x71e   : > { %12257 = vmatmul.mubr.f32.vlgmr.msra.gmra.mrb[16].mxu1 %v6915_v21 }
 0x71f   : > { %12260 = vmatpush3.xpose.msra.mxu1 %v6927_v38  ;;  %12261 = vmatprep.mubr.f32.mxu1 %v6906_v37 }
 0x720   : > { %12264 = vmatprep.subr.mxu1 %v6840_v35 }
 0x722   : > { %12242 = vmatmul.mubr.f32.vlgmr.msra.gmra.mrb[12].mxu0 %v14184_v62 }
 0x723   : > { %12245 = vmatpush3.xpose.msra.mxu0 %v14179_v7  ;;  %12246 = vmatprep.mubr.f32.mxu0 %v14176_v5 }
 0x726   : > { %12262 = vmatmul.mubr.f32.vlgmr.msra.gmra.mrb[16].mxu1 %v6916_v39 }
 0x727   : > { %12265 = vmatpush3.xpose.msra.mxu1 %v6840_v35  ;;  %12266 = vmatprep.mubr.f32.mxu1 %v6907_v40 }
 0x728   : > { %12269 = vmatprep.subr.mxu1 %v6928_v18 }
 0x72a   : > { %12247 = vmatmul.mubr.f32.vlgmr.msra.gmra.mrb[12].mxu0 %v14184_v62 }
 0x72e   : > { %12267 = vmatmul.mubr.f32.vlgmr.msra.gmra.mrb[16].mxu1 %v6917_v22 }
 0x72f   : > { %12270 = vmatpush3.xpose.msra.mxu1 %v6928_v18  ;;  %12271 = vmatprep.mubr.f32.mxu1 %v6905_v47 }
 0x730   : > { %12274 = vmatprep.subr.mxu1 %v6840_v35 }
 0x736   : > { %12272 = vmatmul.mubr.f32.vlgmr.msra.gmra.mrb[16].mxu1 %v6915_v21 }
 0x737   : > { %12275 = vmatpush3.xpose.msra.mxu1 %v6840_v35  ;;  %12276 = vmatprep.mubr.f32.mxu1 %v6905_v47 }
 0x73e   : > { %12277 = vmatmul.mubr.f32.vlgmr.msra.gmra.mrb[16].mxu1 %v6915_v21 }
 0x7d1   : > { %v14239_v27 = vpop.f32.mrb[10].mxu0 }
 0x7d2   : > { %v14241_v33 = vpop.f32.mrb[11].mxu0 }
 0x7e5   : > { %v14243_v36 = vpop.f32.mrb[14].mxu1 }
 0x7e6   : > { %v14245_v45 = vpop.f32.mrb[15].mxu1 }
 0x7fd   : > { %v12248_v46 = vpop.f32.mrb[12].mxu0 }
 0x7fe   : > { %v6817_v51 = vpop.f32.mrb[13].mxu0  ;;  %v7331_v52 = vsel %vm2210_vm1, %v12248_v46, -inf }
 0x7ff   : > { %7332 = vmax.xlane.f32.xlu1 %v7331_v52  ;;  %v7328_v53 = vsel %vm2210_vm1, %v6817_v51, -inf }
 0x800   : > { %7329 = vmax.xlane.f32.xlu0 %v7328_v53 }
 0x811   : > { %v12278_v55 = vpop.f32.mrb[16].mxu1 }
 0x812   : > { %v7318_v57 = vpop.f32.mrb[17].mxu1  ;;  %v7337_v61 = vsel %vm2210_vm1, %v12278_v55, -inf }
 0x813   : > { %v7334_v59 = vsel %vm2210_vm1, %v7318_v57, -inf }
 0x814   : > { %7335 = vmax.xlane.f32.xlu0 %v7334_v59 }
 0x818   : > { %7338 = vmax.xlane.f32.xlu0 %v7337_v61 }
 0x88c   : > { %v7333_v63 = vpop.xlane.xlu1 %7332 }
 0x88d   : > { %v7341_v0 = vsub.f32 %v12248_v46, %v7333_v63  ;;  %v7330_v48 = vpop.xlane.xlu0 %7329 }
 0x88e   : > { %v7340_v1 = vsub.f32 %v6817_v51, %v7330_v48 }
 0x88f   : > { %v7346_v2 = vmul.f32 1.442695, %v7341_v0 }
 0x890   : > { %v7344_v3 = vmul.f32 1.442695, %v7340_v1 }
 0x891   : > { %13100 = vpow2.f32 %v7346_v2 }
 0x892   : > { %13102 = vpow2.f32 %v7344_v3 }
 0x89b   : > { %v13101_v4 = vpop.eup %13100 }
 0x89c   : > { %v13103_v5 = vpop.eup %13102  ;;  %v7355_v6 = vsel %vm2210_vm1, %v13101_v4, 0.0 }
 0x89d   : > { %7356 = vadd.xlane.f32.xlu1 %v7355_v6  ;;  %v7352_v7 = vsel %vm2210_vm1, %v13103_v5, 0.0 }
 0x89e   : > { %7353 = vadd.xlane.f32.xlu0 %v7352_v7 }
 0x8a1   : > { %v7336_v62 = vpop.xlane.xlu0 %7335 }
 0x8a2   : > { %v7342_v54 = vsub.f32 %v7318_v57, %v7336_v62 }
 0x8a4   : > { %v7348_v9 = vmul.f32 1.442695, %v7342_v54 }
 0x8a5   : > { %v7339_v13 = vpop.xlane.xlu0 %7338 }
 0x8a6   : > { %13104 = vpow2.f32 %v7348_v9  ;;  %v7343_v17 = vsub.f32 %v12278_v55, %v7339_v13 }
 0x8a8   : > { %v7350_v20 = vmul.f32 1.442695, %v7343_v17 }
 0x8aa   : > { %13106 = vpow2.f32 %v7350_v20 }
 0x8b0   : > { %v13105_v24 = vpop.eup %13104 }
 0x8b1   : > { %v7358_v28 = vsel %vm2210_vm1, %v13105_v24, 0.0 }
 0x8b2   : > { %7359 = vadd.xlane.f32.xlu0 %v7358_v28 }
 0x8b4   : > { %v13107_v15 = vpop.eup %13106 }
 0x8b5   : > { %v7361_v29 = vsel %vm2210_vm1, %v13107_v15, 0.0 }
 0x8b6   : > { %7362 = vadd.xlane.f32.xlu1 %v7361_v29 }
 0x8c7   : > { %7874 = vrot.lane.b32.xlu1 %v13971_v43, %s13397_s2 }
 0x8c8   : > { %7376 = vrot.lane.b32.xlu0 %v13973_v44, %s13397_s2  ;;  %s13310_s2 = scalar_lea.vmem %s13309_s28, 1024 }
 0x8c9   : > { %p13312_p5 = scmp.lt.s32.totalorder %s13310_s2, %s13304_s18 }
 0x8cb   : > { %8397 = vrot.lane.b32.xlu1 %v13926_v50, %s13398_s10  ;;  %p13313_p9 = por %p13312_p5, %p13311_p3 }
 0x8cc   : > { %8898 = vrot.lane.b32.xlu0 %v13932_v60, %s13398_s10 }
 0x8cd   : > { %p13314_p8 = pnand %p13313_p9, %p13307_p6 }
 0x8cf   : > { %8399 = vrot.lane.b32.xlu1 %v13924_v49, %s13398_s10 }
 0x8d0   : > { %8900 = vrot.lane.b32.xlu0 %v13930_v58, %s13398_s10 }
 0x8d3   : > { %8401 = vrot.lane.b32.xlu1 %v13939_v11, %s13398_s10 }
 0x8d7   : > { %8902 = vrot.lane.b32.xlu1 %v13943_v32, %s13398_s10 }
 0x92a   : > { %v7357_v12 = vpop.xlane.xlu1 %7356 }
 0x92b   : > { %13108 = vrcp.f32 %v7357_v12  ;;  %v7354_v19 = vpop.xlane.xlu0 %7353 }
 0x92c   : > { %13110 = vrcp.f32 %v7354_v19 }
 0x935   : > { %v13109_v56 = vpop.eup %13108 }
 0x936   : > { %v13111_v26 = vpop.eup %13110  ;;  %v7373_v14 = vmul.f32 %v13109_v56, %v13101_v4 }
 0x937   : > { %v7372_v30 = vmul.f32 %v13111_v26, %v13103_v5 }
 0x938   : > { %v7383_v31 = vsel %vm2210_vm1, %v7373_v14, 0 }
 0x939   : > { %v7380_v34 = vsel %vm2210_vm1, %v7372_v30, 0  ;;  %v14273_v8 = vand.u32 4294901760, %v7383_v31 }
 0x93a   : > { %v14275_v47 = vand.u32 4294901760, %v7380_v34 }
 0x93b   : > { %v14278_v11 = vsub.f32 %v7383_v31, %v14273_v8 }
 0x93c   : > { %v7452_v32 = vsub.f32 %v7380_v34, %v14275_v47 }
 0x93d   : > { %v7463_v21 = vand.u32 4294901760, %v14278_v11 }
 0x93e   : > { %v7453_v35 = vand.u32 4294901760, %v7452_v32 }
 0x93f   : > { %v7360_v37 = vpop.xlane.xlu0 %7359  ;;  %v7464_v40 = vsub.f32 %v14278_v11, %v7463_v21 }
 0x940   : > { %13112 = vrcp.f32 %v7360_v37  ;;  %v7454_v38 = vsub.f32 %v7452_v32, %v7453_v35 }
 0x941   : > { %v7465_v23 = vand.u32 4294901760, %v7464_v40 }
 0x942   : > { %v7455_v39 = vand.u32 4294901760, %v7454_v38 }
 0x943   : > { %v7377_v18 = vpop.permute.xlu0 %7376  ;;  %v7363_v22 = vpop.xlane.xlu1 %7362 }
 0x944   : > { %v14285_v41 = vand.u32 4294901760, %v7377_v18  ;;  %13114 = vrcp.f32 %v7363_v22  ;;  %12281 = vmatprep.mubr.f32.mxu0 %v7455_v39 }
 0x946   : > { %v7473_v42 = vsub.f32 %v7377_v18, %v14285_v41  ;;  %12279 = vmatprep.subr.mxu0 %v14285_v41 }
 0x947   : > { %12280 = vmatpush3.msra.mxu0 %v14285_v41  ;;  %v7875_v10 = vpop.permute.xlu1 %7874 }
 0x948   : > { %v14290_v16 = vand.u32 4294901760, %v7875_v10  ;;  %12282 = vmatmul.mubr.f32.vlgmr.msra.gmra.mrb[14].mxu0 %v7465_v23  ;;  %v7474_v25 = vand.u32 4294901760, %v7473_v42 }
 0x949   : > { %12286 = vmatprep.mubr.f32.mxu0 %v14275_v47 }
 0x94a   : > { %v13113_v46 = vpop.eup %13112  ;;  %v7971_v51 = vsub.f32 %v7875_v10, %v14290_v16  ;;  %12309 = vmatprep.subr.mxu1 %v14290_v16  ;;  %v7475_v52 = vsub.f32 %v7473_v42, %v7474_v25 }
 0x94b   : > { %v7374_v53 = vmul.f32 %v13113_v46, %v13105_v24  ;;  %12310 = vmatpush3.msra.mxu1 %v14290_v16  ;;  %v8398_v63 = vpop.permute.xlu1 %8397 }
 0x94c   : > { %v7476_v55 = vand.u32 4294901760, %v7475_v52  ;;  %v14296_v57 = vand.u32 4294901760, %v7971_v51  ;;  %v8403_v28 = vsel %vm2210_vm1, %v8398_v63, 0 }
 0x94d   : > { %v7878_v59 = vsel %vm2210_vm1, %v7374_v53, 0  ;;  %v14314_v29 = vand.u32 4294901760, %v8403_v28 }
 0x94e   : > { %v13115_v61 = vpop.eup %13114  ;;  %12284 = vmatprep.subr.mxu0 %v7476_v55  ;;  %v7973_v0 = vsub.f32 %v7971_v51, %v14296_v57  ;;  %v14300_v48 = vand.u32 4294901760, %v7878_v59 }
 0x94f   : > { %v7375_v1 = vmul.f32 %v13115_v61, %v13107_v15  ;;  %12285 = vmatpush3.msra.mxu0 %v7476_v55  ;;  %v8400_v7 = vpop.permute.xlu1 %8399  ;;  %v14326_v26 = vsub.f32 %v8403_v28, %v14314_v29 }
 0x950   : > { %12287 = vmatmul.mubr.f32.vlgmr.msra.gmra.mrb[14].mxu0 %v14273_v8  ;;  %12289 = vmatprep.subr.mxu0 %v7473_v42  ;;  %v7974_v2 = vand.u32 4294901760, %v7973_v0  ;;  %v7950_v3 = vsub.f32 %v7878_v59, %v14300_v48  ;;  %v8405_v12 = vsel %vm2210_vm1, %v8400_v7, 0 }
 0x951   : > { %12290 = vmatpush3.msra.mxu0 %v7473_v42  ;;  %12291 = vmatprep.mubr.f32.mxu0 %v7452_v32  ;;  %v7881_v4 = vsel %vm2210_vm1, %v7375_v1, 0  ;;  %v14322_v56 = vand.u32 4294901760, %v8405_v12  ;;  %v8477_v31 = vand.u32 4294901760, %v14326_v26 }
 0x952   : > { %12294 = vmatprep.subr.mxu0 %v14285_v41  ;;  %12314 = vmatprep.subr.mxu1 %v7974_v2  ;;  %v7951_v5 = vand.u32 4294901760, %v7950_v3  ;;  %v14306_v6 = vand.u32 4294901760, %v7881_v4 }
 0x953   : > { %v8402_v20 = vpop.permute.xlu1 %8401  ;;  %v14331_v30 = vsub.f32 %v8405_v12, %v14322_v56 }
 0x954   : > { %v7952_v62 = vsub.f32 %v7950_v3, %v7951_v5  ;;  %v7960_v54 = vsub.f32 %v7881_v4, %v14306_v6  ;;  %v8407_v15 = vsel %vm2210_vm1, %v8402_v20, 0 }
 0x955   : > { %v14317_v19 = vand.u32 4294901760, %v8407_v15  ;;  %v8487_v32 = vand.u32 4294901760, %v14331_v30 }
 0x956   : > { %v7953_v9 = vand.u32 4294901760, %v7952_v62  ;;  %v7961_v13 = vand.u32 4294901760, %v7960_v54 }
 0x957   : > { %v8497_v14 = vsub.f32 %v8407_v15, %v14317_v19  ;;  %v8488_v37 = vsub.f32 %v14331_v30, %v8487_v32 }
 0x958   : > { %12292 = vmatmul.mubr.f32.vlgmr.msra.gmra.mrb[14].mxu0 %v14278_v11  ;;  %12311 = vmatprep.mubr.f32.mxu1 %v7953_v9  ;;  %v7962_v17 = vsub.f32 %v7960_v54, %v7961_v13  ;;  %v8899_v11 = vpop.permute.xlu0 %8898 }
 0x959   : > { %12295 = vmatpush3.msra.mxu0 %v14285_v41  ;;  %12296 = vmatprep.mubr.f32.mxu0 %v7453_v35  ;;  %v14336_v34 = vand.u32 4294901760, %v8497_v14  ;;  %v8478_v35 = vsub.f32 %v14326_v26, %v8477_v31  ;;  %v8904_v18 = vsel %vm2210_vm1, %v8899_v11, 0  ;;  %v8489_v22 = vand.u32 4294901760, %v8488_v37 }
 0x95a   : > { %12299 = vmatprep.subr.mxu0 %v7474_v25  ;;  %v7963_v24 = vand.u32 4294901760, %v7962_v17  ;;  %v8976_v23 = vand.u32 4294901760, %v8904_v18 }
 0x95b   : > { %v8479_v38 = vand.u32 4294901760, %v8478_v35 }
 0x95c   : > { %12312 = vmatmul.mubr.f32.vlgmr.msra.gmra.mrb[18].mxu1 %v7963_v24  ;;  %v8901_v39 = vpop.permute.xlu0 %8900 }
 0x95d   : > { %12315 = vmatpush3.msra.mxu1 %v7974_v2  ;;  %12316 = vmatprep.mubr.f32.mxu1 %v14300_v48  ;;  %v8906_v42 = vsel %vm2210_vm1, %v8901_v39, 0 }
 0x95e   : > { %12319 = vmatprep.subr.mxu1 %v7971_v51 }
 0x960   : > { %12297 = vmatmul.mubr.f32.vlgmr.msra.gmra.mrb[14].mxu0 %v7463_v21  ;;  %v8499_v21 = vsub.f32 %v8497_v14, %v14336_v34 }
 0x961   : > { %12300 = vmatpush3.msra.mxu0 %v7474_v25  ;;  %12301 = vmatprep.mubr.f32.mxu0 %v14275_v47  ;;  %v8977_v25 = vsub.f32 %v8904_v18, %v8976_v23 }
 0x962   : > { %12304 = vmatprep.subr.mxu0 %v14285_v41  ;;  %v8500_v40 = vand.u32 4294901760, %v8499_v21 }
 0x963   : > { %v8978_v52 = vand.u32 4294901760, %v8977_v25 }
 0x964   : > { %12317 = vmatmul.mubr.f32.vlgmr.msra.gmra.mrb[18].mxu1 %v14306_v6 }
 0x965   : > { %12320 = vmatpush3.msra.mxu1 %v7971_v51  ;;  %12321 = vmatprep.mubr.f32.mxu1 %v7950_v3 }
 0x966   : > { %12324 = vmatprep.subr.mxu1 %v14290_v16 }
 0x968   : > { %12302 = vmatmul.mubr.f32.vlgmr.msra.gmra.mrb[14].mxu0 %v14273_v8 }
 0x969   : > { %12305 = vmatpush3.msra.mxu0 %v14285_v41  ;;  %12306 = vmatprep.mubr.f32.mxu0 %v14275_v47  ;;  %v8903_v47 = vpop.permute.xlu1 %8902 }
 0x96a   : > { %12339 = vmatprep.subr.mxu0 %v14317_v19  ;;  %v8908_v41 = vsel %vm2210_vm1, %v8903_v47, 0 }
 0x96b   : > { %v8911_v10 = vand.u32 4294901760, %v8908_v41 }
 0x96c   : > { %12322 = vmatmul.mubr.f32.vlgmr.msra.gmra.mrb[18].mxu1 %v7960_v54 }
 0x96d   : > { %12325 = vmatpush3.msra.mxu1 %v14290_v16  ;;  %12326 = vmatprep.mubr.f32.mxu1 %v7951_v5  ;;  %v8998_v46 = vsub.f32 %v8908_v41, %v8911_v10 }
 0x96e   : > { %12329 = vmatprep.subr.mxu1 %v14296_v57 }
 0x96f   : > { %v8999_v53 = vand.u32 4294901760, %v8998_v46 }
 0x970   : > { %12307 = vmatmul.mubr.f32.vlgmr.msra.gmra.mrb[14].mxu0 %v14273_v8  ;;  %v8986_v8 = vand.u32 4294901760, %v8906_v42 }
 0x971   : > { %12340 = vmatpush3.xpose.msra.mxu0 %v14317_v19  ;;  %12341 = vmatprep.mubr.f32.mxu0 %v8479_v38  ;;  %v9000_v59 = vsub.f32 %v8998_v46, %v8999_v53 }
 0x972   : > { %12344 = vmatprep.subr.mxu0 %v8500_v40  ;;  %v8987_v51 = vsub.f32 %v8906_v42, %v8986_v8 }
 0x973   : > { %v9001_v63 = vand.u32 4294901760, %v9000_v59 }
 0x974   : > { %12327 = vmatmul.mubr.f32.vlgmr.msra.gmra.mrb[18].mxu1 %v7961_v13  ;;  %12342 = vmatmul.mubr.f32.vlgmr.msra.gmra.mrb[16].mxu0 %v8489_v22  ;;  %v8988_v55 = vand.u32 4294901760, %v8987_v51 }
 0x975   : > { %12330 = vmatpush3.msra.mxu1 %v14296_v57  ;;  %12345 = vmatpush3.xpose.msra.mxu0 %v8500_v40  ;;  %v8979_v57 = vsub.f32 %v8977_v25, %v8978_v52 }
 0x976   : > { %12331 = vmatprep.mubr.f32.mxu1 %v14300_v48  ;;  %12334 = vmatprep.subr.mxu1 %v14290_v16  ;;  %v8989_v61 = vsub.f32 %v8987_v51, %v8988_v55 }
 0x977   : > { %12346 = vmatprep.mubr.f32.mxu0 %v14314_v29  ;;  %12349 = vmatprep.subr.mxu0 %v8497_v14 }
 0x978   : > { %v8990_v0 = vand.u32 4294901760, %v8989_v61 }
 0x97c   : > { %12332 = vmatmul.mubr.f32.vlgmr.msra.gmra.mrb[18].mxu1 %v14306_v6  ;;  %12347 = vmatmul.mubr.f32.vlgmr.msra.gmra.mrb[16].mxu0 %v14322_v56 }
 0x97d   : > { %12335 = vmatpush3.msra.mxu1 %v14290_v16  ;;  %12350 = vmatpush3.xpose.msra.mxu0 %v8497_v14  ;;  %v8980_v16 = vand.u32 4294901760, %v8979_v57 }
 0x97e   : > { %12336 = vmatprep.mubr.f32.mxu1 %v14300_v48  ;;  %12351 = vmatprep.mubr.f32.mxu0 %v14326_v26 }
 0x97f   : > { %12354 = vmatprep.subr.mxu0 %v14317_v19  ;;  %12369 = vmatprep.subr.mxu1 %v8911_v10 }
 0x984   : > { %12337 = vmatmul.mubr.f32.vlgmr.msra.gmra.mrb[18].mxu1 %v14306_v6  ;;  %12352 = vmatmul.mubr.f32.vlgmr.msra.gmra.mrb[16].mxu0 %v14331_v30 }
 0x985   : > { %12355 = vmatpush3.xpose.msra.mxu0 %v14317_v19  ;;  %12370 = vmatpush3.xpose.msra.mxu1 %v8911_v10 }
 0x986   : > { %12356 = vmatprep.mubr.f32.mxu0 %v8477_v31  ;;  %12359 = vmatprep.subr.mxu0 %v14336_v34 }
 0x987   : > { %12371 = vmatprep.mubr.f32.mxu1 %v8980_v16  ;;  %12374 = vmatprep.subr.mxu1 %v9001_v63 }
 0x988   : > { %12372 = vmatmul.mubr.f32.vlgmr.msra.gmra.mrb[20].mxu1 %v8990_v0 }
 0x989   : > { %12375 = vmatpush3.xpose.msra.mxu1 %v9001_v63  ;;  %12376 = vmatprep.mubr.f32.mxu1 %v8976_v23 }
 0x98a   : > { %12379 = vmatprep.subr.mxu1 %v8998_v46 }
 0x98c   : > { %12357 = vmatmul.mubr.f32.vlgmr.msra.gmra.mrb[16].mxu0 %v8487_v32 }
 0x98d   : > { %12360 = vmatpush3.xpose.msra.mxu0 %v14336_v34  ;;  %12361 = vmatprep.mubr.f32.mxu0 %v14314_v29 }
 0x98e   : > { %12364 = vmatprep.subr.mxu0 %v14317_v19 }
 0x990   : > { %12377 = vmatmul.mubr.f32.vlgmr.msra.gmra.mrb[20].mxu1 %v8986_v8 }
 0x991   : > { %12380 = vmatpush3.xpose.msra.mxu1 %v8998_v46  ;;  %12381 = vmatprep.mubr.f32.mxu1 %v8977_v25 }
 0x992   : > { %12384 = vmatprep.subr.mxu1 %v8911_v10 }
 0x994   : > { %12362 = vmatmul.mubr.f32.vlgmr.msra.gmra.mrb[16].mxu0 %v14322_v56 }
 0x995   : > { %12365 = vmatpush3.xpose.msra.mxu0 %v14317_v19  ;;  %12366 = vmatprep.mubr.f32.mxu0 %v14314_v29 }
 0x998   : > { %12382 = vmatmul.mubr.f32.vlgmr.msra.gmra.mrb[20].mxu1 %v8987_v51 }
 0x999   : > { %12385 = vmatpush3.xpose.msra.mxu1 %v8911_v10  ;;  %12386 = vmatprep.mubr.f32.mxu1 %v8978_v52 }
 0x99a   : > { %12389 = vmatprep.subr.mxu1 %v8999_v53 }
 0x99c   : > { %12367 = vmatmul.mubr.f32.vlgmr.msra.gmra.mrb[16].mxu0 %v14322_v56 }
 0x9a0   : > { %12387 = vmatmul.mubr.f32.vlgmr.msra.gmra.mrb[20].mxu1 %v8988_v55 }
 0x9a1   : > { %12390 = vmatpush3.xpose.msra.mxu1 %v8999_v53  ;;  %12391 = vmatprep.mubr.f32.mxu1 %v8976_v23 }
 0x9a2   : > { %12394 = vmatprep.subr.mxu1 %v8911_v10 }
 0x9a8   : > { %12392 = vmatmul.mubr.f32.vlgmr.msra.gmra.mrb[20].mxu1 %v8986_v8 }
 0x9a9   : > { %12395 = vmatpush3.xpose.msra.mxu1 %v8911_v10  ;;  %12396 = vmatprep.mubr.f32.mxu1 %v8976_v23 }
 0x9b0   : > { %12397 = vmatmul.mubr.f32.vlgmr.msra.gmra.mrb[20].mxu1 %v8986_v8 }
 0xa43   : > { %v12308_v48 = vpop.f32.mrb[14].mxu0 }
 0xa44   : > { %v7864_v1 = vpop.f32.mrb[15].mxu0 }
 0xa57   : > { %v12338_v2 = vpop.f32.mrb[18].mxu1 }
 0xa58   : > { %v8362_v3 = vpop.f32.mrb[19].mxu1 }
 0xa6f   : > { %v12368_v4 = vpop.f32.mrb[16].mxu0 }
 0xa70   : > { %v8888_v5 = vpop.f32.mrb[17].mxu0  ;;  %v9402_v6 = vsel %vm2210_vm1, %v12368_v4, -inf }
 0xa71   : > { %9403 = vmax.xlane.f32.xlu1 %v9402_v6  ;;  %v9399_v7 = vsel %vm2210_vm1, %v8888_v5, -inf }
 0xa72   : > { %9400 = vmax.xlane.f32.xlu0 %v9399_v7 }
 0xa83   : > { %v12398_v62 = vpop.f32.mrb[20].mxu1 }
 0xa84   : > { %v9389_v54 = vpop.f32.mrb[21].mxu1  ;;  %v9408_v13 = vsel %vm2210_vm1, %v12398_v62, -inf }
 0xa85   : > { %v9405_v9 = vsel %vm2210_vm1, %v9389_v54, -inf }
 0xa86   : > { %9406 = vmax.xlane.f32.xlu0 %v9405_v9 }
 0xa8a   : > { %9409 = vmax.xlane.f32.xlu0 %v9408_v13 }
 0xafe   : > { %v9404_v17 = vpop.xlane.xlu1 %9403 }
 0xaff   : > { %v9412_v20 = vsub.f32 %v12368_v4, %v9404_v17  ;;  %v9401_v24 = vpop.xlane.xlu0 %9400 }
 0xb00   : > { %v9411_v28 = vsub.f32 %v8888_v5, %v9401_v24 }
 0xb01   : > { %v9417_v15 = vmul.f32 1.442695, %v9412_v20 }
 0xb02   : > { %v9415_v29 = vmul.f32 1.442695, %v9411_v28 }
 0xb03   : > { %13116 = vpow2.f32 %v9417_v15 }
 0xb04   : > { %13118 = vpow2.f32 %v9415_v29 }
 0xb0d   : > { %v13117_v12 = vpop.eup %13116 }
 0xb0e   : > { %v13119_v19 = vpop.eup %13118  ;;  %v9426_v56 = vsel %vm2210_vm1, %v13117_v12, 0.0 }
 0xb0f   : > { %9427 = vadd.xlane.f32.xlu1 %v9426_v56  ;;  %v9423_v26 = vsel %vm2210_vm1, %v13119_v19, 0.0 }
 0xb10   : > { %9424 = vadd.xlane.f32.xlu0 %v9423_v26 }
 0xb13   : > { %v9407_v14 = vpop.xlane.xlu0 %9406 }
 0xb14   : > { %v9413_v30 = vsub.f32 %v9389_v54, %v9407_v14 }
 0xb16   : > { %v9419_v31 = vmul.f32 1.442695, %v9413_v30 }
 0xb17   : > { %v9410_v34 = vpop.xlane.xlu0 %9409 }
 0xb18   : > { %13120 = vpow2.f32 %v9419_v31  ;;  %v9414_v11 = vsub.f32 %v12398_v62, %v9410_v34 }
 0xb1a   : > { %v9421_v32 = vmul.f32 1.442695, %v9414_v11 }
 0xb1c   : > { %13122 = vpow2.f32 %v9421_v32 }
 0xb22   : > { %v13121_v35 = vpop.eup %13120 }
 0xb23   : > { %v9429_v21 = vsel %vm2210_vm1, %v13121_v35, 0.0 }
 0xb24   : > { %9430 = vadd.xlane.f32.xlu0 %v9429_v21 }
 0xb26   : > { %v14384_v37 = vpop.eup %13122 }
 0xb27   : > { %v9432_v47 = vsel %vm2210_vm1, %v14384_v37, 0.0 }
 0xb28   : > { %9433 = vadd.xlane.f32.xlu1 %v9432_v47 }
 0xb39   : > { %9945 = vrot.lane.b32.xlu1 %v13971_v43, %s13398_s10 }
 0xb3a   : > { %9447 = vrot.lane.b32.xlu0 %v13973_v44, %s13398_s10 }
 0xb3d   : > { %6305 = vrot.lane.b32.xlu1 %v14241_v33, %s13399_s13 }
 0xb3e   : > { %8376 = vrot.lane.b32.xlu0 %v7864_v1, %s13400_s24 }
 0xb41   : > { %6307 = vrot.lane.b32.xlu1 %v14239_v27, %s13399_s13 }
 0xb42   : > { %6309 = vrot.lane.b32.xlu0 %v14245_v45, %s13399_s13 }
 0xb45   : > { %8378 = vrot.lane.b32.xlu1 %v12308_v48, %s13400_s24 }
 0xb46   : > { %8380 = vrot.lane.b32.xlu0 %v8362_v3, %s13400_s24 }
 0xb49   : > { %6311 = vrot.lane.b32.xlu1 %v14243_v36, %s13399_s13 }
 0xb4d   : > { %8382 = vrot.lane.b32.xlu1 %v12338_v2, %s13400_s24 }
 0xb9c   : > { %v9428_v43 = vpop.xlane.xlu1 %9427 }
 0xb9d   : > { %13124 = vrcp.f32 %v9428_v43  ;;  %v9425_v44 = vpop.xlane.xlu0 %9424 }
 0xb9e   : > { %13126 = vrcp.f32 %v9425_v44 }
 0xba7   : > { %v13125_v38 = vpop.eup %13124 }
 0xba8   : > { %v13127_v33 = vpop.eup %13126  ;;  %v9444_v39 = vmul.f32 %v13125_v38, %v13117_v12 }
 0xba9   : > { %v9443_v40 = vmul.f32 %v13127_v33, %v13119_v19 }
 0xbaa   : > { %v9454_v18 = vsel %vm2210_vm1, %v9444_v39, 0  ;;  %v10472_v39 = vld [vmem:[#allocation12] sm:$0xff] }
 0xbab   : > { %v9451_v27 = vsel %vm2210_vm1, %v9443_v40, 0  ;;  %v14402_v22 = vand.u32 4294901760, %v9454_v18  ;;  %v10473_v40 = vld [vmem:[#allocation12 + $0x8] sm:$0xff] }
 0xbac   : > { %v14404_v45 = vand.u32 4294901760, %v9451_v27 }
 0xbad   : > { %v14407_v41 = vsub.f32 %v9454_v18, %v14402_v22  ;;  %v10474_v18 = vld [vmem:[#allocation12 + $0x10] sm:$0xff] }
 0xbae   : > { %v14410_v36 = vsub.f32 %v9451_v27, %v14404_v45  ;;  %v10496_v27 = vand.u32 4294901760, %v10472_v39 }
 0xbaf   : > { %v9534_v23 = vand.u32 4294901760, %v14407_v41 }
 0xbb0   : > { %v9524_v42 = vand.u32 4294901760, %v14410_v36 }
 0xbb1   : > { %v9431_v10 = vpop.xlane.xlu0 %9430  ;;  %v9535_v46 = vsub.f32 %v14407_v41, %v9534_v23 }
 0xbb2   : > { %13128 = vrcp.f32 %v9431_v10  ;;  %v9525_v8 = vsub.f32 %v14410_v36, %v9524_v42 }
 0xbb3   : > { %v9536_v57 = vand.u32 4294901760, %v9535_v46 }
 0xbb4   : > { %v9526_v25 = vand.u32 4294901760, %v9525_v8 }
 0xbb5   : > { %v9448_v51 = vpop.permute.xlu0 %9447  ;;  %v9434_v52 = vpop.xlane.xlu1 %9433 }
 0xbb6   : > { %v14420_v53 = vand.u32 4294901760, %v9448_v51  ;;  %13130 = vrcp.f32 %v9434_v52  ;;  %12401 = vmatprep.mubr.f32.mxu0 %v9526_v25  ;;  %v10606_v25 = vsub.f32 %v10472_v39, %v10496_v27 }
 0xbb8   : > { %v9544_v55 = vsub.f32 %v9448_v51, %v14420_v53  ;;  %12399 = vmatprep.subr.mxu0 %v14420_v53  ;;  %v10607_v51 = vand.u32 4294901760, %v10606_v25 }
 0xbb9   : > { %12400 = vmatpush3.msra.mxu0 %v14420_v53  ;;  %v8377_v59 = vpop.permute.xlu0 %8376  ;;  %v9946_v61 = vpop.permute.xlu1 %9945 }
 0xbba   : > { %v14425_v16 = vand.u32 4294901760, %v9946_v61  ;;  %12402 = vmatmul.mubr.f32.vlgmr.msra.gmra.mrb[18].mxu0 %v9536_v57  ;;  %v14427_v63 = vand.u32 4294901760, %v9544_v55  ;;  %v8388_v54 = vadd.f32 %v13926_v50, %v8377_v59 }
 0xbbb   : > { %12406 = vmatprep.mubr.f32.mxu0 %v14404_v45 }
 0xbbc   : > { %v13129_v0 = vpop.eup %13128  ;;  %v14431_v48 = vsub.f32 %v9946_v61, %v14425_v16  ;;  %12429 = vmatprep.subr.mxu1 %v14425_v16  ;;  %v9546_v1 = vsub.f32 %v9544_v55, %v14427_v63 }
 0xbbd   : > { %v9445_v2 = vmul.f32 %v13129_v0, %v13121_v35  ;;  %v6310_v3 = vpop.permute.xlu0 %6309  ;;  %12430 = vmatpush3.msra.mxu1 %v14425_v16  ;;  %v6306_v4 = vpop.permute.xlu1 %6305 }
 0xbbe   : > { %v6319_v5 = vadd.f32 %v13932_v60, %v6310_v3  ;;  %v6317_v6 = vadd.f32 %v13926_v50, %v6306_v4  ;;  %v9547_v7 = vand.u32 4294901760, %v9546_v1  ;;  %v14439_v62 = vand.u32 4294901760, %v14431_v48 }
 0xbbf   : > { %v9949_v9 = vsel %vm2210_vm1, %v9445_v2, 0 }
 0xbc0   : > { %v13131_v13 = vpop.eup %13130  ;;  %6324 = vst.msk [vmem:[#allocation2 + $0x10] sm:$0xff] %vm6321_vm2, %v6319_v5  ;;  %6322 = vst.msk [vmem:[#allocation2] sm:$0xff] %vm6321_vm2, %v6317_v6  ;;  %12404 = vmatprep.subr.mxu0 %v9547_v7  ;;  %v10044_v17 = vsub.f32 %v14431_v48, %v14439_v62  ;;  %v14447_v20 = vand.u32 4294901760, %v9949_v9 }
 0xbc1   : > { %v9446_v24 = vmul.f32 %v13131_v13, %v14384_v37  ;;  %v8381_v28 = vpop.permute.xlu0 %8380  ;;  %8393 = vst.msk [vmem:[#allocation2] sm:$0xff] %vm8392_vm3, %v8388_v54  ;;  %12405 = vmatpush3.msra.mxu0 %v9547_v7  ;;  %v6308_v15 = vpop.permute.xlu1 %6307 }
 0xbc2   : > { %v8390_v29 = vadd.f32 %v13932_v60, %v8381_v28  ;;  %v6318_v12 = vadd.f32 %v13924_v49, %v6308_v15  ;;  %12407 = vmatmul.mubr.f32.vlgmr.msra.gmra.mrb[18].mxu0 %v14402_v22  ;;  %12409 = vmatprep.subr.mxu0 %v9544_v55  ;;  %v10045_v19 = vand.u32 4294901760, %v10044_v17  ;;  %v10021_v56 = vsub.f32 %v9949_v9, %v14447_v20 }
 0xbc3   : > { %12410 = vmatpush3.msra.mxu0 %v9544_v55  ;;  %12411 = vmatprep.mubr.f32.mxu0 %v14410_v36  ;;  %v9952_v26 = vsel %vm2210_vm1, %v9446_v24, 0 }
 0xbc4   : > { %8395 = vst.msk [vmem:[#allocation2 + $0x10] sm:$0xff] %vm8392_vm3, %v8390_v29  ;;  %12414 = vmatprep.subr.mxu0 %v14420_v53  ;;  %12434 = vmatprep.subr.mxu1 %v10045_v19  ;;  %v10022_v14 = vand.u32 4294901760, %v10021_v56  ;;  %v10030_v30 = vand.u32 4294901760, %v9952_v26 }
 0xbc5   : > { %6323 = vst.msk [vmem:[#allocation2 + $0x8] sm:$0xff] %vm6321_vm2, %v6318_v12  ;;  %v8379_v31 = vpop.permute.xlu1 %8378 }
 0xbc6   : > { %v8389_v34 = vadd.f32 %v13924_v49, %v8379_v31  ;;  %v10023_v11 = vsub.f32 %v10021_v56, %v10022_v14  ;;  %v10031_v32 = vsub.f32 %v9952_v26, %v10030_v30 }
 0xbc8   : > { %8394 = vst.msk [vmem:[#allocation2 + $0x8] sm:$0xff] %vm8392_vm3, %v8389_v34  ;;  %v10024_v35 = vand.u32 4294901760, %v10023_v11  ;;  %v10032_v21 = vand.u32 4294901760, %v10031_v32 }
 0xbc9   : > { %v6312_v37 = vpop.permute.xlu1 %6311 }
 0xbca   : > { %v6320_v47 = vadd.f32 %v13930_v58, %v6312_v37  ;;  %12412 = vmatmul.mubr.f32.vlgmr.msra.gmra.mrb[18].mxu0 %v14407_v41  ;;  %12431 = vmatprep.mubr.f32.mxu1 %v10024_v35  ;;  %v10033_v43 = vsub.f32 %v10031_v32, %v10032_v21  ;;  %v10475_v41 = vld [vmem:[#allocation12 + $0x18] sm:$0xff] }
 0xbcb   : > { %12415 = vmatpush3.msra.mxu0 %v14420_v53  ;;  %12416 = vmatprep.mubr.f32.mxu0 %v9524_v42  ;;  %v10505_v36 = vand.u32 4294901760, %v10475_v41 }
 0xbcc   : > { %6325 = vst.msk [vmem:[#allocation2 + $0x18] sm:$0xff] %vm6321_vm2, %v6320_v47  ;;  %12419 = vmatprep.subr.mxu0 %v14427_v63  ;;  %v10034_v44 = vand.u32 4294901760, %v10033_v43 }
 0xbcd   : > { %v8383_v38 = vpop.permute.xlu1 %8382 }
 0xbce   : > { %v8391_v33 = vadd.f32 %v13930_v58, %v8383_v38  ;;  %12432 = vmatmul.mubr.f32.vlgmr.msra.gmra.mrb[22].mxu1 %v10034_v44 }
 0xbcf   : > { %12435 = vmatpush3.msra.mxu1 %v10045_v19  ;;  %12436 = vmatprep.mubr.f32.mxu1 %v14447_v20 }
 0xbd0   : > { %8396 = vst.msk [vmem:[#allocation2 + $0x18] sm:$0xff] %vm8392_vm3, %v8391_v33  ;;  %12439 = vmatprep.subr.mxu1 %v14431_v48 }
 0xbd2   : > { %12417 = vmatmul.mubr.f32.vlgmr.msra.gmra.mrb[18].mxu0 %v9534_v23 }
 0xbd3   : > { %12420 = vmatpush3.msra.mxu0 %v14427_v63  ;;  %12421 = vmatprep.mubr.f32.mxu0 %v14404_v45 }
 0xbd4   : > { %12424 = vmatprep.subr.mxu0 %v14420_v53 }
 0xbd6   : > { %12437 = vmatmul.mubr.f32.vlgmr.msra.gmra.mrb[22].mxu1 %v10030_v30 }
 0xbd7   : > { %12440 = vmatpush3.msra.mxu1 %v14431_v48  ;;  %12441 = vmatprep.mubr.f32.mxu1 %v10021_v56  ;;  %v10627_v48 = vsub.f32 %v10475_v41, %v10505_v36 }
 0xbd8   : > { %12444 = vmatprep.subr.mxu1 %v14425_v16 }
 0xbd9   : > { %v10628_v2 = vand.u32 4294901760, %v10627_v48 }
 0xbda   : > { %12422 = vmatmul.mubr.f32.vlgmr.msra.gmra.mrb[18].mxu0 %v14402_v22 }
 0xbdb   : > { %12425 = vmatpush3.msra.mxu0 %v14420_v53  ;;  %12426 = vmatprep.mubr.f32.mxu0 %v14404_v45  ;;  %v10499_v45 = vand.u32 4294901760, %v10473_v40  ;;  %v10608_v53 = vsub.f32 %v10606_v25, %v10607_v51  ;;  %v10629_v4 = vsub.f32 %v10627_v48, %v10628_v2 }
 0xbdd   : > { %v14491_v42 = vpack.c.bf16 %v10499_v45, %v10496_v27  ;;  %v10613_v46 = vsub.f32 %v10473_v40, %v10499_v45  ;;  %v10609_v57 = vand.u32 4294901760, %v10608_v53  ;;  %v10630_v6 = vand.u32 4294901760, %v10629_v4 }
 0xbde   : > { %12442 = vmatmul.mubr.f32.vlgmr.msra.gmra.mrb[22].mxu1 %v10031_v32 }
 0xbdf   : > { %12445 = vmatpush3.msra.mxu1 %v14425_v16  ;;  %12446 = vmatprep.mubr.f32.mxu1 %v10022_v14  ;;  %v10614_v52 = vand.u32 4294901760, %v10613_v46 }
 0xbe0   : > { %12449 = vmatprep.subr.mxu1 %v14439_v62  ;;  %12688 = vmatprep.subr.bf16.mxu0 %v14491_v42 }
 0xbe1   : > { %v10615_v55 = vsub.f32 %v10613_v46, %v10614_v52  ;;  %v14499_v9 = vpack.c.bf16 %v10614_v52, %v10607_v51 }
 0xbe2   : > { %12427 = vmatmul.mubr.f32.vlgmr.msra.gmra.mrb[18].mxu0 %v14402_v22  ;;  %v10502_v22 = vand.u32 4294901760, %v10474_v18 }
 0xbe3   : > { %12690 = vmatpush3.bf16.msra.mxu0 %v14491_v42  ;;  %v10616_v59 = vand.u32 4294901760, %v10615_v55 }
 0xbe4   : > { %v14493_v23 = vpack.c.bf16 %v10505_v36, %v10502_v22  ;;  %v10620_v0 = vsub.f32 %v10474_v18, %v10502_v22 }
 0xbe5   : > { %v12695_v61 = vpack.c.bf16 %v10616_v59, %v10609_v57 }
 0xbe6   : > { %12447 = vmatmul.mubr.f32.vlgmr.msra.gmra.mrb[22].mxu1 %v10032_v21  ;;  %12692 = vmatprep.subr.bf16.mxu0 %v14493_v23  ;;  %v10621_v1 = vand.u32 4294901760, %v10620_v0  ;;  %v12707_v54 = vpack.c.bf16 %v10627_v48, %v10620_v0 }
 0xbe7   : > { %12450 = vmatpush3.msra.mxu1 %v14439_v62  ;;  %12451 = vmatprep.mubr.f32.mxu1 %v14447_v20  ;;  %v12703_v62 = vpack.c.bf16 %v10613_v46, %v10606_v25 }
 0xbe8   : > { %12454 = vmatprep.subr.mxu1 %v14425_v16  ;;  %12694 = vmatpush3.bf16.msra.mxu0 %v14493_v23  ;;  %v10622_v3 = vsub.f32 %v10620_v0, %v10621_v1  ;;  %v14501_v13 = vpack.c.bf16 %v10628_v2, %v10621_v1 }
 0xbe9   : > { %12696 = vmatprep.subr.bf16.mxu0 %v12695_v61 }
 0xbea   : > { %v10623_v5 = vand.u32 4294901760, %v10622_v3 }
 0xbec   : > { %v12699_v7 = vpack.c.bf16 %v10630_v6, %v10623_v5 }
 0xbee   : > { %12452 = vmatmul.mubr.f32.vlgmr.msra.gmra.mrb[22].mxu1 %v10030_v30 }
 0xbef   : > { %12455 = vmatpush3.msra.mxu1 %v14425_v16  ;;  %12456 = vmatprep.mubr.f32.mxu1 %v14447_v20 }
 0xbf6   : > { %12457 = vmatmul.mubr.f32.vlgmr.msra.gmra.mrb[22].mxu1 %v10030_v30 }
 0xcb5   : > { %v12428_v10 = vpop.f32.mrb[18].mxu0 }
 0xcb6   : > { %10449 = vrot.lane.b32.xlu1 %v12428_v10, %s13401_s30  ;;  %v9935_v8 = vpop.f32.mrb[19].mxu0  ;;  %v11295_v10 = vld [vmem:[%s14667_s4] ss:$0 sm:$0xff] }
 0xcb7   : > { %10447 = vrot.lane.b32.xlu0 %v9935_v8, %s13401_s30 }
 0xcc9   : > { %v12458_v16 = vpop.f32.mrb[22].mxu1 }
 0xcca   : > { %10453 = vrot.lane.b32.xlu1 %v12458_v16, %s13401_s30  ;;  %v10433_v63 = vpop.f32.mrb[23].mxu1 }
 0xccb   : > { %10451 = vrot.lane.b32.xlu0 %v10433_v63, %s13401_s30 }
 0xd28   : > { %v10450_v17 = vpop.permute.xlu1 %10449 }
 0xd29   : > { %v10460_v20 = vadd.f32 %v13924_v49, %v10450_v17  ;;  %v10448_v24 = vpop.permute.xlu0 %10447 }
 0xd2a   : > { %v10459_v28 = vadd.f32 %v13926_v50, %v10448_v24 }
 0xd2b   : > { %10465 = vst.msk [vmem:[#allocation2 + $0x8] sm:$0xff] %vm10463_vm4, %v10460_v20 }
 0xd2c   : > { %10464 = vst.msk [vmem:[#allocation2] sm:$0xff] %vm10463_vm4, %v10459_v28 }
 0xd32   : > { %v14507_v15 = vld [vmem:[#allocation2 + $0x8] sm:$0xff] }
 0xd33   : > { %v14509_v29 = vld [vmem:[#allocation2] sm:$0xff]  ;;  %v10487_v12 = vsel %vm497_vm0, %v14507_v15, 0 }
 0xd34   : > { %v10484_v19 = vsel %vm497_vm0, %v14509_v29, 0  ;;  %v14515_v56 = vand.u32 4294901760, %v10487_v12 }
 0xd35   : > { %v14517_v49 = vand.u32 4294901760, %v10484_v19 }
 0xd36   : > { %v10575_v50 = vsub.f32 %v10487_v12, %v14515_v56 }
 0xd37   : > { %v10565_v26 = vsub.f32 %v10484_v19, %v14517_v49 }
 0xd38   : > { %v10576_v14 = vand.u32 4294901760, %v10575_v50 }
 0xd39   : > { %v10566_v30 = vand.u32 4294901760, %v10565_v26 }
 0xd3a   : > { %v10577_v31 = vsub.f32 %v10575_v50, %v10576_v14 }
 0xd3b   : > { %v10567_v34 = vsub.f32 %v10565_v26, %v10566_v30 }
 0xd3c   : > { %v10454_v11 = vpop.permute.xlu1 %10453  ;;  %v10578_v47 = vand.u32 4294901760, %v10577_v31 }
 0xd3d   : > { %v10462_v32 = vadd.f32 %v13930_v58, %v10454_v11  ;;  %v10452_v35 = vpop.permute.xlu0 %10451  ;;  %v10568_v21 = vand.u32 4294901760, %v10567_v34 }
 0xd3e   : > { %v10461_v37 = vadd.f32 %v13932_v60, %v10452_v35 }
 0xd3f   : > { %10467 = vst.msk [vmem:[#allocation2 + $0x18] sm:$0xff] %vm10463_vm4, %v10462_v32  ;;  %12467 = vmatprep.mubr.f32.mxu0 %v10568_v21 }
 0xd40   : > { %10466 = vst.msk [vmem:[#allocation2 + $0x10] sm:$0xff] %vm10463_vm4, %v10461_v37  ;;  %12468 = vmatmul.mubr.f32.vlgmr.msra.gmra.mrb[20].mxu0 %v10578_v47 }
 0xd41   : > { %12698 = vmatpush3.bf16.msra.mxu0 %v12695_v61 }
 0xd42   : > { %12700 = vmatprep.subr.bf16.mxu0 %v12699_v7 }
 0xd45   : > { %12702 = vmatpush3.bf16.msra.mxu0 %v12699_v7 }
 0xd46   : > { %v14525_v43 = vld [vmem:[#allocation2 + $0x18] sm:$0xff]  ;;  %12704 = vmatprep.subr.bf16.mxu0 %v12703_v62 }
 0xd47   : > { %v14527_v44 = vld [vmem:[#allocation2 + $0x10] sm:$0xff]  ;;  %v10493_v58 = vsel %vm497_vm0, %v14525_v43, 0 }
 0xd48   : > { %v10490_v60 = vsel %vm497_vm0, %v14527_v44, 0  ;;  %v10594_v38 = vand.u32 4294901760, %v10493_v58 }
 0xd49   : > { %v10584_v33 = vand.u32 4294901760, %v10490_v60 }
 0xd4a   : > { %v10595_v39 = vsub.f32 %v10493_v58, %v10594_v38 }
 0xd4b   : > { %v10585_v40 = vsub.f32 %v10490_v60, %v10584_v33 }
 0xd4c   : > { %v10596_v18 = vand.u32 4294901760, %v10595_v39 }
 0xd4d   : > { %v10586_v27 = vand.u32 4294901760, %v10585_v40 }
 0xd4e   : > { %v10597_v45 = vsub.f32 %v10595_v39, %v10596_v18 }
 0xd4f   : > { %v10587_v41 = vsub.f32 %v10585_v40, %v10586_v27 }
 0xd50   : > { %v10598_v36 = vand.u32 4294901760, %v10597_v45 }
 0xd51   : > { %v10588_v22 = vand.u32 4294901760, %v10587_v41 }
 0xd53   : > { %12470 = vmatprep.mubr.f32.mxu0 %v10588_v22 }
 0xd54   : > { %12471 = vmatmul.mubr.f32.gmra.mrb[22].mxu0 %v10598_v36 }
 0xd55   : > { %12481 = vmatprep.mubr.f32.mxu0 %v14517_v49 }
 0xd58   : > { %12482 = vmatmul.mubr.f32.vlgmr.msra.gmra.mrb[20].mxu0 %v14515_v56 }
 0xd59   : > { %12484 = vmatprep.mubr.f32.mxu0 %v10584_v33  ;;  %12706 = vmatpush3.bf16.msra.mxu0 %v12703_v62 }
 0xd5a   : > { %12708 = vmatprep.subr.bf16.mxu0 %v12707_v54 }
 0xd5c   : > { %12485 = vmatmul.mubr.f32.gmra.mrb[22].mxu0 %v10594_v38 }
 0xd5d   : > { %12710 = vmatpush3.bf16.msra.mxu0 %v12707_v54  ;;  %12495 = vmatprep.mubr.f32.mxu0 %v10565_v26 }
 0xd5e   : > { %12712 = vmatprep.subr.bf16.mxu0 %v14491_v42 }
 0xd60   : > { %12496 = vmatmul.mubr.f32.vlgmr.msra.gmra.mrb[20].mxu0 %v10575_v50 }
 0xd61   : > { %12498 = vmatprep.mubr.f32.mxu0 %v10585_v40  ;;  %12714 = vmatpush3.bf16.msra.mxu0 %v14491_v42 }
 0xd62   : > { %12716 = vmatprep.subr.bf16.mxu0 %v14493_v23 }
 0xd64   : > { %12499 = vmatmul.mubr.f32.gmra.mrb[22].mxu0 %v10595_v39 }
 0xd65   : > { %12718 = vmatpush3.bf16.msra.mxu0 %v14493_v23  ;;  %12509 = vmatprep.mubr.f32.mxu0 %v10566_v30 }
 0xd66   : > { %12720 = vmatprep.subr.bf16.mxu0 %v14499_v9 }
 0xd68   : > { %12510 = vmatmul.mubr.f32.vlgmr.msra.gmra.mrb[20].mxu0 %v10576_v14 }
 0xd69   : > { %12512 = vmatprep.mubr.f32.mxu0 %v10586_v27  ;;  %12722 = vmatpush3.bf16.msra.mxu0 %v14499_v9 }
 0xd6a   : > { %12724 = vmatprep.subr.bf16.mxu0 %v14501_v13 }
 0xd6c   : > { %12513 = vmatmul.mubr.f32.gmra.mrb[22].mxu0 %v10596_v18 }
 0xd6d   : > { %12726 = vmatpush3.bf16.msra.mxu0 %v14501_v13  ;;  %12523 = vmatprep.mubr.f32.mxu0 %v14517_v49 }
 0xd6e   : > { %12728 = vmatprep.subr.bf16.mxu0 %v14491_v42 }
 0xd70   : > { %12524 = vmatmul.mubr.f32.vlgmr.msra.gmra.mrb[20].mxu0 %v14515_v56 }
 0xd71   : > { %12526 = vmatprep.mubr.f32.mxu0 %v10584_v33  ;;  %12730 = vmatpush3.bf16.msra.mxu0 %v14491_v42 }
 0xd72   : > { %12732 = vmatprep.subr.bf16.mxu0 %v14493_v23 }
 0xd74   : > { %12527 = vmatmul.mubr.f32.gmra.mrb[22].mxu0 %v10594_v38 }
 0xd75   : > { %12734 = vmatpush3.bf16.msra.mxu0 %v14493_v23  ;;  %12537 = vmatprep.mubr.f32.mxu0 %v14517_v49 }
 0xd78   : > { %12538 = vmatmul.mubr.f32.vlgmr.msra.gmra.mrb[20].mxu0 %v14515_v56 }
 0xd79   : > { %12540 = vmatprep.mubr.f32.mxu0 %v10584_v33 }
 0xd7c   : > { %12541 = vmatmul.mubr.f32.gmra.mrb[22].mxu0 %v10594_v38 }
 0xe4b   : > { %v12539_v8 = vpop.f32.mrb[20].mxu0 }
 0xe4c   : > { %v12747_v25 = vadd.f32 %v12539_v8, %v11295_v10  ;;  %v11087_v42 = vpop.f32.mrb[21].mxu0 }
 0xe4d   : > { %v12748_v46 = vadd.f32 %v11295_v10, %v11087_v42 }
 0xe4e   : > { %v11110_v51 = vmax.f32 %v12747_v25, 0.0 }
 0xe4f   : > { %v11109_v52 = vmax.f32 %v12748_v46, 0.0  ;;  %v12542_v53 = vpop.f32.mrb[22].mxu0 }
 0xe50   : > { %v11114_v23 = vadd.f32 %v11110_v51, %v14507_v15  ;;  %v12749_v55 = vadd.f32 %v12542_v53, %v11295_v10  ;;  %v11099_v57 = vpop.f32.mrb[23].mxu0 }
 0xe51   : > { %v11113_v59 = vadd.f32 %v11109_v52, %v14509_v29  ;;  %v12750_v61 = vadd.f32 %v11295_v10, %v11099_v57 }
 0xe52   : > { %11118 = vst.msk [vmem:[%s476_s21 + $0x8] sm:$0xff] %vm497_vm0, %v11114_v23  ;;  %v11112_v16 = vmax.f32 %v12749_v55, 0.0 }
 0xe53   : > { %11117 = vst.msk [vmem:[%s476_s21] sm:$0xff] %vm497_vm0, %v11113_v59  ;;  %v11111_v63 = vmax.f32 %v12750_v61, 0.0 }
 0xe54   : > { %v11116_v0 = vadd.f32 %v11112_v16, %v14525_v43 }
 0xe55   : > { %v11115_v48 = vadd.f32 %v11111_v63, %v14527_v44 }
 0xe56   : > { %11120 = vst.msk [vmem:[%s476_s21 + $0x18] sm:$0xff] %vm497_vm0, %v11116_v0 }
 0xe57   : > { %11119 = vst.msk [vmem:[%s476_s21 + $0x10] sm:$0xff] %vm497_vm0, %v11115_v48 }
 0xe58   : > { %13317 = shalt.err (!%p13314_p8)
}
 0xe59   : > { %s13318_s10 = scalar_lea.hbm %s14568_s23, 512  ;;  %s13322_s9 = scalar_lea.hbm %s14668_s25, 1024 }
 0xe5a   : > { %p13319_p11 = scmp.ne.s32.totalorder %s14568_s23, %s13318_s10  ;;  %p13323_p1 = scmp.lt.u32.totalorder %s14568_s23, %s14668_s25 }
 0xe5b   : > { %p13324_p2 = scmp.lt.u32.totalorder %s13322_s9, %s13318_s10  ;;  %p13326_p0 = scmp.lt.u32.totalorder %s13318_s10, %s14568_s23 }
 0xe5c   : > { %p13320_p7 = pnand %p13319_p11, %p13630_p10 }
 0xe5d   : > { %p13325_p13 = por %p13324_p2, %p13323_p1 }
 0xe5e   : > { %p13321_p12 = pneg %p13320_p7 }
 0xe5f   : > { %p13327_p4 = por %p13326_p0, %p13325_p13 }
 0xe61   : > { %p13328_p6 = pnand %p13327_p4, %p13321_p12 }
 0xe63   : > { %13331 = shalt.err (!%p13328_p6)
}
 0xe64   : > { %s13403_s21 = smov 128  }
 0xe65   : > { %12987 = dma.vmem_to_hbm [thread:$0]  (%p13630_p10), %s14561_s27, 512, %s14568_s23, %s11122_s17, %s13403_s21, %s13403_s21, %s13399_s13  }
 0xe66 PF: > { %s14669_s19 = sld [smem:[#allocation21_spill]]  ;;  %s14670_s11 = sld [smem:[#allocation22_spill]] }
 0xe67   : > { %p14672_p5 = scmp.ge.s32.totalorder %s13386_s16, 2 }
 0xe6c   : > { %s11151_s29 = sand.u32 1, %s14669_s19   ;;  %p14671_p3 = scmp.ne.s32.totalorder %s14670_s11, 0 }
 0xe6d   : > { %s11152_s18 = scalar_lea.sflag [#allocation5], %s11151_s29 }
 0xe6e   : > { %p13010_p9 = pnand %p14672_p5, %p14671_p3 }
 0xe70   : > { %13369 = dma.done.wait (!%p13010_p9), %s11152_s18, 512  }
 0xe71   : > { %13371 = vsyncadd (!%p13010_p9), %s11152_s18, 4294966784  ;;  %p28_p8 = scmp.ge.s32.totalorder %s13620_s22, 4   ;;  %s14673_s13 = smov %s13378_s14 }
 0xe72   : > { %s14674_s14 = smov %s13382_s15  ;;  %s14675_s15 = smov %s13636_s12 }
 0xe73   : > { %s14676_s16 = smov %s13620_s22  ;;  %30 = sbr.rel (!%p28_p8) target bundleno = 16 (0x10), region = 134 }
 0xe7a   :  { %11157 = vsyncpa [#allocation4], 1 }
 0xe7b   :  { %11159 = vsyncpa [#allocation4 + $0x1], 1 }
 0xe7c   :  { %11160 = vsyncpa [#allocation7], 1 }
 0xe7d   :  { %11162 = vsyncpa [#allocation7 + $0x1], 1 }
 0xe7e   :  { %11163 = vsyncpa [#allocation10], 1 }
 0xe7f   :  { %11164 = vsyncpa [#allocation13], 1 }
 0xe80   :  { %11165 = vsyncpa [#allocation5], 1 }
 0xe81   :  { %11167 = vsyncpa [#allocation5 + $0x1], 1 }

</bundles_post_ra>
